<compile_context>
chip_gen: v7x
topology: tpu7x:2x2x1
jax: 0.10.0
libtpu: 0.0.40
codegen_flags: <defaults>
</compile_context>

<pallas_src>
import functools

import jax
import jax.numpy as jnp
from jax.experimental import pallas as pl
from jax.experimental.pallas import tpu as pltpu


_PITCH = 16            # row pitch of the flattened 10x10 conv1 slab (16-aligned)
_SROWS = 10 * _PITCH   # 160 rows per sample at every stage


# ----------------------------------------------------------------------------
# Fused conv1+conv2+conv3 (+ReLU) kernel.  One grid step = B batch samples.
#
# Per-sample row layout (pitch 16, pitch 160 between samples):
#   conv1 slab row u*16+v   = conv1 output at (2u+sh, 2v+sw)   (phase on lanes)
#   conv2 slab row p*16+q   = conv2 output at (p, q)
#   conv3 slab row r*16+c   = conv3 output at (r, c)
# Junk rows (v/q/c >= valid extent, inter-sample slack) are provably never read
# by any valid downstream tap and are dropped in the wrapper.
# ----------------------------------------------------------------------------
def _fused_dqn_kernel(xw_ref, w1_ref, b1_ref, w2_ref, b2_ref, w3_ref, b3_ref,
                      out_ref, l1_ref, l2_ref):
    f32 = jnp.float32
    cdt = l1_ref.dtype                      # MXU operand dtype (bf16)
    m1 = l1_ref.shape[0]                    # B*160
    m2 = l2_ref.shape[0]                    # B*160 - 16
    m3 = out_ref.shape[1]                   # B*160 - 48

    # ---- conv1 + ReLU: 4 stride-phase matmuls, K = 64*Cin -------------------
    # w1_ref[p] only occupies output lanes [32p, 32p+32), so the four phase
    # outputs are packed onto the 128-lane axis by the MXU itself.
    acc1 = jnp.dot(xw_ref[0, 0], w1_ref[0], preferred_element_type=f32)
    for p in range(1, 4):
        acc1 = acc1 + jnp.dot(xw_ref[0, p], w1_ref[p], preferred_element_type=f32)
    v1 = jnp.maximum(acc1 + b1_ref[...], 0.0)                      # (m1,128) f32
    # l1x[r] = [l1[r] | l1[r+1]]   (wrap row is never read by a valid output)
    v1s = jnp.concatenate([v1[1:], v1[:1]], axis=0)
    l1_ref[...] = jnp.concatenate([v1.astype(cdt), v1s.astype(cdt)], axis=1)

    # ---- conv2 + ReLU: 2 matmuls, K = 256 (4 phases x 32ch x 2 width taps) --
    acc2 = jnp.dot(l1_ref[0:m2], w2_ref[0], preferred_element_type=f32)
    acc2 = acc2 + jnp.dot(l1_ref[16:16 + m2], w2_ref[1], preferred_element_type=f32)
    v2 = jnp.maximum(acc2 + b2_ref[...], 0.0)                      # (m2,64) f32
    # l2x[r] = [l2[r] | l2[r+1] | l2[r+2]]
    v2a = jnp.concatenate([v2[1:], v2[:1]], axis=0)
    v2b = jnp.concatenate([v2[2:], v2[:2]], axis=0)
    l2_ref[...] = jnp.concatenate(
        [v2.astype(cdt), v2a.astype(cdt), v2b.astype(cdt)], axis=1)

    # ---- conv3 + ReLU: 3 matmuls, K = 192 (3 width taps x 64ch) -------------
    acc3 = jnp.dot(l2_ref[0:m3], w3_ref[0], preferred_element_type=f32)
    acc3 = acc3 + jnp.dot(l2_ref[16:16 + m3], w3_ref[1], preferred_element_type=f32)
    acc3 = acc3 + jnp.dot(l2_ref[32:32 + m3], w3_ref[2], preferred_element_type=f32)
    out_ref[0] = jnp.maximum(acc3 + b3_ref[...], 0.0).astype(out_ref.dtype)


# ----------------------------------------------------------------------------
# Wrapper-side glue
# ----------------------------------------------------------------------------
def _conv1_patches(x, compute_dtype):
    """(N,84,84,Cin) -> (N, 4, 160, 64*Cin) per-stride-phase im2col, row pitch 16.

    out[n, sh*2+sw, u*16+v, kh*8*Cin + kw*Cin + ci] = x[n, 4*(2u+sh)+kh, 4*(2v+sw)+kw, ci]
    """
    N, H, W, Cin = x.shape
    K1 = 64 * Cin
    xp = jnp.pad(x, ((0, 0), (0, 88 - H), (0, 88 - W), (0, 0)))
    # width: columns 4*(2v+sw)+kw = 8v + 4sw + kw packed into the kw axis.
    xw8 = xp.reshape(N, 88, 11, 8, Cin)
    w_sw0 = xw8[:, :, 0:10]
    w_sw1 = jnp.concatenate([xw8[:, :, 0:10, 4:8], xw8[:, :, 1:11, 0:4]], axis=3)
    xc = jnp.stack([w_sw0, w_sw1], axis=2)          # (n, h, sw, v, kw, ci)
    # height: rows 4*(2u+sh)+kh = 8u + 4sh + kh packed into the kh axis.
    xh8 = xc.reshape(N, 11, 8, 2, 10, 8, Cin)       # (n, hu, kh, sw, v, kw, ci)
    h_sh0 = xh8[:, 0:10]
    h_sh1 = jnp.concatenate([xh8[:, 0:10, 4:8], xh8[:, 1:11, 0:4]], axis=2)
    xf = jnp.stack([h_sh0, h_sh1], axis=1)          # (n, sh, u, kh, sw, v, kw, ci)
    xf = xf.transpose(0, 1, 4, 2, 5, 3, 6, 7)       # (n, sh, sw, u, v, kh, kw, ci)
    xf = xf.reshape(N, 4, 10, 10, K1)
    xf = jnp.pad(xf, ((0, 0), (0, 0), (0, 0), (0, _PITCH - 10), (0, 0)))
    return xf.reshape(N, 4, _SROWS, K1).astype(compute_dtype)


def _pack_weights(params, compute_dtype):
    w1, b1 = params["conv1_w"], params["conv1_b"]
    w2, b2 = params["conv2_w"], params["conv2_b"]
    w3, b3 = params["conv3_w"], params["conv3_b"]
    Cin = w1.shape[1]
    K1 = 64 * Cin
    f32 = jnp.float32

    # conv1: w1pack[p][k, 32p+co] = w1m[k, co]  (phase outputs on lane bands)
    w1m = w1.transpose(2, 3, 1, 0).reshape(K1, 32).astype(f32)
    w1p = jnp.zeros((4, K1, 128), f32)
    for p in range(4):
        w1p = w1p.at[p, :, 32 * p:32 * (p + 1)].set(w1m)
    b1t = jnp.tile(b1.astype(f32), 4).reshape(1, 128)

    # conv2: w2pack[a][b*128 + (sh*2+sw)*32 + ci, co] = w2[co, ci, 2a+sh, 2b+sw]
    w2t = w2.transpose(2, 3, 1, 0).reshape(2, 2, 2, 2, 32, 64)  # (a,sh,b,sw,ci,co)
    w2p = w2t.transpose(0, 2, 1, 3, 4, 5).reshape(2, 256, 64)
    b2m = b2.astype(f32).reshape(1, 64)

    # conv3: w3pack[kh][kw*64 + ci, co] = w3[co, ci, kh, kw]
    w3p = w3.transpose(2, 3, 1, 0).reshape(3, 192, 64)
    b3m = b3.astype(f32).reshape(1, 64)

    return (w1p.astype(compute_dtype), b1t, w2p.astype(compute_dtype), b2m,
            w3p.astype(compute_dtype), b3m)


@functools.partial(jax.jit, static_argnames=("group", "compute_dtype"))
def mario_dqn_forward(x_nhwc, params, *, group=8, compute_dtype=jnp.bfloat16):
    N, H, W, Cin = x_nhwc.shape
    assert H == 84 and W == 84, "geometry fixed by fc4 (84x84 DQN input)"
    K1 = 64 * Cin

    # B samples per grid step; keep >= 2 grid steps when N >= 2 (v7x: 2 TCs).
    B = max(1, min(group, (N + 1) // 2))
    G = (N + B - 1) // B
    Np = G * B

    xw = _conv1_patches(x_nhwc, compute_dtype)               # (N, 4, 160, K1)
    if Np != N:
        xw = jnp.pad(xw, ((0, Np - N), (0, 0), (0, 0), (0, 0)))
    xw = xw.reshape(G, B, 4, _SROWS, K1).transpose(0, 2, 1, 3, 4)
    xw = xw.reshape(G, 4, B * _SROWS, K1)

    w1p, b1t, w2p, b2m, w3p, b3m = _pack_weights(params, compute_dtype)

    M1 = B * _SROWS
    M2 = M1 - 16
    M3 = M1 - 48

    out = pl.pallas_call(
        _fused_dqn_kernel,
        out_shape=jax.ShapeDtypeStruct((G, M3, 64), jnp.float32),
        grid=(G,),
        in_specs=[
            pl.BlockSpec((1, 4, M1, K1), lambda n: (n, 0, 0, 0)),
            pl.BlockSpec((4, K1, 128), lambda n: (0, 0, 0)),
            pl.BlockSpec((1, 128), lambda n: (0, 0)),
            pl.BlockSpec((2, 256, 64), lambda n: (0, 0, 0)),
            pl.BlockSpec((1, 64), lambda n: (0, 0)),
            pl.BlockSpec((3, 192, 64), lambda n: (0, 0, 0)),
            pl.BlockSpec((1, 64), lambda n: (0, 0)),
        ],
        out_specs=pl.BlockSpec((1, M3, 64), lambda n: (n, 0, 0)),
        scratch_shapes=[
            pltpu.VMEM((M1, 256), compute_dtype),  # l1x: 4 phases x32ch, 2 width taps
            pltpu.VMEM((M2, 192), compute_dtype),  # l2x: 64ch, 3 width taps
        ],
        compiler_params=pltpu.CompilerParams(
            dimension_semantics=("parallel",)),
    )(xw, w1p, b1t, w2p, b2m, w3p, b3m)

    # pitch-16 slabs -> NCHW (N, 64, 7, 7)
    out = jnp.pad(out, ((0, 0), (0, B * _SROWS - M3), (0, 0)))
    out = out.reshape(G, B, 10, _PITCH, 64)[:, :, :7, :7, :]
    out = out.reshape(Np, 7, 7, 64)[:N]
    return jnp.transpose(out, (0, 3, 1, 2)).astype(x_nhwc.dtype)


# ----------------------------------------------------------------------------
# Parameter init (matches nn.Conv2d / nn.Linear default uniform init bounds)
# ----------------------------------------------------------------------------
def init_params(key, in_channels=1, n_actions=6, dtype=jnp.float32):
    ks = jax.random.split(key, 10)

    def uinit(k, shape, fan_in):
        bound = 1.0 / jnp.sqrt(fan_in)
        return jax.random.uniform(k, shape, dtype, -bound, bound)

    return {
        "conv1_w": uinit(ks[0], (32, in_channels, 8, 8), in_channels * 8 * 8),
        "conv1_b": uinit(ks[1], (32,), in_channels * 8 * 8),
        "conv2_w": uinit(ks[2], (64, 32, 4, 4), 32 * 4 * 4),
        "conv2_b": uinit(ks[3], (64,), 32 * 4 * 4),
        "conv3_w": uinit(ks[4], (64, 64, 3, 3), 64 * 3 * 3),
        "conv3_b": uinit(ks[5], (64,), 64 * 3 * 3),
        # fc4 / head exist in __init__ but are unused by forward; kept for parity.
        "fc4_w": uinit(ks[6], (512, 7 * 7 * 64), 7 * 7 * 64),
        "fc4_b": uinit(ks[7], (512,), 7 * 7 * 64),
        "head_w": uinit(ks[8], (n_actions, 512), 512),
        "head_b": uinit(ks[9], (n_actions,), 512),
    }


# ----------------------------------------------------------------------------
# Reference with matched precision: bf16 MXU operands, f32 accumulation,
# f32 bias/ReLU, activations re-cast to bf16 between layers (same as kernel).
# ----------------------------------------------------------------------------
def ref_forward(x_nhwc, params, compute_dtype=jnp.bfloat16):
    x = jnp.transpose(x_nhwc, (0, 3, 1, 2)).astype(jnp.float32)
    for w, b, s in [
        (params["conv1_w"], params["conv1_b"], 4),
        (params["conv2_w"], params["conv2_b"], 2),
        (params["conv3_w"], params["conv3_b"], 1),
    ]:
        x = jax.lax.conv_general_dilated(
            x.astype(compute_dtype), w.astype(compute_dtype),
            window_strides=(s, s), padding="VALID",
            dimension_numbers=("NCHW", "OIHW", "NCHW"),
            preferred_element_type=jnp.float32)
        x = jax.nn.relu(x + b[None, :, None, None].astype(jnp.float32))
    return x


if __name__ == "__main__":
    key = jax.random.PRNGKey(0)
    kx, kp = jax.random.split(key)

    # NHWC input; 84x84x1 matches the DQN geometry implied by fc4 (7*7*64).
    x = jax.random.uniform(kx, (4, 84, 84, 1), jnp.float32)
    params = init_params(kp, in_channels=1)

    out = mario_dqn_forward(x, params)
    out = jax.block_until_ready(out)
    assert out.shape == (4, 64, 7, 7), out.shape

    ref = ref_forward(x, params)
    err = float(jnp.max(jnp.abs(out - ref)))
    assert jnp.allclose(out, ref, atol=2e-3, rtol=2e-3), err

    print("KERNEL_OK")
</pallas_src>

<mosaic_0001>
module attributes {stable_mosaic.version = 11 : i64} {
  func.func @_fused_dqn_kernel(%arg0: i32, %arg1: memref<1x4x320x64xbf16, #tpu.memory_space<vmem>>, %arg2: memref<4x64x128xbf16, #tpu.memory_space<vmem>>, %arg3: memref<1x128xf32, #tpu.memory_space<vmem>>, %arg4: memref<2x256x64xbf16, #tpu.memory_space<vmem>>, %arg5: memref<1x64xf32, #tpu.memory_space<vmem>>, %arg6: memref<3x192x64xbf16, #tpu.memory_space<vmem>>, %arg7: memref<1x64xf32, #tpu.memory_space<vmem>>, %arg8: memref<1x272x64xf32, #tpu.memory_space<vmem>>, %arg9: memref<320x256xbf16, #tpu.memory_space<vmem>>, %arg10: memref<304x192xbf16, #tpu.memory_space<vmem>>) attributes {dimension_semantics = [#tpu.dimension_semantics<parallel>], iteration_bounds = array<i64: 2>, scalar_prefetch = 0 : i64, scratch_operands = 2 : i64, tpu.core_type = #tpu.core_type<tc>, window_params = [{transform_indices = @transform_0, window_bounds = array<i64: 1, 4, 320, 64>}, {pipeline_mode = #tpu.pipeline_mode<synchronous>, transform_indices = @transform_1, window_bounds = array<i64: 4, 64, 128>}, {pipeline_mode = #tpu.pipeline_mode<synchronous>, transform_indices = @transform_2, window_bounds = array<i64: 1, 128>}, {pipeline_mode = #tpu.pipeline_mode<synchronous>, transform_indices = @transform_3, window_bounds = array<i64: 2, 256, 64>}, {pipeline_mode = #tpu.pipeline_mode<synchronous>, transform_indices = @transform_4, window_bounds = array<i64: 1, 64>}, {pipeline_mode = #tpu.pipeline_mode<synchronous>, transform_indices = @transform_5, window_bounds = array<i64: 3, 192, 64>}, {pipeline_mode = #tpu.pipeline_mode<synchronous>, transform_indices = @transform_6, window_bounds = array<i64: 1, 64>}, {transform_indices = @transform_7, window_bounds = array<i64: 1, 272, 64>}]} {
    %c0 = arith.constant 0 : index
    %c0_0 = arith.constant 0 : index
    %c0_1 = arith.constant 0 : index
    %c0_2 = arith.constant 0 : index
    %0 = vector.load %arg1[%c0, %c0_0, %c0_1, %c0_2] : memref<1x4x320x64xbf16, #tpu.memory_space<vmem>>, vector<1x1x320x64xbf16>
    %1 = vector.shape_cast %0 : vector<1x1x320x64xbf16> to vector<320x64xbf16>
    %c0_3 = arith.constant 0 : index
    %c0_4 = arith.constant 0 : index
    %c0_5 = arith.constant 0 : index
    %2 = vector.load %arg2[%c0_3, %c0_4, %c0_5] : memref<4x64x128xbf16, #tpu.memory_space<vmem>>, vector<1x64x128xbf16>
    %3 = vector.shape_cast %2 : vector<1x64x128xbf16> to vector<64x128xbf16>
    %cst = arith.constant dense<0.000000e+00> : vector<320x128xf32>
    %4 = tpu.matmul %1, %3, %cst {dimension_numbers = #tpu.dot_dimension_numbers<[1], [0], [0], [1], [0, 0, 1, 1], [], []>} : vector<320x64xbf16>, vector<64x128xbf16>, vector<320x128xf32> -> vector<320x128xf32>
    %c0_6 = arith.constant 0 : index
    %c1 = arith.constant 1 : index
    %c0_7 = arith.constant 0 : index
    %c0_8 = arith.constant 0 : index
    %5 = vector.load %arg1[%c0_6, %c1, %c0_7, %c0_8] : memref<1x4x320x64xbf16, #tpu.memory_space<vmem>>, vector<1x1x320x64xbf16>
    %6 = vector.shape_cast %5 : vector<1x1x320x64xbf16> to vector<320x64xbf16>
    %c1_9 = arith.constant 1 : index
    %c0_10 = arith.constant 0 : index
    %c0_11 = arith.constant 0 : index
    %7 = vector.load %arg2[%c1_9, %c0_10, %c0_11] : memref<4x64x128xbf16, #tpu.memory_space<vmem>>, vector<1x64x128xbf16>
    %8 = vector.shape_cast %7 : vector<1x64x128xbf16> to vector<64x128xbf16>
    %cst_12 = arith.constant dense<0.000000e+00> : vector<320x128xf32>
    %9 = tpu.matmul %6, %8, %cst_12 {dimension_numbers = #tpu.dot_dimension_numbers<[1], [0], [0], [1], [0, 0, 1, 1], [], []>} : vector<320x64xbf16>, vector<64x128xbf16>, vector<320x128xf32> -> vector<320x128xf32>
    %10 = arith.addf %4, %9 : vector<320x128xf32>
    %c0_13 = arith.constant 0 : index
    %c2 = arith.constant 2 : index
    %c0_14 = arith.constant 0 : index
    %c0_15 = arith.constant 0 : index
    %11 = vector.load %arg1[%c0_13, %c2, %c0_14, %c0_15] : memref<1x4x320x64xbf16, #tpu.memory_space<vmem>>, vector<1x1x320x64xbf16>
    %12 = vector.shape_cast %11 : vector<1x1x320x64xbf16> to vector<320x64xbf16>
    %c2_16 = arith.constant 2 : index
    %c0_17 = arith.constant 0 : index
    %c0_18 = arith.constant 0 : index
    %13 = vector.load %arg2[%c2_16, %c0_17, %c0_18] : memref<4x64x128xbf16, #tpu.memory_space<vmem>>, vector<1x64x128xbf16>
    %14 = vector.shape_cast %13 : vector<1x64x128xbf16> to vector<64x128xbf16>
    %cst_19 = arith.constant dense<0.000000e+00> : vector<320x128xf32>
    %15 = tpu.matmul %12, %14, %cst_19 {dimension_numbers = #tpu.dot_dimension_numbers<[1], [0], [0], [1], [0, 0, 1, 1], [], []>} : vector<320x64xbf16>, vector<64x128xbf16>, vector<320x128xf32> -> vector<320x128xf32>
    %16 = arith.addf %10, %15 : vector<320x128xf32>
    %c0_20 = arith.constant 0 : index
    %c3 = arith.constant 3 : index
    %c0_21 = arith.constant 0 : index
    %c0_22 = arith.constant 0 : index
    %17 = vector.load %arg1[%c0_20, %c3, %c0_21, %c0_22] : memref<1x4x320x64xbf16, #tpu.memory_space<vmem>>, vector<1x1x320x64xbf16>
    %18 = vector.shape_cast %17 : vector<1x1x320x64xbf16> to vector<320x64xbf16>
    %c3_23 = arith.constant 3 : index
    %c0_24 = arith.constant 0 : index
    %c0_25 = arith.constant 0 : index
    %19 = vector.load %arg2[%c3_23, %c0_24, %c0_25] : memref<4x64x128xbf16, #tpu.memory_space<vmem>>, vector<1x64x128xbf16>
    %20 = vector.shape_cast %19 : vector<1x64x128xbf16> to vector<64x128xbf16>
    %cst_26 = arith.constant dense<0.000000e+00> : vector<320x128xf32>
    %21 = tpu.matmul %18, %20, %cst_26 {dimension_numbers = #tpu.dot_dimension_numbers<[1], [0], [0], [1], [0, 0, 1, 1], [], []>} : vector<320x64xbf16>, vector<64x128xbf16>, vector<320x128xf32> -> vector<320x128xf32>
    %22 = arith.addf %16, %21 : vector<320x128xf32>
    %c0_27 = arith.constant 0 : index
    %c0_28 = arith.constant 0 : index
    %23 = vector.load %arg3[%c0_27, %c0_28] : memref<1x128xf32, #tpu.memory_space<vmem>>, vector<1x128xf32>
    %24 = vector.broadcast %23 : vector<1x128xf32> to vector<320x128xf32>
    %25 = arith.addf %22, %24 : vector<320x128xf32>
    %cst_29 = arith.constant 0.000000e+00 : f32
    %26 = vector.broadcast %cst_29 : f32 to vector<320x128xf32>
    %27 = arith.maximumf %25, %26 : vector<320x128xf32>
    %28 = vector.extract_strided_slice %27 {offsets = [1, 0], sizes = [319, 128], strides = [1, 1]} : vector<320x128xf32> to vector<319x128xf32>
    %29 = vector.extract_strided_slice %27 {offsets = [0, 0], sizes = [1, 128], strides = [1, 1]} : vector<320x128xf32> to vector<1x128xf32>
    %30 = tpu.concatenate %28, %29 in 0 : vector<319x128xf32>, vector<1x128xf32> -> vector<320x128xf32>
    %31 = arith.truncf %27 : vector<320x128xf32> to vector<320x128xbf16>
    %32 = arith.truncf %30 : vector<320x128xf32> to vector<320x128xbf16>
    %33 = tpu.concatenate %31, %32 in 1 : vector<320x128xbf16>, vector<320x128xbf16> -> vector<320x256xbf16>
    %c0_30 = arith.constant 0 : index
    %c0_31 = arith.constant 0 : index
    %34 = vector.load %arg9[%c0_30, %c0_31] : memref<320x256xbf16, #tpu.memory_space<vmem>>, vector<320x256xbf16>
    tpu.vector_store %arg9[%c0_30, %c0_31], %33 {strides = array<i32>} : memref<320x256xbf16, #tpu.memory_space<vmem>>, vector<320x256xbf16>,
    %c0_32 = arith.constant 0 : index
    %c0_33 = arith.constant 0 : index
    %35 = vector.load %arg9[%c0_32, %c0_33] : memref<320x256xbf16, #tpu.memory_space<vmem>>, vector<304x256xbf16>
    %c0_34 = arith.constant 0 : index
    %c0_35 = arith.constant 0 : index
    %c0_36 = arith.constant 0 : index
    %36 = vector.load %arg4[%c0_34, %c0_35, %c0_36] : memref<2x256x64xbf16, #tpu.memory_space<vmem>>, vector<1x256x64xbf16>
    %37 = vector.shape_cast %36 : vector<1x256x64xbf16> to vector<256x64xbf16>
    %cst_37 = arith.constant dense<0.000000e+00> : vector<304x64xf32>
    %38 = tpu.matmul %35, %37, %cst_37 {dimension_numbers = #tpu.dot_dimension_numbers<[1], [0], [0], [1], [0, 0, 1, 1], [], []>} : vector<304x256xbf16>, vector<256x64xbf16>, vector<304x64xf32> -> vector<304x64xf32>
    %c16 = arith.constant 16 : index
    %c0_38 = arith.constant 0 : index
    %39 = vector.load %arg9[%c16, %c0_38] : memref<320x256xbf16, #tpu.memory_space<vmem>>, vector<304x256xbf16>
    %c1_39 = arith.constant 1 : index
    %c0_40 = arith.constant 0 : index
    %c0_41 = arith.constant 0 : index
    %40 = vector.load %arg4[%c1_39, %c0_40, %c0_41] : memref<2x256x64xbf16, #tpu.memory_space<vmem>>, vector<1x256x64xbf16>
    %41 = vector.shape_cast %40 : vector<1x256x64xbf16> to vector<256x64xbf16>
    %cst_42 = arith.constant dense<0.000000e+00> : vector<304x64xf32>
    %42 = tpu.matmul %39, %41, %cst_42 {dimension_numbers = #tpu.dot_dimension_numbers<[1], [0], [0], [1], [0, 0, 1, 1], [], []>} : vector<304x256xbf16>, vector<256x64xbf16>, vector<304x64xf32> -> vector<304x64xf32>
    %43 = arith.addf %38, %42 : vector<304x64xf32>
    %c0_43 = arith.constant 0 : index
    %c0_44 = arith.constant 0 : index
    %44 = vector.load %arg5[%c0_43, %c0_44] : memref<1x64xf32, #tpu.memory_space<vmem>>, vector<1x64xf32>
    %45 = vector.broadcast %44 : vector<1x64xf32> to vector<304x64xf32>
    %46 = arith.addf %43, %45 : vector<304x64xf32>
    %cst_45 = arith.constant 0.000000e+00 : f32
    %47 = vector.broadcast %cst_45 : f32 to vector<304x64xf32>
    %48 = arith.maximumf %46, %47 : vector<304x64xf32>
    %49 = vector.extract_strided_slice %48 {offsets = [1, 0], sizes = [303, 64], strides = [1, 1]} : vector<304x64xf32> to vector<303x64xf32>
    %50 = vector.extract_strided_slice %48 {offsets = [0, 0], sizes = [1, 64], strides = [1, 1]} : vector<304x64xf32> to vector<1x64xf32>
    %51 = tpu.concatenate %49, %50 in 0 : vector<303x64xf32>, vector<1x64xf32> -> vector<304x64xf32>
    %52 = vector.extract_strided_slice %48 {offsets = [2, 0], sizes = [302, 64], strides = [1, 1]} : vector<304x64xf32> to vector<302x64xf32>
    %53 = vector.extract_strided_slice %48 {offsets = [0, 0], sizes = [2, 64], strides = [1, 1]} : vector<304x64xf32> to vector<2x64xf32>
    %54 = tpu.concatenate %52, %53 in 0 : vector<302x64xf32>, vector<2x64xf32> -> vector<304x64xf32>
    %55 = arith.truncf %48 : vector<304x64xf32> to vector<304x64xbf16>
    %56 = arith.truncf %51 : vector<304x64xf32> to vector<304x64xbf16>
    %57 = arith.truncf %54 : vector<304x64xf32> to vector<304x64xbf16>
    %58 = tpu.concatenate %55, %56, %57 in 1 : vector<304x64xbf16>, vector<304x64xbf16>, vector<304x64xbf16> -> vector<304x192xbf16>
    %c0_46 = arith.constant 0 : index
    %c0_47 = arith.constant 0 : index
    %59 = vector.load %arg10[%c0_46, %c0_47] : memref<304x192xbf16, #tpu.memory_space<vmem>>, vector<304x192xbf16>
    tpu.vector_store %arg10[%c0_46, %c0_47], %58 {strides = array<i32>} : memref<304x192xbf16, #tpu.memory_space<vmem>>, vector<304x192xbf16>,
    %c0_48 = arith.constant 0 : index
    %c0_49 = arith.constant 0 : index
    %60 = vector.load %arg10[%c0_48, %c0_49] : memref<304x192xbf16, #tpu.memory_space<vmem>>, vector<272x192xbf16>
    %c0_50 = arith.constant 0 : index
    %c0_51 = arith.constant 0 : index
    %c0_52 = arith.constant 0 : index
    %61 = vector.load %arg6[%c0_50, %c0_51, %c0_52] : memref<3x192x64xbf16, #tpu.memory_space<vmem>>, vector<1x192x64xbf16>
    %62 = vector.shape_cast %61 : vector<1x192x64xbf16> to vector<192x64xbf16>
    %cst_53 = arith.constant dense<0.000000e+00> : vector<272x64xf32>
    %63 = tpu.matmul %60, %62, %cst_53 {dimension_numbers = #tpu.dot_dimension_numbers<[1], [0], [0], [1], [0, 0, 1, 1], [], []>} : vector<272x192xbf16>, vector<192x64xbf16>, vector<272x64xf32> -> vector<272x64xf32>
    %c16_54 = arith.constant 16 : index
    %c0_55 = arith.constant 0 : index
    %64 = vector.load %arg10[%c16_54, %c0_55] : memref<304x192xbf16, #tpu.memory_space<vmem>>, vector<272x192xbf16>
    %c1_56 = arith.constant 1 : index
    %c0_57 = arith.constant 0 : index
    %c0_58 = arith.constant 0 : index
    %65 = vector.load %arg6[%c1_56, %c0_57, %c0_58] : memref<3x192x64xbf16, #tpu.memory_space<vmem>>, vector<1x192x64xbf16>
    %66 = vector.shape_cast %65 : vector<1x192x64xbf16> to vector<192x64xbf16>
    %cst_59 = arith.constant dense<0.000000e+00> : vector<272x64xf32>
    %67 = tpu.matmul %64, %66, %cst_59 {dimension_numbers = #tpu.dot_dimension_numbers<[1], [0], [0], [1], [0, 0, 1, 1], [], []>} : vector<272x192xbf16>, vector<192x64xbf16>, vector<272x64xf32> -> vector<272x64xf32>
    %68 = arith.addf %63, %67 : vector<272x64xf32>
    %c32 = arith.constant 32 : index
    %c0_60 = arith.constant 0 : index
    %69 = vector.load %arg10[%c32, %c0_60] : memref<304x192xbf16, #tpu.memory_space<vmem>>, vector<272x192xbf16>
    %c2_61 = arith.constant 2 : index
    %c0_62 = arith.constant 0 : index
    %c0_63 = arith.constant 0 : index
    %70 = vector.load %arg6[%c2_61, %c0_62, %c0_63] : memref<3x192x64xbf16, #tpu.memory_space<vmem>>, vector<1x192x64xbf16>
    %71 = vector.shape_cast %70 : vector<1x192x64xbf16> to vector<192x64xbf16>
    %cst_64 = arith.constant dense<0.000000e+00> : vector<272x64xf32>
    %72 = tpu.matmul %69, %71, %cst_64 {dimension_numbers = #tpu.dot_dimension_numbers<[1], [0], [0], [1], [0, 0, 1, 1], [], []>} : vector<272x192xbf16>, vector<192x64xbf16>, vector<272x64xf32> -> vector<272x64xf32>
    %73 = arith.addf %68, %72 : vector<272x64xf32>
    %c0_65 = arith.constant 0 : index
    %c0_66 = arith.constant 0 : index
    %74 = vector.load %arg7[%c0_65, %c0_66] : memref<1x64xf32, #tpu.memory_space<vmem>>, vector<1x64xf32>
    %75 = vector.broadcast %74 : vector<1x64xf32> to vector<272x64xf32>
    %76 = arith.addf %73, %75 : vector<272x64xf32>
    %cst_67 = arith.constant 0.000000e+00 : f32
    %77 = vector.broadcast %cst_67 : f32 to vector<272x64xf32>
    %78 = arith.maximumf %76, %77 : vector<272x64xf32>
    %c0_68 = arith.constant 0 : index
    %c0_69 = arith.constant 0 : index
    %c0_70 = arith.constant 0 : index
    %79 = vector.load %arg8[%c0_68, %c0_69, %c0_70] : memref<1x272x64xf32, #tpu.memory_space<vmem>>, vector<1x272x64xf32>
    %80 = vector.shape_cast %79 : vector<1x272x64xf32> to vector<272x64xf32>
    %81 = vector.shape_cast %78 : vector<272x64xf32> to vector<1x272x64xf32>
    tpu.vector_store %arg8[%c0_68, %c0_69, %c0_70], %81 {strides = array<i32>} : memref<1x272x64xf32, #tpu.memory_space<vmem>>, vector<1x272x64xf32>,
    return
  }
  func.func @transform_0(%arg0: i32) -> (i32, i32, i32, i32) {
    %c0_i32 = arith.constant 0 : i32
    %c0_i32_0 = arith.constant 0 : i32
    %c0_i32_1 = arith.constant 0 : i32
    %c0_i32_2 = arith.constant 0 : i32
    return %arg0, %c0_i32, %c0_i32_0, %c0_i32_1 : i32, i32, i32, i32
  }
  func.func @transform_1(%arg0: i32) -> (i32, i32, i32) {
    %c0_i32 = arith.constant 0 : i32
    %c0_i32_0 = arith.constant 0 : i32
    %c0_i32_1 = arith.constant 0 : i32
    %c0_i32_2 = arith.constant 0 : i32
    return %c0_i32, %c0_i32_0, %c0_i32_1 : i32, i32, i32
  }
  func.func @transform_2(%arg0: i32) -> (i32, i32) {
    %c0_i32 = arith.constant 0 : i32
    %c0_i32_0 = arith.constant 0 : i32
    %c0_i32_1 = arith.constant 0 : i32
    return %c0_i32, %c0_i32_0 : i32, i32
  }
  func.func @transform_3(%arg0: i32) -> (i32, i32, i32) {
    %c0_i32 = arith.constant 0 : i32
    %c0_i32_0 = arith.constant 0 : i32
    %c0_i32_1 = arith.constant 0 : i32
    %c0_i32_2 = arith.constant 0 : i32
    return %c0_i32, %c0_i32_0, %c0_i32_1 : i32, i32, i32
  }
  func.func @transform_4(%arg0: i32) -> (i32, i32) {
    %c0_i32 = arith.constant 0 : i32
    %c0_i32_0 = arith.constant 0 : i32
    %c0_i32_1 = arith.constant 0 : i32
    return %c0_i32, %c0_i32_0 : i32, i32
  }
  func.func @transform_5(%arg0: i32) -> (i32, i32, i32) {
    %c0_i32 = arith.constant 0 : i32
    %c0_i32_0 = arith.constant 0 : i32
    %c0_i32_1 = arith.constant 0 : i32
    %c0_i32_2 = arith.constant 0 : i32
    return %c0_i32, %c0_i32_0, %c0_i32_1 : i32, i32, i32
  }
  func.func @transform_6(%arg0: i32) -> (i32, i32) {
    %c0_i32 = arith.constant 0 : i32
    %c0_i32_0 = arith.constant 0 : i32
    %c0_i32_1 = arith.constant 0 : i32
    return %c0_i32, %c0_i32_0 : i32, i32
  }
  func.func @transform_7(%arg0: i32) -> (i32, i32, i32) {
    %c0_i32 = arith.constant 0 : i32
    %c0_i32_0 = arith.constant 0 : i32
    %c0_i32_1 = arith.constant 0 : i32
    return %arg0, %c0_i32, %c0_i32_0 : i32, i32, i32
  }
}

</mosaic_0001>

<bundles_post_ra>
// kernel: tile.8
= control target key start
LH: loop header
LB: loop body
LE: loop exit
PB: predicated region body
PF: predicated region fallthrough
CT: control target
= control target key end

     0   :  { %s22_s0 = inlined_call_operand.vmem [shape: f32[32], index: 0, kind: input, shape index: {}]   ;;  %s23_s1 = inlined_call_operand.vmem [shape: f32[4,32], index: 1, kind: output, shape index: {}]  }
   0x1   :  { %v4_v0 = vld [vmem:[%s22_s0] ss:$0 sm:$0xff] }
   0x2   :  { %5 = vst [vmem:[%s23_s1] sm:$0xf] %v4_v0 }

// kernel: tile.9
= control target key start
LH: loop header
LB: loop body
LE: loop exit
PB: predicated region body
PF: predicated region fallthrough
CT: control target
= control target key end

     0   :  { %vm7_vm0 = vcmask 261120   ;;  %s37_s8 = smov 32   ;;  %s38_s9 = smov 64   ;;  %vm13_vm1 = vcmask 1048320   ;;  %vm19_vm2 = vcmask 785920   ;;  %vm25_vm3 = vcmask 523520   ;;  %s55_s0 = inlined_call_operand.vmem [shape: f32[4,32], index: 0, kind: input, shape index: {}]   ;;  %s56_s1 = inlined_call_operand.vmem [shape: f32[1,128], index: 1, kind: output, shape index: {}]  }
   0x1   :  { %v4_v0 = vld [vmem:[%s55_s0] sm:$0xf]  ;;  %s36_s0 = smov 96  }
   0x2   :  { %5 = vst [vmem:[#allocation1] sm:$0xf] %v4_v0 }
   0x9   :  { %v10_v1 = vld [vmem:[#allocation1 + $0x3] sm:$0x1]   ;;  %v22_v2 = vld [vmem:[#allocation1 + $0x1] sm:$0x1]   ;;  %v6_v3 = vld [vmem:[#allocation1] sm:$0x1]  }
   0xa   :  { %11 = vrot.lane.b32.xlu0 %v10_v1, %s36_s0  ;;  %23 = vrot.lane.b32.xlu1 %v22_v2, %s37_s8  ;;  %v16_v4 = vld [vmem:[#allocation1 + $0x2] sm:$0x1]   ;;  %8 = vst.msk [vmem:[#allocation0] sm:$0x1] %vm7_vm0, %v6_v3  }
   0xe   :  { %17 = vrot.lane.b32.xlu0 %v16_v4, %s38_s9 }
  0x7c   :  { %v12_v5 = vpop.permute.xlu0 %11   ;;  %v24_v6 = vpop.permute.xlu1 %23  }
  0x7d   :  { %14 = vst.msk [vmem:[#allocation0] sm:$0x1] %vm13_vm1, %v12_v5  }
  0x80   :  { %v18_v7 = vpop.permute.xlu0 %17  }
  0x81   :  { %20 = vst.msk [vmem:[#allocation0] sm:$0x1] %vm19_vm2, %v18_v7  }
  0x82   :  { %26 = vst.msk [vmem:[#allocation0] sm:$0x1] %vm25_vm3, %v24_v6  }
  0x89   :  { %v30_v8 = vld [vmem:[#allocation0] sm:$0x1] }
  0x8a   :  { %32 = vst [vmem:[%s56_s1] sm:$0x1] %v30_v8 }

// kernel: mario_dqn_forward.1
= control target key start
LH: loop header
LB: loop body
LE: loop exit
PB: predicated region body
PF: predicated region fallthrough
CT: control target
= control target key end

     0   :  { %s6015_s24 = smov 0   ;;  %s7850_s0 = inlined_call_operand.vmem [shape: bf16[2,4,320,64], index: 0, kind: input, shape index: {}]   ;;  %s7851_s1 = inlined_call_operand.vmem [shape: bf16[4,64,128], index: 1, kind: input, shape index: {}]   ;;  %s7852_s2 = inlined_call_operand.vmem [shape: f32[1,128], index: 2, kind: input, shape index: {}]   ;;  %s7853_s3 = inlined_call_operand.vmem [shape: bf16[2,256,64], index: 3, kind: input, shape index: {}]   ;;  %s7854_s4 = inlined_call_operand.vmem [shape: f32[1,64], index: 4, kind: input, shape index: {}]   ;;  %s7855_s5 = inlined_call_operand.vmem [shape: bf16[3,192,64], index: 5, kind: input, shape index: {}]   ;;  %s7856_s6 = inlined_call_operand.vmem [shape: f32[1,64], index: 6, kind: input, shape index: {}]   ;;  %s7857_s7 = inlined_call_operand.vmem [shape: f32[2,272,64], index: 7, kind: output, shape index: {}]  }
   0x1 LB: > { %s4849_s25 = sadd.s32 4294967295, %s5971_s24   ;;  %p4853_p0 = scmp.ge.s32.totalorder %s5971_s24, 1  ;;  %s5971_s24 = sphi %s6015_s24, %s17_s24  }
   0x2   : > { %p237_p1 = scmp.lt.s32.totalorder %s5971_s24, 3 }
   0x4   : > { %p238_p2 = pnand %p4853_p0, %p237_p1 }
   0x5   : > { %v5800_v0 = vld [vmem:[%s7851_s1] sm:$0xff] (!%p238_p2)   ;;  %p269_p3 = scmp.lt.s32.totalorder (!%p238_p2), %s4849_s25, 1  ;;  %v5801_v1 = vld [vmem:[%s7851_s1 + $0x8] sm:$0xff] (!%p238_p2)   ;;  %v5802_v2 = vld [vmem:[%s7851_s1 + $0x10] sm:$0xff] (!%p238_p2)   ;;  %vm502_vm0 = vcmask (!%p238_p2), 523264   ;;  %vm2194_vm1 = vcmask (!%p238_p2), 1046528  }
   0x6   : > { %241 = sbr.rel (%p238_p2) target bundleno = 1408 (0x580), region = 48  ;;  %5524 = vmatprep.subr.bf16.mxu0 (!%p238_p2), %v5800_v0  ;;  %v5803_v4 = vld [vmem:[%s7851_s1 + $0x18] sm:$0xff] (!%p238_p2)   ;;  %v5806_v5 = vld [vmem:[%s7851_s1 + $0x40] sm:$0xff] (!%p238_p2)   ;;  %v5811_v8 = vld [vmem:[%s7851_s1 + $0x48] sm:$0xff] (!%p238_p2)   ;;  %vm3335_vm2 = vcmask (!%p238_p2), 1045504   ;;  %s5974_s8 = smov (!%p238_p2), 64  }
   0x7   : > { %5525 = vmatpush3.bf16.msra.mxu0 (!%p238_p2), %v5800_v0  ;;  %v5818_v9 = vld [vmem:[%s7851_s1 + $0x50] sm:$0xff] (!%p238_p2)   ;;  %v5823_v12 = vld [vmem:[%s7851_s1 + $0x58] sm:$0xff] (!%p238_p2)   ;;  %v6069_v14 = vld [vmem:[%s7851_s1 + $0x60] sm:$0xff] (!%p238_p2)  }
   0x8   : > { %5526 = vmatprep.subr.bf16.mxu0 (!%p238_p2), %v5801_v1  ;;  %v5848_v20 = vld [vmem:[%s7851_s1 + $0x20] sm:$0xff] (!%p238_p2)   ;;  %v5851_v21 = vld [vmem:[%s7851_s1 + $0x28] sm:$0xff] (!%p238_p2)   ;;  %v5852_v22 = vld [vmem:[%s7851_s1 + $0x30] sm:$0xff] (!%p238_p2)  }
   0x9   : > { %5476 = vmatprep.subr.bf16.mxu1 (!%p238_p2), %v5848_v20  ;;  %v5855_v25 = vld [vmem:[%s7851_s1 + $0x38] sm:$0xff] (!%p238_p2)   ;;  %v5835_v46 = vld [vmem:[%s7851_s1 + $0x68] sm:$0xff] (!%p238_p2)   ;;  %v5842_v48 = vld [vmem:[%s7851_s1 + $0x70] sm:$0xff] (!%p238_p2)  }
   0xa   : > { %5477 = vmatpush3.bf16.msra.mxu1 (!%p238_p2), %v5848_v20  ;;  %v5847_v52 = vld [vmem:[%s7851_s1 + $0x78] sm:$0xff] (!%p238_p2)   ;;  %v5896_v62 = vld [vmem:[%s7853_s3 + $0x80] sm:$0xff] (!%p238_p2)  }
   0xb   : > { %5527 = vmatpush3.bf16.msra.mxu0 (!%p238_p2), %v5801_v1  ;;  %5478 = vmatprep.subr.bf16.mxu1 (!%p238_p2), %v5851_v21  ;;  %v5973_v1 = vmov (!%p238_p2), 0  }
   0xc   : > { %5528 = vmatprep.subr.bf16.mxu0 (!%p238_p2), %v5802_v2 }
   0xd   : > { %s7878_s25 = smov (!%p269_p3, %s4849_s25), 1 }
   0xe   : > { %s5788_s9 = smul.u32 640, %s7878_s25  ;;  %5479 = vmatpush3.bf16.msra.mxu1 %v5851_v21 }
   0xf   : > { %5529 = vmatpush3.bf16.msra.mxu0 %v5802_v2  ;;  %5480 = vmatprep.subr.bf16.mxu1 %v5852_v22  ;;  %s5789_s15 = smul.u32 272, %s7878_s25 }
  0x10   : > { %s6038_s12 = scalar_lea.vmem %s7850_s0, %s5788_s9  ;;  %5530 = vmatprep.subr.bf16.mxu0 %v5803_v4 }
  0x11   : > { %v5804_v3 = vld [vmem:[%s6038_s12] sm:$0xff]   ;;  %v5805_v6 = vld [vmem:[%s6038_s12 + $0x8] sm:$0xff]   ;;  %v5807_v7 = vld [vmem:[%s6038_s12 + $0x10] sm:$0xff]   ;;  %s7714_s20 = scalar_lea.vmem %s7857_s7, %s5789_s15 }
  0x12   : > { %5532 = vmatprep.mubr.msk.bf16.mxu0 %vm502_vm0, %v5804_v3  ;;  %v5808_v10 = vld [vmem:[%s6038_s12 + $0x18] sm:$0xff]   ;;  %v5809_v11 = vld [vmem:[%s6038_s12 + $0x20] sm:$0xff]   ;;  %v5810_v13 = vld [vmem:[%s6038_s12 + $0x28] sm:$0xff]   ;;  %5481 = vmatpush3.bf16.msra.mxu1 %v5852_v22 }
  0x13   : > { %5531 = vmatpush3.bf16.msra.mxu0 %v5803_v4  ;;  %v5812_v15 = vld [vmem:[%s6038_s12 + $0x30] sm:$0xff]   ;;  %v5813_v16 = vld [vmem:[%s6038_s12 + $0x38] sm:$0xff]   ;;  %v5814_v17 = vld [vmem:[%s6038_s12 + $0x40] sm:$0xff]   ;;  %5482 = vmatprep.subr.bf16.mxu1 %v5855_v25 }
  0x14   : > { %5572 = vmatprep.subr.bf16.mxu0 %v5806_v5  ;;  %v5815_v18 = vld [vmem:[%s6038_s12 + $0x48] sm:$0xff]   ;;  %v5816_v19 = vld [vmem:[%s6038_s12 + $0x50] sm:$0xff]   ;;  %v5817_v23 = vld [vmem:[%s6038_s12 + $0x58] sm:$0xff]  }
  0x15   : > { %v5819_v24 = vld [vmem:[%s6038_s12 + $0x60] sm:$0xff]   ;;  %v5820_v27 = vld [vmem:[%s6038_s12 + $0x68] sm:$0xff]   ;;  %v5821_v28 = vld [vmem:[%s6038_s12 + $0x70] sm:$0xff]  }
  0x16   : > { %5533 = vmatmul.mubr.msk.bf16.vlgmr.msra.gmra.mrb[0].mxu0 %vm502_vm0, %v5805_v6  ;;  %v5856_v26 = vld [vmem:[%s6038_s12 + $0xa0] sm:$0xff]   ;;  %v5857_v29 = vld [vmem:[%s6038_s12 + $0xa8] sm:$0xff]   ;;  %5483 = vmatpush3.bf16.msra.mxu1 %v5855_v25  ;;  %v5860_v30 = vld [vmem:[%s6038_s12 + $0xb0] sm:$0xff]  }
  0x17   : > { %5573 = vmatpush3.bf16.msra.mxu0 %v5806_v5  ;;  %5536 = vmatprep.mubr.msk.bf16.mxu0 %vm502_vm0, %v5807_v7  ;;  %v5822_v31 = vld [vmem:[%s6038_s12 + $0x78] sm:$0xff]   ;;  %v5824_v32 = vld [vmem:[%s6038_s12 + $0x80] sm:$0xff]   ;;  %v5825_v35 = vld [vmem:[%s6038_s12 + $0x88] sm:$0xff]  }
  0x18   : > { %5574 = vmatprep.subr.bf16.mxu0 %v5811_v8  ;;  %5484 = vmatprep.mubr.msk.bf16.mxu1 %vm502_vm0, %v5856_v26  ;;  %v5861_v33 = vld [vmem:[%s6038_s12 + $0xb8] sm:$0xff]   ;;  %v5864_v34 = vld [vmem:[%s6038_s12 + $0xc0] sm:$0xff]   ;;  %v5866_v36 = vld [vmem:[%s6038_s12 + $0xc8] sm:$0xff]  }
  0x19   : > { %5485 = vmatmul.mubr.msk.bf16.vlgmr.msra.gmra.mrb[0].mxu1 %vm502_vm0, %v5857_v29  ;;  %v5826_v37 = vld [vmem:[%s6038_s12 + $0x90] sm:$0xff]   ;;  %v5827_v39 = vld [vmem:[%s6038_s12 + $0x98] sm:$0xff]   ;;  %v5828_v41 = vld [vmem:[%s6038_s12 + $0x140] sm:$0xff]   ;;  %2633 = vmatprep.subr.bf16.mxu1 %v5973_v1 }
  0x1a   : > { %5488 = vmatprep.mubr.msk.bf16.mxu1 %vm502_vm0, %v5860_v30  ;;  %v5868_v38 = vld [vmem:[%s6038_s12 + $0xd0] sm:$0xff]   ;;  %v5870_v40 = vld [vmem:[%s6038_s12 + $0xd8] sm:$0xff]   ;;  %v5872_v42 = vld [vmem:[%s6038_s12 + $0xe0] sm:$0xff]   ;;  %2634 = vmatpush1.bf16.msra.mxu1 %v5896_v62 }
  0x1b   : > { %5575 = vmatpush3.bf16.msra.mxu0 %v5811_v8  ;;  %v5829_v43 = vld [vmem:[%s6038_s12 + $0x148] sm:$0xff]   ;;  %v5831_v45 = vld [vmem:[%s6038_s12 + $0x150] sm:$0xff]   ;;  %v5832_v49 = vld [vmem:[%s6038_s12 + $0x158] sm:$0xff]   ;;  %2635 = vmatprep.subr.bf16.mxu1 %v5973_v1 }
  0x1c   : > { %5576 = vmatprep.subr.bf16.mxu0 %v5818_v9  ;;  %v5874_v44 = vld [vmem:[%s6038_s12 + $0xe8] sm:$0xff]   ;;  %v5876_v47 = vld [vmem:[%s6038_s12 + $0xf0] sm:$0xff]   ;;  %v5878_v50 = vld [vmem:[%s6038_s12 + $0xf8] sm:$0xff]  }
  0x1d   : > { %v5833_v51 = vld [vmem:[%s6038_s12 + $0x160] sm:$0xff]   ;;  %v5834_v54 = vld [vmem:[%s6038_s12 + $0x168] sm:$0xff]   ;;  %v5836_v56 = vld [vmem:[%s6038_s12 + $0x170] sm:$0xff]  }
  0x1e   : > { %5537 = vmatmul.mubr.msk.bf16.gmra.mrb[4].mxu0 %vm502_vm0, %v5808_v10  ;;  %v5880_v53 = vld [vmem:[%s6038_s12 + $0x100] sm:$0xff]   ;;  %v5882_v55 = vld [vmem:[%s6038_s12 + $0x108] sm:$0xff]   ;;  %v5884_v57 = vld [vmem:[%s6038_s12 + $0x110] sm:$0xff]  }
  0x1f   : > { %5540 = vmatprep.mubr.msk.bf16.mxu0 %vm502_vm0, %v5809_v11  ;;  %5577 = vmatpush3.bf16.msra.mxu0 %v5818_v9  ;;  %v5837_v58 = vld [vmem:[%s6038_s12 + $0x178] sm:$0xff]   ;;  %v5838_v60 = vld [vmem:[%s6038_s12 + $0x180] sm:$0xff]   ;;  %v5839_v63 = vld [vmem:[%s6038_s12 + $0x188] sm:$0xff]  }
  0x20   : > { %5578 = vmatprep.subr.bf16.mxu0 %v5823_v12  ;;  %v5886_v59 = vld [vmem:[%s6038_s12 + $0x118] sm:$0xff]   ;;  %v5888_v61 = vld [vmem:[%s6038_s12 + $0x120] sm:$0xff]   ;;  %v5890_v0 = vld [vmem:[%s6038_s12 + $0x128] sm:$0xff]  }
  0x21   : > { %5489 = vmatmul.mubr.msk.bf16.gmra.mrb[4].mxu1 %vm502_vm0, %v5861_v33  ;;  %v5840_v2 = vld [vmem:[%s6038_s12 + $0x190] sm:$0xff]   ;;  %v5897_v4 = vld [vmem:[%s7853_s3 + $0x88] sm:$0xff]   ;;  %v5899_v6 = vld [vmem:[%s7853_s3 + $0x98] sm:$0xff]  }
  0x22   : > { %5492 = vmatprep.mubr.msk.bf16.mxu1 %vm502_vm0, %v5864_v34  ;;  %v5892_v3 = vld [vmem:[%s6038_s12 + $0x130] sm:$0xff]   ;;  %2636 = vmatpush1.bf16.msra.mxu1 %v5897_v4  ;;  %v5841_v7 = vld [vmem:[%s6038_s12 + $0x198] sm:$0xff]   ;;  %v5843_v9 = vld [vmem:[%s6038_s12 + $0x1a0] sm:$0xff]  }
  0x23   : > { %5579 = vmatpush3.bf16.msra.mxu0 %v5823_v12  ;;  %v5898_v5 = vld [vmem:[%s7853_s3 + $0x90] sm:$0xff]   ;;  %v5894_v8 = vld [vmem:[%s6038_s12 + $0x138] sm:$0xff]   ;;  %2637 = vmatprep.subr.bf16.mxu1 %v5973_v1  ;;  %v5900_v10 = vld [vmem:[%s7853_s3 + $0xa0] sm:$0xff]  }
  0x24   : > { %5620 = vmatprep.subr.bf16.mxu0 %v6069_v14  ;;  %v5901_v11 = vld [vmem:[%s7853_s3 + $0xa8] sm:$0xff]   ;;  %v5853_v21 = vld [vmem:[%s6038_s12 + $0x1d0] sm:$0xff]   ;;  %v5858_v25 = vld [vmem:[%s6038_s12 + $0x1e0] sm:$0xff]  }
  0x25   : > { %v5844_v12 = vld [vmem:[%s6038_s12 + $0x1a8] sm:$0xff]   ;;  %v5906_v22 = vld [vmem:[%s7853_s3 + $0xd0] sm:$0xff]   ;;  %v5865_v29 = vld [vmem:[%s6038_s12 + $0x200] sm:$0xff]  }
  0x26   : > { %5541 = vmatmul.mubr.msk.bf16.gmra.mrb[8].mxu0 %vm502_vm0, %v5810_v13  ;;  %2638 = vmatpush1.bf16.msra.mxu1 %v5898_v5  ;;  %v5845_v13 = vld [vmem:[%s6038_s12 + $0x1b0] sm:$0xff]   ;;  %v5850_v20 = vld [vmem:[%s6038_s12 + $0x1c8] sm:$0xff]   ;;  %v5873_v33 = vld [vmem:[%s6038_s12 + $0x220] sm:$0xff]  }
  0x27   : > { %5544 = vmatprep.mubr.msk.bf16.mxu0 %vm502_vm0, %v5812_v15  ;;  %2639 = vmatprep.subr.bf16.mxu1 %v5973_v1  ;;  %v5903_v15 = vld [vmem:[%s7853_s3 + $0xb8] sm:$0xff]   ;;  %v5859_v26 = vld [vmem:[%s6038_s12 + $0x1e8] sm:$0xff]  }
  0x28   : > { %v5867_v30 = vld [vmem:[%s6038_s12 + $0x208] sm:$0xff]  }
  0x29   : > { %5493 = vmatmul.mubr.msk.bf16.gmra.mrb[8].mxu1 %vm502_vm0, %v5866_v36  ;;  %v5875_v34 = vld [vmem:[%s6038_s12 + $0x228] sm:$0xff]   ;;  %v5879_v36 = vld [vmem:[%s6038_s12 + $0x238] sm:$0xff]  }
  0x2a   : > { %5496 = vmatprep.mubr.msk.bf16.mxu1 %vm502_vm0, %v5868_v38  ;;  %2640 = vmatpush1.bf16.msra.mxu1 %v5899_v6  ;;  %v5883_v38 = vld [vmem:[%s6038_s12 + $0x248] sm:$0xff]  }
  0x2b   : > { %2641 = vmatprep.subr.bf16.mxu1 %v5973_v1 }
  0x2e   : > { %5545 = vmatmul.mubr.msk.bf16.gmra.mrb[12].mxu0 %vm502_vm0, %v5813_v16  ;;  %2642 = vmatpush1.bf16.msra.mxu1 %v5900_v10  ;;  %v5846_v16 = vld [vmem:[%s6038_s12 + $0x1b8] sm:$0xff]  }
  0x2f   : > { %5548 = vmatprep.mubr.msk.bf16.mxu0 %vm502_vm0, %v5814_v17  ;;  %2643 = vmatprep.subr.bf16.mxu1 %v5973_v1  ;;  %v5849_v17 = vld [vmem:[%s6038_s12 + $0x1c0] sm:$0xff]  }
  0x31   : > { %5497 = vmatmul.mubr.msk.bf16.gmra.mrb[12].mxu1 %vm502_vm0, %v5870_v40  ;;  %v5887_v40 = vld [vmem:[%s6038_s12 + $0x258] sm:$0xff]  }
  0x32   : > { %5500 = vmatprep.mubr.msk.bf16.mxu1 %vm502_vm0, %v5872_v42  ;;  %2644 = vmatpush1.bf16.msra.mxu1 %v5901_v11  ;;  %v5891_v42 = vld [vmem:[%s6038_s12 + $0x268] sm:$0xff]  }
  0x33   : > { %2645 = vmatprep.subr.bf16.mxu1 %v5973_v1 }
  0x36   : > { %5549 = vmatmul.mubr.msk.bf16.gmra.mrb[16].mxu0 %vm502_vm0, %v5815_v18  ;;  %v5904_v18 = vld [vmem:[%s7853_s3 + $0xc0] sm:$0xff]  }
  0x37   : > { %5552 = vmatprep.mubr.msk.bf16.mxu0 %vm502_vm0, %v5816_v19  ;;  %v5905_v19 = vld [vmem:[%s7853_s3 + $0xc8] sm:$0xff]  }
  0x39   : > { %5501 = vmatmul.mubr.msk.bf16.gmra.mrb[16].mxu1 %vm502_vm0, %v5874_v44  ;;  %v5895_v44 = vld [vmem:[%s6038_s12 + $0x278] sm:$0xff]  }
  0x3a   : > { %5504 = vmatprep.mubr.msk.bf16.mxu1 %vm502_vm0, %v5876_v47  ;;  %v5910_v47 = vld [vmem:[%s7853_s3 + $0xf0] sm:$0xff]  }
  0x3e   : > { %5553 = vmatmul.mubr.msk.bf16.gmra.mrb[20].mxu0 %vm502_vm0, %v5817_v23  ;;  %v5907_v23 = vld [vmem:[%s7853_s3 + $0xd8] sm:$0xff]  }
  0x3f   : > { %5556 = vmatprep.mubr.msk.bf16.mxu0 %vm502_vm0, %v5819_v24  ;;  %v5854_v24 = vld [vmem:[%s6038_s12 + $0x1d8] sm:$0xff]  }
  0x41   : > { %5505 = vmatmul.mubr.msk.bf16.gmra.mrb[20].mxu1 %vm502_vm0, %v5878_v50  ;;  %v5911_v50 = vld [vmem:[%s7853_s3 + $0xf8] sm:$0xff]  }
  0x42   : > { %5508 = vmatprep.mubr.msk.bf16.mxu1 %vm502_vm0, %v5880_v53 }
  0x46   : > { %5557 = vmatmul.mubr.msk.bf16.gmra.mrb[24].mxu0 %vm502_vm0, %v5820_v27  ;;  %v5862_v27 = vld [vmem:[%s6038_s12 + $0x1f0] sm:$0xff]  }
  0x47   : > { %5560 = vmatprep.mubr.msk.bf16.mxu0 %vm502_vm0, %v5821_v28  ;;  %v5863_v28 = vld [vmem:[%s6038_s12 + $0x1f8] sm:$0xff]  }
  0x49   : > { %5509 = vmatmul.mubr.msk.bf16.gmra.mrb[24].mxu1 %vm502_vm0, %v5882_v55 }
  0x4a   : > { %5512 = vmatprep.mubr.msk.bf16.mxu1 %vm502_vm0, %v5884_v57 }
  0x4e   : > { %5561 = vmatmul.mubr.msk.bf16.gmra.mrb[28].mxu0 %vm502_vm0, %v5822_v31  ;;  %v5869_v31 = vld [vmem:[%s6038_s12 + $0x210] sm:$0xff]  }
  0x4f   : > { %5564 = vmatprep.mubr.msk.bf16.mxu0 %vm502_vm0, %v5824_v32  ;;  %v5871_v32 = vld [vmem:[%s6038_s12 + $0x218] sm:$0xff]  }
  0x51   : > { %5513 = vmatmul.mubr.msk.bf16.gmra.mrb[28].mxu1 %vm502_vm0, %v5886_v59 }
  0x52   : > { %5516 = vmatprep.mubr.msk.bf16.mxu1 %vm502_vm0, %v5888_v61 }
  0x56   : > { %5565 = vmatmul.mubr.msk.bf16.gmra.mrb[32].mxu0 %vm502_vm0, %v5825_v35  ;;  %v5877_v35 = vld [vmem:[%s6038_s12 + $0x230] sm:$0xff]  }
  0x57   : > { %5568 = vmatprep.mubr.msk.bf16.mxu0 %vm502_vm0, %v5826_v37  ;;  %v5881_v37 = vld [vmem:[%s6038_s12 + $0x240] sm:$0xff]  }
  0x59   : > { %5517 = vmatmul.mubr.msk.bf16.gmra.mrb[32].mxu1 %vm502_vm0, %v5890_v0 }
  0x5a   : > { %5520 = vmatprep.mubr.msk.bf16.mxu1 %vm502_vm0, %v5892_v3 }
  0x5e   : > { %5569 = vmatmul.mubr.msk.bf16.gmra.mrb[36].mxu0 %vm502_vm0, %v5827_v39  ;;  %v5885_v39 = vld [vmem:[%s6038_s12 + $0x250] sm:$0xff]  }
  0x5f   : > { %5580 = vmatprep.mubr.msk.bf16.mxu0 %vm502_vm0, %v5828_v41  ;;  %v5889_v41 = vld [vmem:[%s6038_s12 + $0x260] sm:$0xff]  }
  0x61   : > { %5521 = vmatmul.mubr.msk.bf16.gmra.mrb[36].mxu1 %vm502_vm0, %v5894_v8 }
  0x66   : > { %5581 = vmatmul.mubr.msk.bf16.vlgmr.msra.gmra.mrb[0].mxu0 %vm502_vm0, %v5829_v43  ;;  %v5893_v43 = vld [vmem:[%s6038_s12 + $0x270] sm:$0xff]  }
  0x67   : > { %5621 = vmatpush3.bf16.msra.mxu0 %v6069_v14  ;;  %5584 = vmatprep.mubr.msk.bf16.mxu0 %vm502_vm0, %v5831_v45  ;;  %v5902_v14 = vld [vmem:[%s7853_s3 + $0xb0] sm:$0xff]   ;;  %v5908_v45 = vld [vmem:[%s7853_s3 + $0xe0] sm:$0xff]  }
  0x68   : > { %5622 = vmatprep.subr.bf16.mxu0 %v5835_v46  ;;  %2646 = vmatpush1.bf16.msra.mxu1 %v5902_v14 }
  0x69   : > { %2647 = vmatprep.subr.bf16.mxu1 %v5973_v1 }
  0x6b   : > { %5623 = vmatpush3.bf16.msra.mxu0 %v5835_v46  ;;  %v5909_v46 = vld [vmem:[%s7853_s3 + $0xe8] sm:$0xff]  }
  0x6c   : > { %5624 = vmatprep.subr.bf16.mxu0 %v5842_v48  ;;  %2648 = vmatpush1.bf16.msra.mxu1 %v5903_v15 }
  0x6d   : > { %2649 = vmatprep.subr.bf16.mxu1 %v5973_v1 }
  0x6e   : > { %5585 = vmatmul.mubr.msk.bf16.gmra.mrb[4].mxu0 %vm502_vm0, %v5832_v49 }
  0x6f   : > { %5588 = vmatprep.mubr.msk.bf16.mxu0 %vm502_vm0, %v5833_v51  ;;  %5625 = vmatpush3.bf16.msra.mxu0 %v5842_v48 }
  0x70   : > { %5626 = vmatprep.subr.bf16.mxu0 %v5847_v52  ;;  %2650 = vmatpush1.bf16.msra.mxu1 %v5904_v18 }
  0x71   : > { %2651 = vmatprep.subr.bf16.mxu1 %v5973_v1 }
  0x73   : > { %5627 = vmatpush3.bf16.msra.mxu0 %v5847_v52 }
  0x74   : > { %3887 = vmatprep.subr.bf16.mxu0 %v5973_v1  ;;  %2652 = vmatpush1.bf16.msra.mxu1 %v5905_v19 }
  0x75   : > { %2653 = vmatprep.subr.bf16.mxu1 %v5973_v1 }
  0x76   : > { %5589 = vmatmul.mubr.msk.bf16.gmra.mrb[8].mxu0 %vm502_vm0, %v5834_v54 }
  0x77   : > { %5592 = vmatprep.mubr.msk.bf16.mxu0 %vm502_vm0, %v5836_v56 }
  0x78   : > { %2654 = vmatpush1.bf16.msra.mxu1 %v5906_v22 }
  0x79   : > { %2655 = vmatprep.subr.bf16.mxu1 %v5973_v1 }
  0x7c   : > { %2656 = vmatpush1.bf16.msra.mxu1 %v5907_v23 }
  0x7d   : > { %2657 = vmatprep.subr.bf16.mxu1 %v5973_v1 }
  0x7e   : > { %5593 = vmatmul.mubr.msk.bf16.gmra.mrb[12].mxu0 %vm502_vm0, %v5837_v58 }
  0x7f   : > { %5596 = vmatprep.mubr.msk.bf16.mxu0 %vm502_vm0, %v5838_v60 }
  0x80   : > { %2658 = vmatpush1.bf16.msra.mxu1 %v5908_v45 }
  0x81   : > { %2659 = vmatprep.subr.bf16.mxu1 %v5973_v1 }
  0x84   : > { %2660 = vmatpush1.bf16.msra.mxu1 %v5909_v46 }
  0x85   : > { %2661 = vmatprep.subr.bf16.mxu1 %v5973_v1 }
  0x86   : > { %5597 = vmatmul.mubr.msk.bf16.gmra.mrb[16].mxu0 %vm502_vm0, %v5839_v63 }
  0x87   : > { %5600 = vmatprep.mubr.msk.bf16.mxu0 %vm502_vm0, %v5840_v2 }
  0x88   : > { %2662 = vmatpush1.bf16.msra.mxu1 %v5910_v47 }
  0x89   : > { %2663 = vmatprep.subr.bf16.mxu1 %v5973_v1 }
  0x8c   : > { %2664 = vmatpush1.bf16.msra.mxu1 %v5911_v50 }
  0x8d   : > { %2914 = vmatprep.subr.bf16.mxu1 %v5973_v1 }
  0x8e   : > { %5601 = vmatmul.mubr.msk.bf16.gmra.mrb[20].mxu0 %vm502_vm0, %v5841_v7 }
  0x8f   : > { %5604 = vmatprep.mubr.msk.bf16.mxu0 %vm502_vm0, %v5843_v9 }
  0x96   : > { %5605 = vmatmul.mubr.msk.bf16.gmra.mrb[24].mxu0 %vm502_vm0, %v5844_v12 }
  0x97   : > { %5608 = vmatprep.mubr.msk.bf16.mxu0 %vm502_vm0, %v5845_v13 }
  0x9e   : > { %5609 = vmatmul.mubr.msk.bf16.gmra.mrb[28].mxu0 %vm502_vm0, %v5846_v16 }
  0x9f   : > { %5612 = vmatprep.mubr.msk.bf16.mxu0 %vm502_vm0, %v5849_v17 }
  0xa6   : > { %5613 = vmatmul.mubr.msk.bf16.gmra.mrb[32].mxu0 %vm502_vm0, %v5850_v20 }
  0xa7   : > { %5616 = vmatprep.mubr.msk.bf16.mxu0 %vm502_vm0, %v5853_v21 }
  0xae   : > { %5617 = vmatmul.mubr.msk.bf16.gmra.mrb[36].mxu0 %vm502_vm0, %v5854_v24 }
  0xaf   : > { %5628 = vmatprep.mubr.msk.bf16.mxu0 %vm502_vm0, %v5858_v25 }
  0xb6   : > { %5629 = vmatmul.mubr.msk.bf16.vlgmr.msra.gmra.mrb[0].mxu0 %vm502_vm0, %v5859_v26 }
  0xb7   : > { %5632 = vmatprep.mubr.msk.bf16.mxu0 %vm502_vm0, %v5862_v27  ;;  %v6380_v27 = vld [vmem:[%s7852_s2] ss:$0 sm:$0xff] }
  0xbe   : > { %5633 = vmatmul.mubr.msk.bf16.gmra.mrb[4].mxu0 %vm502_vm0, %v5863_v28 }
  0xbf   : > { %5636 = vmatprep.mubr.msk.bf16.mxu0 %vm502_vm0, %v5865_v29 }
  0xc6   : > { %5637 = vmatmul.mubr.msk.bf16.gmra.mrb[8].mxu0 %vm502_vm0, %v5867_v30 }
  0xc7   : > { %5640 = vmatprep.mubr.msk.bf16.mxu0 %vm502_vm0, %v5869_v31 }
  0xce   : > { %5641 = vmatmul.mubr.msk.bf16.gmra.mrb[12].mxu0 %vm502_vm0, %v5871_v32 }
  0xcf   : > { %5644 = vmatprep.mubr.msk.bf16.mxu0 %vm502_vm0, %v5873_v33 }
  0xd6   : > { %5645 = vmatmul.mubr.msk.bf16.gmra.mrb[16].mxu0 %vm502_vm0, %v5875_v34 }
  0xd7   : > { %5648 = vmatprep.mubr.msk.bf16.mxu0 %vm502_vm0, %v5877_v35 }
  0xde   : > { %5649 = vmatmul.mubr.msk.bf16.gmra.mrb[20].mxu0 %vm502_vm0, %v5879_v36 }
  0xdf   : > { %5652 = vmatprep.mubr.msk.bf16.mxu0 %vm502_vm0, %v5881_v37 }
  0xe6   : > { %5653 = vmatmul.mubr.msk.bf16.gmra.mrb[24].mxu0 %vm502_vm0, %v5883_v38 }
  0xe7   : > { %5656 = vmatprep.mubr.msk.bf16.mxu0 %vm502_vm0, %v5885_v39 }
  0xec   : > { %v5486_v48 = vpop.f32.mrb[0].mxu1 }
  0xed   : > { %v597_v49 = vpop.f32.mrb[1].mxu1 }
  0xee   : > { %5657 = vmatmul.mubr.msk.bf16.gmra.mrb[28].mxu0 %vm502_vm0, %v5887_v40  ;;  %v5487_v51 = vpop.f32.mrb[2].mxu1 }
  0xef   : > { %5660 = vmatprep.mubr.msk.bf16.mxu0 %vm502_vm0, %v5889_v41  ;;  %v600_v52 = vpop.f32.mrb[3].mxu1 }
  0xf4   : > { %v5490_v53 = vpop.f32.mrb[4].mxu1 }
  0xf5   : > { %v613_v54 = vpop.f32.mrb[5].mxu1 }
  0xf6   : > { %5661 = vmatmul.mubr.msk.bf16.gmra.mrb[32].mxu0 %vm502_vm0, %v5891_v42  ;;  %v6309_v55 = vpop.f32.mrb[6].mxu1 }
  0xf7   : > { %5664 = vmatprep.mubr.msk.bf16.mxu0 %vm502_vm0, %v5893_v43  ;;  %v6311_v56 = vpop.f32.mrb[7].mxu1 }
  0xfc   : > { %v6313_v57 = vpop.f32.mrb[8].mxu1 }
  0xfd   : > { %v6315_v58 = vpop.f32.mrb[9].mxu1 }
  0xfe   : > { %5665 = vmatmul.mubr.msk.bf16.gmra.mrb[36].mxu0 %vm502_vm0, %v5895_v44  ;;  %v6317_v59 = vpop.f32.mrb[10].mxu1 }
  0xff   : > { %v6319_v60 = vpop.f32.mrb[11].mxu1 }
 0x104   : > { %v6321_v61 = vpop.f32.mrb[12].mxu1 }
 0x105   : > { %v6323_v62 = vpop.f32.mrb[13].mxu1 }
 0x106   : > { %v6325_v63 = vpop.f32.mrb[14].mxu1 }
 0x107   : > { %v6327_v0 = vpop.f32.mrb[15].mxu1 }
 0x10c   : > { %v6329_v2 = vpop.f32.mrb[16].mxu1 }
 0x10d   : > { %v6331_v3 = vpop.f32.mrb[17].mxu1 }
 0x10e   : > { %v6333_v4 = vpop.f32.mrb[18].mxu1 }
 0x10f   : > { %v6335_v5 = vpop.f32.mrb[19].mxu1 }
 0x114   : > { %v6337_v6 = vpop.f32.mrb[20].mxu1 }
 0x115   : > { %v6339_v7 = vpop.f32.mrb[21].mxu1 }
 0x116   : > { %v6341_v8 = vpop.f32.mrb[22].mxu1 }
 0x117   : > { %v6343_v9 = vpop.f32.mrb[23].mxu1 }
 0x11c   : > { %v6345_v10 = vpop.f32.mrb[24].mxu1 }
 0x11d   : > { %v6347_v11 = vpop.f32.mrb[25].mxu1 }
 0x11e   : > { %v6349_v12 = vpop.f32.mrb[26].mxu1 }
 0x11f   : > { %v6351_v13 = vpop.f32.mrb[27].mxu1 }
 0x124   : > { %v6353_v14 = vpop.f32.mrb[28].mxu1 }
 0x125   : > { %v6355_v15 = vpop.f32.mrb[29].mxu1 }
 0x126   : > { %v6357_v16 = vpop.f32.mrb[30].mxu1 }
 0x127   : > { %v6359_v17 = vpop.f32.mrb[31].mxu1 }
 0x12c   : > { %v6361_v18 = vpop.f32.mrb[32].mxu1 }
 0x12d   : > { %v6363_v19 = vpop.f32.mrb[33].mxu1 }
 0x12e   : > { %v6365_v20 = vpop.f32.mrb[34].mxu1 }
 0x12f   : > { %v6367_v21 = vpop.f32.mrb[35].mxu1 }
 0x134   : > { %v6369_v22 = vpop.f32.mrb[36].mxu1 }
 0x135   : > { %v6371_v23 = vpop.f32.mrb[37].mxu1 }
 0x136   : > { %v6373_v24 = vpop.f32.mrb[38].mxu1 }
 0x137   : > { %v6375_v25 = vpop.f32.mrb[39].mxu1 }
 0x189   : > { %v5630_v26 = vpop.f32.mrb[0].mxu0 }
 0x18a   : > { %v5668_v28 = vadd.f32 %v5630_v26, %v5486_v48  ;;  %v1868_v29 = vpop.f32.mrb[1].mxu0 }
 0x18b   : > { %v5669_v30 = vadd.f32 %v1868_v29, %v597_v49  ;;  %v5631_v31 = vpop.f32.mrb[2].mxu0 }
 0x18c   : > { %v2076_v32 = vadd.f32 %v5668_v28, %v6380_v27  ;;  %v5670_v33 = vadd.f32 %v5631_v31, %v5487_v51  ;;  %v1871_v34 = vpop.f32.mrb[3].mxu0 }
 0x18d   : > { %v2074_v35 = vadd.f32 %v5669_v30, %v6380_v27  ;;  %v5671_v36 = vadd.f32 %v1871_v34, %v600_v52 }
 0x18e   : > { %v2116_v37 = vmax.f32 %v2076_v32, 0.0  ;;  %v2077_v38 = vadd.f32 %v5670_v33, %v6380_v27 }
 0x18f   : > { %v2114_v39 = vmax.f32 %v2074_v35, 0.0  ;;  %v2075_v40 = vadd.f32 %v5671_v36, %v6380_v27 }
 0x190   : > { %v2117_v41 = vmax.f32 %v2077_v38, 0.0  ;;  %v2198_v44 = vrot.slane %v2116_v37, 1 }
 0x191   : > { %v2115_v42 = vmax.f32 %v2075_v40, 0.0  ;;  %v5634_v43 = vpop.f32.mrb[4].mxu0  ;;  %v6388_v49 = vrot.slane %v2114_v39, 1 }
 0x192   : > { %v2200_v45 = vrot.slane %v2117_v41, 1  ;;  %v6386_v46 = vpack.c.bf16 %v2117_v41, %v2116_v37  ;;  %v5672_v47 = vadd.f32 %v5634_v43, %v5490_v53  ;;  %v1884_v48 = vpop.f32.mrb[5].mxu0 }
 0x193   : > { %v2196_v50 = vrot.slane %v2115_v42, 1  ;;  %v6390_v51 = vpack.c.bf16 %v2115_v42, %v2114_v39  ;;  %v5673_v52 = vadd.f32 %v1884_v48, %v613_v54  ;;  %v5635_v26 = vpop.f32.mrb[6].mxu0 }
 0x194   : > { %v2080_v28 = vadd.f32 %v5672_v47, %v6380_v27  ;;  %v5674_v29 = vadd.f32 %v5635_v26, %v6309_v55  ;;  %v1887_v30 = vpop.f32.mrb[7].mxu0  ;;  %v2201_v31 = vsel %vm2194_vm1, %v2198_v44, %v2200_v45 }
 0x195   : > { %v2078_v32 = vadd.f32 %v5673_v52, %v6380_v27  ;;  %v5675_v33 = vadd.f32 %v1887_v30, %v6311_v56  ;;  %v6399_v53 = vsel %vm2194_vm1, %v6388_v49, %v2196_v50  ;;  %v6402_v34 = vsel %vm2194_vm1, %v2196_v50, %v2198_v44 }
 0x196   : > { %v2120_v54 = vmax.f32 %v2080_v28, 0.0  ;;  %v2081_v35 = vadd.f32 %v5674_v29, %v6380_v27  ;;  %v2336_v55 = vpack.c.bf16 %v6402_v34, %v6399_v53 }
 0x197   : > { %v2118_v36 = vmax.f32 %v2078_v32, 0.0  ;;  %v2079_v37 = vadd.f32 %v5675_v33, %v6380_v27 }
 0x198   : > { %v2121_v38 = vmax.f32 %v2081_v35, 0.0  ;;  %v2206_v41 = vrot.slane %v2120_v54, 1 }
 0x199   : > { %v2202_v39 = vrot.slane %v2118_v36, 1  ;;  %v2119_v40 = vmax.f32 %v2079_v37, 0.0  ;;  %v5638_v56 = vpop.f32.mrb[8].mxu0 }
 0x19a   : > { %v2208_v42 = vrot.slane %v2121_v38, 1  ;;  %v5676_v43 = vadd.f32 %v5638_v56, %v6313_v57  ;;  %v1900_v47 = vpop.f32.mrb[9].mxu0  ;;  %v6409_v44 = vpack.c.bf16 %v2121_v38, %v2120_v54  ;;  %v5912_v57 = vld [vmem:[%s7853_s3] sm:$0xff]  }
 0x19b   : > { %v2204_v48 = vrot.slane %v2119_v40, 1  ;;  %v5677_v50 = vadd.f32 %v1900_v47, %v6315_v58  ;;  %v5639_v52 = vpop.f32.mrb[10].mxu0  ;;  %v2203_v26 = vsel %vm2194_vm1, %v2200_v45, %v2202_v39  ;;  %v6413_v28 = vpack.c.bf16 %v2119_v40, %v2118_v36 }
 0x19c   : > { %v2084_v29 = vadd.f32 %v5676_v43, %v6380_v27  ;;  %v5678_v30 = vadd.f32 %v5639_v52, %v6317_v59  ;;  %v1903_v32 = vpop.f32.mrb[11].mxu0  ;;  %v6417_v33 = vpack.c.bf16 %v2203_v26, %v2201_v31  ;;  %v2209_v54 = vsel %vm2194_vm1, %v2206_v41, %v2208_v42 }
 0x19d   : > { %v2082_v58 = vadd.f32 %v5677_v50, %v6380_v27  ;;  %v5679_v35 = vadd.f32 %v1903_v32, %v6319_v60  ;;  %v2205_v45 = vsel %vm2194_vm1, %v2202_v39, %v2204_v48  ;;  %v2207_v36 = vsel %vm2194_vm1, %v2204_v48, %v2206_v41  ;;  %v5913_v60 = vld [vmem:[%s7853_s3 + $0x8] sm:$0xff]  }
 0x19e   : > { %v2124_v37 = vmax.f32 %v2084_v29, 0.0  ;;  %v2085_v59 = vadd.f32 %v5678_v30, %v6380_v27  ;;  %2665 = vmatprep.mubr.bf16.mxu1 %v6417_v33  ;;  %v6429_v31 = vpack.c.bf16 %v2207_v36, %v2205_v45 }
 0x19f   : > { %v2122_v38 = vmax.f32 %v2082_v58, 0.0  ;;  %v2083_v40 = vadd.f32 %v5679_v35, %v6380_v27  ;;  %2666 = vmatmul.mubr.bf16.vlgmr.msra.gmra.mrb[40].mxu1 %v6386_v46 }
 0x1a0   : > { %v2125_v56 = vmax.f32 %v2085_v59, 0.0  ;;  %2673 = vmatprep.mubr.bf16.mxu1 %v6429_v31  ;;  %2915 = vmatpush1.bf16.msra.mxu1 %v5912_v57  ;;  %v2214_v47 = vrot.slane %v2124_v37, 1 }
 0x1a1   : > { %v2210_v39 = vrot.slane %v2122_v38, 1  ;;  %v2123_v41 = vmax.f32 %v2083_v40, 0.0  ;;  %v5642_v43 = vpop.f32.mrb[12].mxu0  ;;  %2916 = vmatprep.subr.bf16.mxu1 %v5973_v1 }
 0x1a2   : > { %v2216_v48 = vrot.slane %v2125_v56, 1  ;;  %v5680_v50 = vadd.f32 %v5642_v43, %v6321_v61  ;;  %v1916_v52 = vpop.f32.mrb[13].mxu0  ;;  %v6439_v26 = vpack.c.bf16 %v2125_v56, %v2124_v37  ;;  %v5914_v61 = vld [vmem:[%s7853_s3 + $0x10] sm:$0xff]  }
 0x1a3   : > { %v2212_v29 = vrot.slane %v2123_v41, 1  ;;  %v5681_v30 = vadd.f32 %v1916_v52, %v6323_v62  ;;  %v5643_v32 = vpop.f32.mrb[14].mxu0  ;;  %v2211_v57 = vsel %vm2194_vm1, %v2208_v42, %v2210_v39  ;;  %v6443_v58 = vpack.c.bf16 %v2123_v41, %v2122_v38 }
 0x1a4   : > { %v2088_v35 = vadd.f32 %v5680_v50, %v6380_v27  ;;  %v5682_v45 = vadd.f32 %v5643_v32, %v6325_v63  ;;  %v1919_v36 = vpop.f32.mrb[15].mxu0  ;;  %v6447_v59 = vpack.c.bf16 %v2211_v57, %v2209_v54  ;;  %2917 = vmatpush1.bf16.msra.mxu1 %v5913_v60  ;;  %v2217_v37 = vsel %vm2194_vm1, %v2214_v47, %v2216_v48 }
 0x1a5   : > { %v2086_v62 = vadd.f32 %v5681_v30, %v6380_v27  ;;  %v5683_v42 = vadd.f32 %v1919_v36, %v6327_v0  ;;  %v2213_v38 = vsel %vm2194_vm1, %v2210_v39, %v2212_v29  ;;  %v2215_v40 = vsel %vm2194_vm1, %v2212_v29, %v2214_v47  ;;  %2918 = vmatprep.subr.bf16.mxu1 %v5973_v1  ;;  %v5915_v0 = vld [vmem:[%s7853_s3 + $0x18] sm:$0xff]  }
 0x1a6   : > { %v2128_v63 = vmax.f32 %v2088_v35, 0.0  ;;  %v2089_v54 = vadd.f32 %v5682_v45, %v6380_v27  ;;  %v6459_v56 = vpack.c.bf16 %v2215_v40, %v2213_v38 }
 0x1a7   : > { %v2126_v60 = vmax.f32 %v2086_v62, 0.0  ;;  %v2087_v41 = vadd.f32 %v5683_v42, %v6380_v27  ;;  %2674 = vmatmul.mubr.bf16.gmra.mrb[44].mxu1 %v6413_v28 }
 0x1a8   : > { %v2129_v43 = vmax.f32 %v2089_v54, 0.0  ;;  %2681 = vmatprep.mubr.bf16.mxu1 %v6447_v59  ;;  %2919 = vmatpush1.bf16.msra.mxu1 %v5914_v61  ;;  %v2222_v52 = vrot.slane %v2128_v63, 1 }
 0x1a9   : > { %v2218_v39 = vrot.slane %v2126_v60, 1  ;;  %v2127_v47 = vmax.f32 %v2087_v41, 0.0  ;;  %v5646_v50 = vpop.f32.mrb[16].mxu0  ;;  %2920 = vmatprep.subr.bf16.mxu1 %v5973_v1 }
 0x1aa   : > { %v2224_v29 = vrot.slane %v2129_v43, 1  ;;  %v5684_v30 = vadd.f32 %v5646_v50, %v6329_v2  ;;  %v1932_v32 = vpop.f32.mrb[17].mxu0  ;;  %v6469_v57 = vpack.c.bf16 %v2129_v43, %v2128_v63  ;;  %v5916_v2 = vld [vmem:[%s7853_s3 + $0x20] sm:$0xff]  }
 0x1ab   : > { %v2220_v35 = vrot.slane %v2127_v47, 1  ;;  %v5685_v45 = vadd.f32 %v1932_v32, %v6331_v3  ;;  %v5647_v36 = vpop.f32.mrb[18].mxu0  ;;  %v2219_v61 = vsel %vm2194_vm1, %v2216_v48, %v2218_v39  ;;  %v6473_v62 = vpack.c.bf16 %v2127_v47, %v2126_v60 }
 0x1ac   : > { %v2092_v42 = vadd.f32 %v5684_v30, %v6380_v27  ;;  %v5686_v38 = vadd.f32 %v5647_v36, %v6333_v4  ;;  %v1935_v40 = vpop.f32.mrb[19].mxu0  ;;  %v6477_v54 = vpack.c.bf16 %v2219_v61, %v2217_v37  ;;  %2921 = vmatpush1.bf16.msra.mxu1 %v5915_v0  ;;  %v2225_v63 = vsel %vm2194_vm1, %v2222_v52, %v2224_v29 }
 0x1ad   : > { %v2090_v3 = vadd.f32 %v5685_v45, %v6380_v27  ;;  %v5687_v48 = vadd.f32 %v1935_v40, %v6335_v5  ;;  %v2221_v60 = vsel %vm2194_vm1, %v2218_v39, %v2220_v35  ;;  %v2223_v41 = vsel %vm2194_vm1, %v2220_v35, %v2222_v52  ;;  %2922 = vmatprep.subr.bf16.mxu1 %v5973_v1  ;;  %v5917_v5 = vld [vmem:[%s7853_s3 + $0x28] sm:$0xff]  }
 0x1ae   : > { %v2132_v4 = vmax.f32 %v2092_v42, 0.0  ;;  %v2093_v37 = vadd.f32 %v5686_v38, %v6380_v27  ;;  %v6489_v43 = vpack.c.bf16 %v2223_v41, %v2221_v60 }
 0x1af   : > { %v2130_v0 = vmax.f32 %v2090_v3, 0.0  ;;  %v2091_v47 = vadd.f32 %v5687_v48, %v6380_v27  ;;  %2682 = vmatmul.mubr.bf16.gmra.mrb[48].mxu1 %v6409_v44 }
 0x1b0   : > { %v2133_v50 = vmax.f32 %v2093_v37, 0.0  ;;  %2689 = vmatprep.mubr.bf16.mxu1 %v6459_v56  ;;  %2923 = vmatpush1.bf16.msra.mxu1 %v5916_v2  ;;  %v2230_v32 = vrot.slane %v2132_v4, 1 }
 0x1b1   : > { %v2226_v39 = vrot.slane %v2130_v0, 1  ;;  %v2131_v52 = vmax.f32 %v2091_v47, 0.0  ;;  %v5650_v30 = vpop.f32.mrb[20].mxu0  ;;  %2924 = vmatprep.subr.bf16.mxu1 %v5973_v1 }
 0x1b2   : > { %v2232_v35 = vrot.slane %v2133_v50, 1  ;;  %v5688_v45 = vadd.f32 %v5650_v30, %v6337_v6  ;;  %v1948_v36 = vpop.f32.mrb[21].mxu0  ;;  %v6499_v61 = vpack.c.bf16 %v2133_v50, %v2132_v4  ;;  %v5918_v4 = vld [vmem:[%s7853_s3 + $0x30] sm:$0xff]  }
 0x1b3   : > { %v2228_v42 = vrot.slane %v2131_v52, 1  ;;  %v5689_v38 = vadd.f32 %v1948_v36, %v6339_v7  ;;  %v5651_v40 = vpop.f32.mrb[22].mxu0  ;;  %v2227_v2 = vsel %vm2194_vm1, %v2224_v29, %v2226_v39  ;;  %v6503_v3 = vpack.c.bf16 %v2131_v52, %v2130_v0 }
 0x1b4   : > { %v2096_v48 = vadd.f32 %v5688_v45, %v6380_v27  ;;  %v5690_v60 = vadd.f32 %v5651_v40, %v6341_v8  ;;  %v1951_v41 = vpop.f32.mrb[23].mxu0  ;;  %v6507_v37 = vpack.c.bf16 %v2227_v2, %v2225_v63  ;;  %2925 = vmatpush1.bf16.msra.mxu1 %v5917_v5  ;;  %v2233_v6 = vsel %vm2194_vm1, %v2230_v32, %v2232_v35 }
 0x1b5   : > { %v2094_v7 = vadd.f32 %v5689_v38, %v6380_v27  ;;  %v5691_v29 = vadd.f32 %v1951_v41, %v6343_v9  ;;  %v2229_v0 = vsel %vm2194_vm1, %v2226_v39, %v2228_v42  ;;  %v2231_v47 = vsel %vm2194_vm1, %v2228_v42, %v2230_v32  ;;  %2926 = vmatprep.subr.bf16.mxu1 %v5973_v1  ;;  %v5919_v9 = vld [vmem:[%s7853_s3 + $0x38] sm:$0xff]  }
 0x1b6   : > { %v2136_v8 = vmax.f32 %v2096_v48, 0.0  ;;  %v2097_v63 = vadd.f32 %v5690_v60, %v6380_v27  ;;  %v6519_v50 = vpack.c.bf16 %v2231_v47, %v2229_v0 }
 0x1b7   : > { %v2134_v5 = vmax.f32 %v2094_v7, 0.0  ;;  %v2095_v52 = vadd.f32 %v5691_v29, %v6380_v27  ;;  %2690 = vmatmul.mubr.bf16.gmra.mrb[52].mxu1 %v6443_v58 }
 0x1b8   : > { %v2137_v30 = vmax.f32 %v2097_v63, 0.0  ;;  %2697 = vmatprep.mubr.bf16.mxu1 %v6477_v54  ;;  %2927 = vmatpush1.bf16.msra.mxu1 %v5918_v4  ;;  %v2238_v36 = vrot.slane %v2136_v8, 1 }
 0x1b9   : > { %v2234_v39 = vrot.slane %v2134_v5, 1  ;;  %v2135_v32 = vmax.f32 %v2095_v52, 0.0  ;;  %v5654_v45 = vpop.f32.mrb[24].mxu0  ;;  %2928 = vmatprep.subr.bf16.mxu1 %v5973_v1 }
 0x1ba   : > { %v2240_v42 = vrot.slane %v2137_v30, 1  ;;  %v5692_v38 = vadd.f32 %v5654_v45, %v6345_v10  ;;  %v1964_v40 = vpop.f32.mrb[25].mxu0  ;;  %v6529_v2 = vpack.c.bf16 %v2137_v30, %v2136_v8  ;;  %v5920_v8 = vld [vmem:[%s7853_s3 + $0x40] sm:$0xff]  }
 0x1bb   : > { %v2236_v48 = vrot.slane %v2135_v32, 1  ;;  %v5693_v60 = vadd.f32 %v1964_v40, %v6347_v11  ;;  %v5655_v41 = vpop.f32.mrb[26].mxu0  ;;  %v2235_v4 = vsel %vm2194_vm1, %v2232_v35, %v2234_v39  ;;  %v6533_v7 = vpack.c.bf16 %v2135_v32, %v2134_v5 }
 0x1bc   : > { %v2100_v29 = vadd.f32 %v5692_v38, %v6380_v27  ;;  %v5694_v0 = vadd.f32 %v5655_v41, %v6349_v12  ;;  %v1967_v47 = vpop.f32.mrb[27].mxu0  ;;  %v6537_v63 = vpack.c.bf16 %v2235_v4, %v2233_v6  ;;  %2929 = vmatpush1.bf16.msra.mxu1 %v5919_v9  ;;  %v2241_v10 = vsel %vm2194_vm1, %v2238_v36, %v2240_v42 }
 0x1bd   : > { %v2098_v11 = vadd.f32 %v5693_v60, %v6380_v27  ;;  %v5695_v35 = vadd.f32 %v1967_v47, %v6351_v13  ;;  %v2237_v5 = vsel %vm2194_vm1, %v2234_v39, %v2236_v48  ;;  %v2239_v52 = vsel %vm2194_vm1, %v2236_v48, %v2238_v36  ;;  %2930 = vmatprep.subr.bf16.mxu1 %v5973_v1  ;;  %v5921_v13 = vld [vmem:[%s7853_s3 + $0x48] sm:$0xff]  }
 0x1be   : > { %v2140_v12 = vmax.f32 %v2100_v29, 0.0  ;;  %v2101_v6 = vadd.f32 %v5694_v0, %v6380_v27  ;;  %v6549_v30 = vpack.c.bf16 %v2239_v52, %v2237_v5 }
 0x1bf   : > { %v2138_v9 = vmax.f32 %v2098_v11, 0.0  ;;  %v2099_v32 = vadd.f32 %v5695_v35, %v6380_v27  ;;  %2698 = vmatmul.mubr.bf16.gmra.mrb[56].mxu1 %v6439_v26 }
 0x1c0   : > { %v2141_v45 = vmax.f32 %v2101_v6, 0.0  ;;  %2705 = vmatprep.mubr.bf16.mxu1 %v6489_v43  ;;  %2931 = vmatpush1.bf16.msra.mxu1 %v5920_v8  ;;  %v2246_v40 = vrot.slane %v2140_v12, 1 }
 0x1c1   : > { %v2242_v39 = vrot.slane %v2138_v9, 1  ;;  %v2139_v36 = vmax.f32 %v2099_v32, 0.0  ;;  %v5658_v38 = vpop.f32.mrb[28].mxu0  ;;  %2932 = vmatprep.subr.bf16.mxu1 %v5973_v1 }
 0x1c2   : > { %v2248_v48 = vrot.slane %v2141_v45, 1  ;;  %v5696_v60 = vadd.f32 %v5658_v38, %v6353_v14  ;;  %v1980_v41 = vpop.f32.mrb[29].mxu0  ;;  %v6559_v4 = vpack.c.bf16 %v2141_v45, %v2140_v12  ;;  %v5922_v12 = vld [vmem:[%s7853_s3 + $0x50] sm:$0xff]  }
 0x1c3   : > { %v2244_v29 = vrot.slane %v2139_v36, 1  ;;  %v5697_v0 = vadd.f32 %v1980_v41, %v6355_v15  ;;  %v5659_v47 = vpop.f32.mrb[30].mxu0  ;;  %v2243_v8 = vsel %vm2194_vm1, %v2240_v42, %v2242_v39  ;;  %v6563_v11 = vpack.c.bf16 %v2139_v36, %v2138_v9 }
 0x1c4   : > { %v2104_v35 = vadd.f32 %v5696_v60, %v6380_v27  ;;  %v5698_v5 = vadd.f32 %v5659_v47, %v6357_v16  ;;  %v1983_v52 = vpop.f32.mrb[31].mxu0  ;;  %v6567_v6 = vpack.c.bf16 %v2243_v8, %v2241_v10  ;;  %2933 = vmatpush1.bf16.msra.mxu1 %v5921_v13  ;;  %v2249_v14 = vsel %vm2194_vm1, %v2246_v40, %v2248_v48 }
 0x1c5   : > { %v2102_v15 = vadd.f32 %v5697_v0, %v6380_v27  ;;  %v5699_v42 = vadd.f32 %v1983_v52, %v6359_v17  ;;  %v2245_v9 = vsel %vm2194_vm1, %v2242_v39, %v2244_v29  ;;  %v2247_v32 = vsel %vm2194_vm1, %v2244_v29, %v2246_v40  ;;  %2934 = vmatprep.subr.bf16.mxu1 %v5973_v1  ;;  %v5923_v17 = vld [vmem:[%s7853_s3 + $0x58] sm:$0xff]  }
 0x1c6   : > { %v2144_v16 = vmax.f32 %v2104_v35, 0.0  ;;  %v2105_v10 = vadd.f32 %v5698_v5, %v6380_v27  ;;  %v6579_v45 = vpack.c.bf16 %v2247_v32, %v2245_v9 }
 0x1c7   : > { %v2142_v13 = vmax.f32 %v2102_v15, 0.0  ;;  %v2103_v36 = vadd.f32 %v5699_v42, %v6380_v27  ;;  %2706 = vmatmul.mubr.bf16.gmra.mrb[60].mxu1 %v6473_v62 }
 0x1c8   : > { %v2145_v38 = vmax.f32 %v2105_v10, 0.0  ;;  %2713 = vmatprep.mubr.bf16.mxu1 %v6507_v37  ;;  %2935 = vmatpush1.bf16.msra.mxu1 %v5922_v12  ;;  %v2254_v41 = vrot.slane %v2144_v16, 1 }
 0x1c9   : > { %v2250_v39 = vrot.slane %v2142_v13, 1  ;;  %v2143_v40 = vmax.f32 %v2103_v36, 0.0  ;;  %v5662_v60 = vpop.f32.mrb[32].mxu0  ;;  %2936 = vmatprep.subr.bf16.mxu1 %v5973_v1 }
 0x1ca   : > { %v2256_v29 = vrot.slane %v2145_v38, 1  ;;  %v5700_v0 = vadd.f32 %v5662_v60, %v6361_v18  ;;  %v1996_v47 = vpop.f32.mrb[33].mxu0  ;;  %v6589_v8 = vpack.c.bf16 %v2145_v38, %v2144_v16  ;;  %v5924_v16 = vld [vmem:[%s7853_s3 + $0x60] sm:$0xff]  }
 0x1cb   : > { %v2252_v35 = vrot.slane %v2143_v40, 1  ;;  %v5701_v5 = vadd.f32 %v1996_v47, %v6363_v19  ;;  %v5663_v52 = vpop.f32.mrb[34].mxu0  ;;  %v2251_v12 = vsel %vm2194_vm1, %v2248_v48, %v2250_v39  ;;  %v6593_v15 = vpack.c.bf16 %v2143_v40, %v2142_v13 }
 0x1cc   : > { %v2108_v42 = vadd.f32 %v5700_v0, %v6380_v27  ;;  %v5702_v9 = vadd.f32 %v5663_v52, %v6365_v20  ;;  %v1999_v32 = vpop.f32.mrb[35].mxu0  ;;  %v6597_v10 = vpack.c.bf16 %v2251_v12, %v2249_v14  ;;  %v2257_v18 = vsel %vm2194_vm1, %v2254_v41, %v2256_v29  ;;  %2937 = vmatpush1.bf16.msra.mxu1 %v5923_v17 }
 0x1cd   : > { %v2106_v19 = vadd.f32 %v5701_v5, %v6380_v27  ;;  %v5703_v48 = vadd.f32 %v1999_v32, %v6367_v21  ;;  %v2253_v13 = vsel %vm2194_vm1, %v2250_v39, %v2252_v35  ;;  %v2255_v36 = vsel %vm2194_vm1, %v2252_v35, %v2254_v41  ;;  %2938 = vmatprep.subr.bf16.mxu1 %v5973_v1  ;;  %v5925_v21 = vld [vmem:[%s7853_s3 + $0x68] sm:$0xff]  }
 0x1ce   : > { %v2148_v20 = vmax.f32 %v2108_v42, 0.0  ;;  %v2109_v14 = vadd.f32 %v5702_v9, %v6380_v27  ;;  %v6609_v38 = vpack.c.bf16 %v2255_v36, %v2253_v13 }
 0x1cf   : > { %v2146_v17 = vmax.f32 %v2106_v19, 0.0  ;;  %v2107_v40 = vadd.f32 %v5703_v48, %v6380_v27  ;;  %2714 = vmatmul.mubr.bf16.gmra.mrb[64].mxu1 %v6469_v57 }
 0x1d0   : > { %v2149_v60 = vmax.f32 %v2109_v14, 0.0  ;;  %2721 = vmatprep.mubr.bf16.mxu1 %v6519_v50  ;;  %2939 = vmatpush1.bf16.msra.mxu1 %v5924_v16  ;;  %v2262_v47 = vrot.slane %v2148_v20, 1 }
 0x1d1   : > { %v2258_v39 = vrot.slane %v2146_v17, 1  ;;  %v2147_v41 = vmax.f32 %v2107_v40, 0.0  ;;  %v5666_v0 = vpop.f32.mrb[36].mxu0  ;;  %2940 = vmatprep.subr.bf16.mxu1 %v5973_v1 }
 0x1d2   : > { %v2264_v35 = vrot.slane %v2149_v60, 1  ;;  %v5704_v5 = vadd.f32 %v5666_v0, %v6369_v22  ;;  %v2012_v52 = vpop.f32.mrb[37].mxu0  ;;  %v6619_v12 = vpack.c.bf16 %v2149_v60, %v2148_v20  ;;  %v5926_v20 = vld [vmem:[%s7853_s3 + $0x70] sm:$0xff]  }
 0x1d3   : > { %v2260_v42 = vrot.slane %v2147_v41, 1  ;;  %v5705_v9 = vadd.f32 %v2012_v52, %v6371_v23  ;;  %v5667_v32 = vpop.f32.mrb[38].mxu0  ;;  %v2259_v16 = vsel %vm2194_vm1, %v2256_v29, %v2258_v39  ;;  %v6623_v19 = vpack.c.bf16 %v2147_v41, %v2146_v17 }
 0x1d4   : > { %v2112_v48 = vadd.f32 %v5704_v5, %v6380_v27  ;;  %v5706_v13 = vadd.f32 %v5667_v32, %v6373_v24  ;;  %v2015_v36 = vpop.f32.mrb[39].mxu0  ;;  %v6627_v14 = vpack.c.bf16 %v2259_v16, %v2257_v18  ;;  %v2265_v22 = vsel %vm2194_vm1, %v2262_v47, %v2264_v35  ;;  %2941 = vmatpush1.bf16.msra.mxu1 %v5925_v21 }
 0x1d5   : > { %v2110_v23 = vadd.f32 %v5705_v9, %v6380_v27  ;;  %v5707_v29 = vadd.f32 %v2015_v36, %v6375_v25  ;;  %v2261_v17 = vsel %vm2194_vm1, %v2258_v39, %v2260_v42  ;;  %v2263_v40 = vsel %vm2194_vm1, %v2260_v42, %v2262_v47  ;;  %2942 = vmatprep.subr.bf16.mxu1 %v5973_v1  ;;  %v5927_v25 = vld [vmem:[%s7853_s3 + $0x78] sm:$0xff]  }
 0x1d6   : > { %v2152_v24 = vmax.f32 %v2112_v48, 0.0  ;;  %v2113_v18 = vadd.f32 %v5706_v13, %v6380_v27  ;;  %v6639_v60 = vpack.c.bf16 %v2263_v40, %v2261_v17 }
 0x1d7   : > { %v2150_v21 = vmax.f32 %v2110_v23, 0.0  ;;  %v2111_v41 = vadd.f32 %v5707_v29, %v6380_v27  ;;  %2722 = vmatmul.mubr.bf16.gmra.mrb[68].mxu1 %v6503_v3 }
 0x1d8   : > { %v2153_v0 = vmax.f32 %v2113_v18, 0.0  ;;  %2729 = vmatprep.mubr.bf16.mxu1 %v6537_v63  ;;  %2943 = vmatpush1.bf16.msra.mxu1 %v5926_v20  ;;  %v2270_v5 = vrot.slane %v2152_v24, 1 }
 0x1d9   : > { %v2266_v39 = vrot.slane %v2150_v21, 1  ;;  %v2151_v47 = vmax.f32 %v2111_v41, 0.0  ;;  %2944 = vmatprep.subr.bf16.mxu1 %v5973_v1 }
 0x1da   : > { %v2272_v52 = vrot.slane %v2153_v0, 1  ;;  %v2335_v42 = vpack.c.bf16 %v2153_v0, %v2152_v24 }
 0x1db   : > { %v2268_v9 = vrot.slane %v2151_v47, 1  ;;  %v2267_v27 = vsel %vm2194_vm1, %v2264_v35, %v2266_v39  ;;  %v6649_v32 = vpack.c.bf16 %v2151_v47, %v2150_v21 }
 0x1dc   : > { %v6651_v16 = vpack.c.bf16 %v2267_v27, %v2265_v22  ;;  %v2273_v48 = vsel %vm2194_vm1, %v2270_v5, %v2272_v52  ;;  %v2315_v13 = vsel %vm2194_vm1, %v2272_v52, %v6388_v49  ;;  %2945 = vmatpush1.bf16.msra.mxu1 %v5927_v25 }
 0x1dd   : > { %v2269_v36 = vsel %vm2194_vm1, %v2266_v39, %v2268_v9  ;;  %v2271_v20 = vsel %vm2194_vm1, %v2268_v9, %v2270_v5  ;;  %v2355_v23 = vpack.c.bf16 %v2315_v13, %v2273_v48  ;;  %4131 = vmatprep.subr.bf16.mxu1 %v5973_v1 }
 0x1de   : > { %v6659_v29 = vpack.c.bf16 %v2271_v20, %v2269_v36 }
 0x1df   : > { %2730 = vmatmul.mubr.bf16.gmra.mrb[72].mxu1 %v6499_v61 }
 0x1e0   : > { %2737 = vmatprep.mubr.bf16.mxu1 %v6549_v30 }
 0x1e7   : > { %2738 = vmatmul.mubr.bf16.gmra.mrb[76].mxu1 %v6533_v7 }
 0x1e8   : > { %2745 = vmatprep.mubr.bf16.mxu1 %v6567_v6 }
 0x1ef   : > { %2746 = vmatmul.mubr.bf16.gmra.mrb[80].mxu1 %v6529_v2 }
 0x1f0   : > { %2753 = vmatprep.mubr.bf16.mxu1 %v6579_v45 }
 0x1f7   : > { %2754 = vmatmul.mubr.bf16.gmra.mrb[84].mxu1 %v6563_v11 }
 0x1f8   : > { %2761 = vmatprep.mubr.bf16.mxu1 %v6597_v10 }
 0x1ff   : > { %2762 = vmatmul.mubr.bf16.gmra.mrb[88].mxu1 %v6559_v4 }
 0x200   : > { %2769 = vmatprep.mubr.bf16.mxu1 %v6609_v38 }
 0x207   : > { %2770 = vmatmul.mubr.bf16.gmra.mrb[92].mxu1 %v6593_v15 }
 0x208   : > { %2777 = vmatprep.mubr.bf16.mxu1 %v6627_v14 }
 0x20f   : > { %2778 = vmatmul.mubr.bf16.gmra.mrb[96].mxu1 %v6589_v8 }
 0x210   : > { %2785 = vmatprep.mubr.bf16.mxu1 %v6639_v60 }
 0x217   : > { %2786 = vmatmul.mubr.bf16.gmra.mrb[100].mxu1 %v6623_v19 }
 0x218   : > { %2793 = vmatprep.mubr.bf16.mxu1 %v6651_v16 }
 0x21f   : > { %2794 = vmatmul.mubr.bf16.gmra.mrb[104].mxu1 %v6619_v12 }
 0x220   : > { %2801 = vmatprep.mubr.bf16.mxu1 %v6659_v29 }
 0x227   : > { %2802 = vmatmul.mubr.bf16.gmra.mrb[108].mxu1 %v6649_v32 }
 0x228   : > { %2809 = vmatprep.mubr.bf16.mxu1 %v2355_v23  ;;  %v5929_v23 = vld [vmem:[%s7855_s5 + $0x68] sm:$0xff]  }
 0x22f   : > { %2810 = vmatmul.mubr.bf16.gmra.mrb[112].mxu1 %v2335_v42 }
 0x230   : > { %2946 = vmatprep.mubr.bf16.mxu1 %v2336_v55 }
 0x237   : > { %2947 = vmatmul.mubr.bf16.vlgmr.msra.gmra.mrb[116].mxu1 %v6390_v51 }
 0x238   : > { %2954 = vmatprep.mubr.bf16.mxu1 %v6417_v33 }
 0x23f   : > { %2955 = vmatmul.mubr.bf16.gmra.mrb[120].mxu1 %v6386_v46 }
 0x240   : > { %2962 = vmatprep.mubr.bf16.mxu1 %v6429_v31 }
 0x247   : > { %2963 = vmatmul.mubr.bf16.gmra.mrb[124].mxu1 %v6413_v28 }
 0x248   : > { %2970 = vmatprep.mubr.bf16.mxu1 %v6447_v59 }
 0x24f   : > { %2971 = vmatmul.mubr.bf16.gmra.mrb[128].mxu1 %v6409_v44 }
 0x250   : > { %2978 = vmatprep.mubr.bf16.mxu1 %v6459_v56 }
 0x257   : > { %2979 = vmatmul.mubr.bf16.gmra.mrb[132].mxu1 %v6443_v58 }
 0x258   : > { %2986 = vmatprep.mubr.bf16.mxu1 %v6477_v54 }
 0x25f   : > { %2987 = vmatmul.mubr.bf16.gmra.mrb[136].mxu1 %v6439_v26 }
 0x260   : > { %2994 = vmatprep.mubr.bf16.mxu1 %v6489_v43 }
 0x267   : > { %2995 = vmatmul.mubr.bf16.gmra.mrb[140].mxu1 %v6473_v62 }
 0x268   : > { %3002 = vmatprep.mubr.bf16.mxu1 %v6507_v37 }
 0x26f   : > { %3003 = vmatmul.mubr.bf16.gmra.mrb[144].mxu1 %v6469_v57 }
 0x270   : > { %3010 = vmatprep.mubr.bf16.mxu1 %v6519_v50 }
 0x272   : > { %v6699_v46 = vpop.f32.mrb[40].mxu1 }
 0x273   : > { %v2669_v49 = vpop.f32.mrb[41].mxu1 }
 0x274   : > { %v6701_v51 = vpop.f32.mrb[42].mxu1 }
 0x275   : > { %v2672_v53 = vpop.f32.mrb[43].mxu1 }
 0x277   : > { %3011 = vmatmul.mubr.bf16.gmra.mrb[148].mxu1 %v6503_v3 }
 0x278   : > { %3018 = vmatprep.mubr.bf16.mxu1 %v6537_v63 }
 0x27a   : > { %v6705_v34 = vpop.f32.mrb[44].mxu1 }
 0x27b   : > { %v2677_v55 = vpop.f32.mrb[45].mxu1 }
 0x27c   : > { %v6707_v44 = vpop.f32.mrb[46].mxu1 }
 0x27d   : > { %v2680_v28 = vpop.f32.mrb[47].mxu1 }
 0x27f   : > { %3019 = vmatmul.mubr.bf16.gmra.mrb[152].mxu1 %v6499_v61 }
 0x280   : > { %3026 = vmatprep.mubr.bf16.mxu1 %v6549_v30 }
 0x282   : > { %v6711_v33 = vpop.f32.mrb[48].mxu1 }
 0x283   : > { %v2685_v31 = vpop.f32.mrb[49].mxu1 }
 0x284   : > { %v6713_v26 = vpop.f32.mrb[50].mxu1  ;;  %v5931_v31 = vld [vmem:[%s7855_s5 + $0x78] sm:$0xff]  }
 0x285   : > { %v2688_v58 = vpop.f32.mrb[51].mxu1 }
 0x287   : > { %3027 = vmatmul.mubr.bf16.gmra.mrb[156].mxu1 %v6533_v7 }
 0x288   : > { %3034 = vmatprep.mubr.bf16.mxu1 %v6567_v6 }
 0x28a   : > { %v6717_v59 = vpop.f32.mrb[52].mxu1 }
 0x28b   : > { %v2693_v56 = vpop.f32.mrb[53].mxu1 }
 0x28c   : > { %v6719_v57 = vpop.f32.mrb[54].mxu1 }
 0x28d   : > { %v2696_v62 = vpop.f32.mrb[55].mxu1 }
 0x28f   : > { %3035 = vmatmul.mubr.bf16.gmra.mrb[160].mxu1 %v6529_v2 }
 0x290   : > { %3042 = vmatprep.mubr.bf16.mxu1 %v6579_v45 }
 0x292   : > { %v6723_v54 = vpop.f32.mrb[56].mxu1 }
 0x293   : > { %v2701_v43 = vpop.f32.mrb[57].mxu1 }
 0x294   : > { %v6725_v61 = vpop.f32.mrb[58].mxu1 }
 0x295   : > { %v2704_v3 = vpop.f32.mrb[59].mxu1 }
 0x296   : > { %v5932_v3 = vld [vmem:[%s7855_s5 + $0x80] sm:$0xff]  }
 0x297   : > { %3043 = vmatmul.mubr.bf16.gmra.mrb[164].mxu1 %v6563_v11 }
 0x298   : > { %3050 = vmatprep.mubr.bf16.mxu1 %v6597_v10 }
 0x29a   : > { %v6729_v37 = vpop.f32.mrb[60].mxu1 }
 0x29b   : > { %v2709_v50 = vpop.f32.mrb[61].mxu1 }
 0x29c   : > { %v6731_v7 = vpop.f32.mrb[62].mxu1 }
 0x29d   : > { %v2712_v63 = vpop.f32.mrb[63].mxu1 }
 0x29f   : > { %3051 = vmatmul.mubr.bf16.gmra.mrb[168].mxu1 %v6559_v4 }
 0x2a0   : > { %3058 = vmatprep.mubr.bf16.mxu1 %v6609_v38 }
 0x2a2   : > { %v6735_v2 = vpop.f32.mrb[64].mxu1 }
 0x2a3   : > { %v2717_v30 = vpop.f32.mrb[65].mxu1 }
 0x2a4   : > { %v6737_v6 = vpop.f32.mrb[66].mxu1 }
 0x2a5   : > { %v2720_v45 = vpop.f32.mrb[67].mxu1 }
 0x2a7   : > { %3059 = vmatmul.mubr.bf16.gmra.mrb[172].mxu1 %v6593_v15 }
 0x2a8   : > { %3066 = vmatprep.mubr.bf16.mxu1 %v6627_v14 }
 0x2aa   : > { %v6741_v11 = vpop.f32.mrb[68].mxu1 }
 0x2ab   : > { %v2725_v10 = vpop.f32.mrb[69].mxu1 }
 0x2ac   : > { %v6743_v35 = vpop.f32.mrb[70].mxu1  ;;  %v5933_v10 = vld [vmem:[%s7855_s5 + $0x88] sm:$0xff]  }
 0x2ad   : > { %v2728_v22 = vpop.f32.mrb[71].mxu1 }
 0x2af   : > { %3067 = vmatmul.mubr.bf16.gmra.mrb[176].mxu1 %v6589_v8 }
 0x2b0   : > { %3074 = vmatprep.mubr.bf16.mxu1 %v6639_v60 }
 0x2b2   : > { %v6747_v4 = vpop.f32.mrb[72].mxu1 }
 0x2b3   : > { %v2733_v38 = vpop.f32.mrb[73].mxu1 }
 0x2b4   : > { %v6749_v17 = vpop.f32.mrb[74].mxu1  ;;  %v5934_v38 = vld [vmem:[%s7855_s5 + $0x90] sm:$0xff]  }
 0x2b5   : > { %v2736_v40 = vpop.f32.mrb[75].mxu1 }
 0x2b7   : > { %3075 = vmatmul.mubr.bf16.gmra.mrb[180].mxu1 %v6623_v19 }
 0x2b8   : > { %3082 = vmatprep.mubr.bf16.mxu1 %v6651_v16 }
 0x2ba   : > { %v6753_v15 = vpop.f32.mrb[76].mxu1 }
 0x2bb   : > { %v2741_v14 = vpop.f32.mrb[77].mxu1 }
 0x2bc   : > { %v6755_v24 = vpop.f32.mrb[78].mxu1 }
 0x2bd   : > { %v2744_v18 = vpop.f32.mrb[79].mxu1 }
 0x2bf   : > { %3083 = vmatmul.mubr.bf16.gmra.mrb[184].mxu1 %v6619_v12 }
 0x2c0   : > { %3090 = vmatprep.mubr.bf16.mxu1 %v6659_v29  ;;  %v5930_v29 = vld [vmem:[%s7855_s5 + $0x70] sm:$0xff]  }
 0x2c2   : > { %v6759_v8 = vpop.f32.mrb[80].mxu1 }
 0x2c3   : > { %v2749_v60 = vpop.f32.mrb[81].mxu1 }
 0x2c4   : > { %v6761_v21 = vpop.f32.mrb[82].mxu1  ;;  %v5935_v60 = vld [vmem:[%s7855_s5 + $0x98] sm:$0xff]  }
 0x2c5   : > { %v2752_v41 = vpop.f32.mrb[83].mxu1 }
 0x2c7   : > { %3091 = vmatmul.mubr.bf16.gmra.mrb[188].mxu1 %v6649_v32  ;;  %v5928_v32 = vld [vmem:[%s7855_s5 + $0x60] sm:$0xff]  }
 0x2c8   : > { %3888 = vmatpush1.bf16.msra.mxu0 %v5928_v32 }
 0x2c9   : > { %3889 = vmatprep.subr.bf16.mxu0 %v5973_v1 }
 0x2ca   : > { %v6764_v19 = vpop.f32.mrb[84].mxu1 }
 0x2cb   : > { %v2757_v0 = vpop.f32.mrb[85].mxu1 }
 0x2cc   : > { %v6766_v25 = vpop.f32.mrb[86].mxu1  ;;  %3890 = vmatpush1.bf16.msra.mxu0 %v5929_v23  ;;  %v6831_v0 = vld [vmem:[%s7854_s4] ss:$0 sm:$0xff] }
 0x2cd   : > { %v2760_v39 = vpop.f32.mrb[87].mxu1  ;;  %3891 = vmatprep.subr.bf16.mxu0 %v5973_v1 }
 0x2ce   : > { %v5936_v39 = vld [vmem:[%s7855_s5 + $0xa0] sm:$0xff]  }
 0x2d0   : > { %3892 = vmatpush1.bf16.msra.mxu0 %v5930_v29 }
 0x2d1   : > { %3893 = vmatprep.subr.bf16.mxu0 %v5973_v1 }
 0x2d2   : > { %v6768_v47 = vpop.f32.mrb[88].mxu1 }
 0x2d3   : > { %v2765_v5 = vpop.f32.mrb[89].mxu1 }
 0x2d4   : > { %v6770_v12 = vpop.f32.mrb[90].mxu1  ;;  %3894 = vmatpush1.bf16.msra.mxu0 %v5931_v31 }
 0x2d5   : > { %v2768_v52 = vpop.f32.mrb[91].mxu1  ;;  %3895 = vmatprep.subr.bf16.mxu0 %v5973_v1 }
 0x2d8   : > { %3896 = vmatpush1.bf16.msra.mxu0 %v5932_v3 }
 0x2d9   : > { %3897 = vmatprep.subr.bf16.mxu0 %v5973_v1 }
 0x2da   : > { %v6772_v42 = vpop.f32.mrb[92].mxu1 }
 0x2db   : > { %v2773_v9 = vpop.f32.mrb[93].mxu1 }
 0x2dc   : > { %v6774_v27 = vpop.f32.mrb[94].mxu1  ;;  %3898 = vmatpush1.bf16.msra.mxu0 %v5933_v10 }
 0x2dd   : > { %v2776_v16 = vpop.f32.mrb[95].mxu1  ;;  %3899 = vmatprep.subr.bf16.mxu0 %v5973_v1 }
 0x2e0   : > { %3900 = vmatpush1.bf16.msra.mxu0 %v5934_v38 }
 0x2e1   : > { %3901 = vmatprep.subr.bf16.mxu0 %v5973_v1 }
 0x2e2   : > { %v6780_v48 = vpop.f32.mrb[96].mxu1 }
 0x2e3   : > { %v2781_v13 = vpop.f32.mrb[97].mxu1 }
 0x2e4   : > { %v6782_v36 = vpop.f32.mrb[98].mxu1  ;;  %3902 = vmatpush1.bf16.msra.mxu0 %v5935_v60  ;;  %v5940_v60 = vld [vmem:[%s7855_s5 + $0xb8] sm:$0xff]  }
 0x2e5   : > { %v2784_v20 = vpop.f32.mrb[99].mxu1  ;;  %3903 = vmatprep.subr.bf16.mxu0 %v5973_v1 }
 0x2e6   : > { %v5937_v20 = vld [vmem:[%s7855_s5 + $0xa8] sm:$0xff]  }
 0x2e8   : > { %3904 = vmatpush1.bf16.msra.mxu0 %v5936_v39 }
 0x2e9   : > { %3905 = vmatprep.subr.bf16.mxu0 %v5973_v1 }
 0x2ea   : > { %v6791_v49 = vpop.f32.mrb[100].mxu1 }
 0x2eb   : > { %v2789_v53 = vpop.f32.mrb[101].mxu1 }
 0x2ec   : > { %v6793_v55 = vpop.f32.mrb[102].mxu1  ;;  %3906 = vmatpush1.bf16.msra.mxu0 %v5937_v20 }
 0x2ed   : > { %v2792_v28 = vpop.f32.mrb[103].mxu1  ;;  %3907 = vmatprep.subr.bf16.mxu0 %v5973_v1 }
 0x2f2   : > { %v6800_v58 = vpop.f32.mrb[104].mxu1 }
 0x2f3   : > { %v2797_v56 = vpop.f32.mrb[105].mxu1 }
 0x2f4   : > { %v6802_v62 = vpop.f32.mrb[106].mxu1 }
 0x2f5   : > { %v2800_v43 = vpop.f32.mrb[107].mxu1 }
 0x2fa   : > { %v6808_v50 = vpop.f32.mrb[108].mxu1 }
 0x2fb   : > { %v2805_v63 = vpop.f32.mrb[109].mxu1 }
 0x2fc   : > { %v6810_v30 = vpop.f32.mrb[110].mxu1 }
 0x2fd   : > { %v2808_v45 = vpop.f32.mrb[111].mxu1 }
 0x302   : > { %v6816_v22 = vpop.f32.mrb[112].mxu1 }
 0x303   : > { %v2813_v40 = vpop.f32.mrb[113].mxu1 }
 0x304   : > { %v6821_v14 = vpop.f32.mrb[114].mxu1 }
 0x305   : > { %v2816_v18 = vpop.f32.mrb[115].mxu1 }
 0x306   : > { %v5938_v18 = vld [vmem:[%s7855_s5] sm:$0xff]  }
 0x307   : > { %4132 = vmatpush1.bf16.msra.mxu1 %v5938_v18 }
 0x308   : > { %4133 = vmatprep.subr.bf16.mxu1 %v5973_v1 }
 0x30a   : > { %v2948_v41 = vpop.f32.mrb[116].mxu1 }
 0x30b   : > { %v2949_v5 = vadd.f32 %v2948_v41, %v6699_v46  ;;  %v2950_v52 = vpop.f32.mrb[117].mxu1 }
 0x30c   : > { %v2951_v9 = vpop.f32.mrb[118].mxu1 }
 0x30d   : > { %v3106_v16 = vadd.f32 %v6831_v0, %v2949_v5  ;;  %v2952_v32 = vadd.f32 %v2951_v9, %v6701_v51  ;;  %v2953_v13 = vpop.f32.mrb[119].mxu1  ;;  %v5939_v51 = vld [vmem:[%s7855_s5 + $0xb0] sm:$0xff]  }
 0x30e   : > { %3908 = vmatpush1.bf16.msra.mxu0 %v5939_v51 }
 0x30f   : > { %v6843_v23 = vmax.f32 %v3106_v16, 0.0  ;;  %v3107_v29 = vadd.f32 %v6831_v0, %v2952_v32  ;;  %3909 = vmatprep.subr.bf16.mxu0 %v5973_v1 }
 0x311   : > { %v6846_v46 = vmax.f32 %v3107_v29, 0.0  ;;  %v7858_v28 = vrot.slane %v6843_v23, 1  ;;  %v7859_v39 = vrot.slane %v6843_v23, 2 }
 0x312   : > { %v2956_v53 = vpop.f32.mrb[120].mxu1  ;;  %3910 = vmatpush1.bf16.msra.mxu0 %v5940_v60 }
 0x313   : > { %v3221_v31 = vrot.slane %v6846_v46, 1  ;;  %v2957_v56 = vadd.f32 %v2956_v53, %v6705_v34  ;;  %v2958_v43 = vpop.f32.mrb[121].mxu1  ;;  %v3337_v34 = vrot.slane %v6846_v46, 2  ;;  %4482 = vmatprep.subr.bf16.mxu0 %v5973_v1 }
 0x314   : > { %v2959_v63 = vpop.f32.mrb[122].mxu1 }
 0x315   : > { %v3108_v45 = vadd.f32 %v6831_v0, %v2957_v56  ;;  %v2960_v10 = vadd.f32 %v2959_v63, %v6707_v44  ;;  %v2961_v38 = vpop.f32.mrb[123].mxu1  ;;  %v6863_v40 = vsel %vm2194_vm1, %v7858_v28, %v3221_v31  ;;  %v3338_v16 = vsel %vm3335_vm2, %v7859_v39, %v3337_v34 }
 0x317   : > { %v6872_v44 = vmax.f32 %v3108_v45, 0.0  ;;  %v3109_v41 = vadd.f32 %v6831_v0, %v2960_v10 }
 0x319   : > { %v3339_v5 = vrot.slane %v6872_v44, 2  ;;  %v6877_v52 = vmax.f32 %v3109_v41, 0.0  ;;  %v3223_v9 = vrot.slane %v6872_v44, 1 }
 0x31a   : > { %v2964_v32 = vpop.f32.mrb[124].mxu1 }
 0x31b   : > { %v3340_v13 = vsel %vm3335_vm2, %v3337_v34, %v3339_v5  ;;  %v3341_v20 = vrot.slane %v6877_v52, 2  ;;  %v2965_v29 = vadd.f32 %v2964_v32, %v6711_v33  ;;  %v2966_v53 = vpop.f32.mrb[125].mxu1  ;;  %v3225_v51 = vrot.slane %v6877_v52, 1 }
 0x31c   : > { %v3489_v56 = vpack.c.bf16 %v3340_v13, %v3338_v16  ;;  %v2967_v43 = vpop.f32.mrb[126].mxu1  ;;  %v3452_v63 = vpack.c.bf16 %v6877_v52, %v6872_v44  ;;  %v6892_v45 = vsel %vm2194_vm1, %v3221_v31, %v3223_v9  ;;  %v5944_v52 = vld [vmem:[%s7855_s5 + $0xc8] sm:$0xff]  }
 0x31d   : > { %v3342_v10 = vsel %vm3335_vm2, %v3339_v5, %v3341_v20  ;;  %v3110_v38 = vadd.f32 %v6831_v0, %v2965_v29  ;;  %v2968_v34 = vadd.f32 %v2967_v43, %v6713_v26  ;;  %v2969_v18 = vpop.f32.mrb[127].mxu1  ;;  %v3226_v33 = vsel %vm2194_vm1, %v3223_v9, %v3225_v51 }
 0x31e   : > { %3642 = vst.msk [vmem:[#allocation3 + $0x8] sm:$0xff] %vm502_vm0, %v3489_v56 }
 0x31f   : > { %v6901_v41 = vmax.f32 %v3110_v38, 0.0  ;;  %v3111_v16 = vadd.f32 %v6831_v0, %v2968_v34 }
 0x321   : > { %v3343_v31 = vrot.slane %v6901_v41, 2  ;;  %v6905_v32 = vmax.f32 %v3111_v16, 0.0  ;;  %v3227_v5 = vrot.slane %v6901_v41, 1 }
 0x322   : > { %v2972_v13 = vpop.f32.mrb[128].mxu1 }
 0x323   : > { %v3344_v26 = vsel %vm3335_vm2, %v3341_v20, %v3343_v31  ;;  %v3229_v9 = vrot.slane %v6905_v32, 1  ;;  %v3345_v29 = vrot.slane %v6905_v32, 2  ;;  %v2973_v53 = vadd.f32 %v2972_v13, %v6717_v59  ;;  %v2974_v56 = vpop.f32.mrb[129].mxu1 }
 0x324   : > { %v3490_v43 = vpack.c.bf16 %v3344_v26, %v3342_v10  ;;  %v2975_v38 = vpop.f32.mrb[130].mxu1  ;;  %v3228_v34 = vsel %vm2194_vm1, %v3225_v51, %v3227_v5  ;;  %v3453_v18 = vpack.c.bf16 %v6905_v32, %v6901_v41 }
 0x325   : > { %v3346_v16 = vsel %vm3335_vm2, %v3343_v31, %v3345_v29  ;;  %v3112_v3 = vadd.f32 %v6831_v0, %v2973_v53  ;;  %v2976_v20 = vadd.f32 %v2975_v38, %v6719_v57  ;;  %v2977_v28 = vpop.f32.mrb[131].mxu1  ;;  %v3471_v39 = vpack.c.bf16 %v3228_v34, %v3226_v33  ;;  %v3680_v60 = vld [vmem:[#allocation3 + $0x8] sm:$0xff]  ;;  %v5943_v53 = vld [vmem:[%s7855_s5 + $0x10] sm:$0xff]  }
 0x326   : > { %3644 = vst.msk [vmem:[#allocation3 + $0x18] sm:$0xff] %vm502_vm0, %v3490_v43  ;;  %5307 = vmatprep.mubr.msk.bf16.mxu1 %vm502_vm0, %v3680_v60  ;;  %v3230_v59 = vsel %vm2194_vm1, %v3227_v5, %v3229_v9  ;;  %v5941_v57 = vld [vmem:[%s7855_s5 + $0x8] sm:$0xff]  }
 0x327   : > { %v6921_v10 = vmax.f32 %v3112_v3, 0.0  ;;  %v3113_v51 = vadd.f32 %v6831_v0, %v2976_v20  ;;  %3529 = vrot.lane.b32.xlu0 %v3471_v39, %s5974_s8  ;;  %4134 = vmatpush1.bf16.msra.mxu1 %v5941_v57 }
 0x328   : > { %4135 = vmatprep.subr.bf16.mxu1 %v5973_v1 }
 0x329   : > { %v3231_v28 = vrot.slane %v6921_v10, 1  ;;  %v3347_v33 = vrot.slane %v6921_v10, 2  ;;  %v6930_v31 = vmax.f32 %v3113_v51, 0.0 }
 0x32a   : > { %v2980_v60 = vpop.f32.mrb[132].mxu1 }
 0x32b   : > { %v3348_v3 = vsel %vm3335_vm2, %v3345_v29, %v3347_v33  ;;  %v3349_v5 = vrot.slane %v6930_v31, 2  ;;  %v2981_v13 = vadd.f32 %v2980_v60, %v6723_v54  ;;  %v2982_v26 = vpop.f32.mrb[133].mxu1  ;;  %v3232_v39 = vsel %vm2194_vm1, %v3229_v9, %v3231_v28  ;;  %4136 = vmatpush1.bf16.msra.mxu1 %v5943_v53  ;;  %v5945_v53 = vld [vmem:[%s7855_s5 + $0x18] sm:$0xff]  }
 0x32c   : > { %v3491_v56 = vpack.c.bf16 %v3348_v3, %v3346_v16  ;;  %v2983_v43 = vpop.f32.mrb[134].mxu1  ;;  %v3472_v38 = vpack.c.bf16 %v3232_v39, %v3230_v59  ;;  %v3233_v34 = vrot.slane %v6930_v31, 1  ;;  %4137 = vmatprep.subr.bf16.mxu1 %v5973_v1 }
 0x32d   : > { %v3350_v20 = vsel %vm3335_vm2, %v3347_v33, %v3349_v5  ;;  %v3114_v54 = vadd.f32 %v6831_v0, %v2981_v13  ;;  %v2984_v9 = vadd.f32 %v2983_v43, %v6725_v61  ;;  %v2985_v51 = vpop.f32.mrb[135].mxu1  ;;  %v3682_v57 = vld [vmem:[#allocation3 + $0x18] sm:$0xff] }
 0x32e   : > { %3646 = vst.msk [vmem:[#allocation3 + $0x28] sm:$0xff] %vm502_vm0, %v3491_v56  ;;  %5278 = vmatprep.mubr.msk.bf16.mxu0 %vm502_vm0, %v3682_v57  ;;  %3531 = vrot.lane.b32.xlu0 %v3472_v38, %s5974_s8  ;;  %v3234_v16 = vsel %vm2194_vm1, %v3231_v28, %v3233_v34 }
 0x32f   : > { %v6950_v59 = vmax.f32 %v3114_v54, 0.0  ;;  %v3115_v60 = vadd.f32 %v6831_v0, %v2984_v9  ;;  %4138 = vmatpush1.bf16.msra.mxu1 %v5945_v53 }
 0x330   : > { %4139 = vmatprep.subr.bf16.mxu1 %v5973_v1 }
 0x331   : > { %v3351_v33 = vrot.slane %v6950_v59, 2  ;;  %v6955_v61 = vmax.f32 %v3115_v60, 0.0  ;;  %v3235_v3 = vrot.slane %v6950_v59, 1 }
 0x332   : > { %v2988_v13 = vpop.f32.mrb[136].mxu1 }
 0x333   : > { %v3352_v26 = vsel %vm3335_vm2, %v3349_v5, %v3351_v33  ;;  %v3237_v39 = vrot.slane %v6955_v61, 1  ;;  %v3353_v28 = vrot.slane %v6955_v61, 2  ;;  %v2989_v56 = vadd.f32 %v2988_v13, %v6729_v37  ;;  %v2990_v43 = vpop.f32.mrb[137].mxu1 }
 0x334   : > { %v3492_v38 = vpack.c.bf16 %v3352_v26, %v3350_v20  ;;  %v2991_v54 = vpop.f32.mrb[138].mxu1  ;;  %v3236_v9 = vsel %vm2194_vm1, %v3233_v34, %v3235_v3 }
 0x335   : > { %v3354_v5 = vsel %vm3335_vm2, %v3351_v33, %v3353_v28  ;;  %v3116_v57 = vadd.f32 %v6831_v0, %v2989_v56  ;;  %v2992_v60 = vadd.f32 %v2991_v54, %v6731_v7  ;;  %v2993_v29 = vpop.f32.mrb[139].mxu1  ;;  %v3473_v37 = vpack.c.bf16 %v3236_v9, %v3234_v16 }
 0x336   : > { %3648 = vst.msk [vmem:[#allocation3 + $0x38] sm:$0xff] %vm502_vm0, %v3492_v38  ;;  %v3238_v13 = vsel %vm2194_vm1, %v3235_v3, %v3237_v39 }
 0x337   : > { %v6974_v20 = vmax.f32 %v3116_v57, 0.0  ;;  %v3117_v34 = vadd.f32 %v6831_v0, %v2992_v60  ;;  %3533 = vrot.lane.b32.xlu1 %v3473_v37, %s5974_s8 }
 0x339   : > { %v3239_v33 = vrot.slane %v6974_v20, 1  ;;  %v3355_v26 = vrot.slane %v6974_v20, 2  ;;  %v6980_v7 = vmax.f32 %v3117_v34, 0.0 }
 0x33a   : > { %v2996_v29 = vpop.f32.mrb[140].mxu1 }
 0x33b   : > { %v3356_v16 = vsel %vm3335_vm2, %v3353_v28, %v3355_v26  ;;  %v3241_v56 = vrot.slane %v6980_v7, 1  ;;  %v3357_v3 = vrot.slane %v6980_v7, 2  ;;  %v2997_v43 = vadd.f32 %v2996_v29, %v6735_v2  ;;  %v2998_v53 = vpop.f32.mrb[141].mxu1 }
 0x33c   : > { %v3493_v38 = vpack.c.bf16 %v3356_v16, %v3354_v5  ;;  %v2999_v54 = vpop.f32.mrb[142].mxu1  ;;  %v3240_v9 = vsel %vm2194_vm1, %v3237_v39, %v3239_v33 }
 0x33d   : > { %v3358_v60 = vsel %vm3335_vm2, %v3355_v26, %v3357_v3  ;;  %v3118_v37 = vadd.f32 %v6831_v0, %v2997_v43  ;;  %v3000_v28 = vadd.f32 %v2999_v54, %v6737_v6  ;;  %v3001_v34 = vpop.f32.mrb[143].mxu1  ;;  %v3474_v51 = vpack.c.bf16 %v3240_v9, %v3238_v13  ;;  %v7310_v41 = vld [vmem:[#allocation3 + $0x38] sm:$0xff] }
 0x33e   : > { %3650 = vst.msk [vmem:[#allocation3 + $0x48] sm:$0xff] %vm502_vm0, %v3493_v38  ;;  %v3242_v2 = vsel %vm2194_vm1, %v3239_v33, %v3241_v56 }
 0x33f   : > { %v6994_v29 = vmax.f32 %v3118_v37, 0.0  ;;  %v3119_v5 = vadd.f32 %v6831_v0, %v3000_v28  ;;  %3535 = vrot.lane.b32.xlu1 %v3474_v51, %s5974_s8  ;;  %v5947_v51 = vld [vmem:[%s7855_s5 + $0x20] sm:$0xff]  }
 0x340   : > { %4140 = vmatpush1.bf16.msra.mxu1 %v5947_v51 }
 0x341   : > { %v3243_v39 = vrot.slane %v6994_v29, 1  ;;  %v3359_v26 = vrot.slane %v6994_v29, 2  ;;  %v7000_v16 = vmax.f32 %v3119_v5, 0.0  ;;  %4141 = vmatprep.subr.bf16.mxu1 %v5973_v1 }
 0x342   : > { %v3004_v43 = vpop.f32.mrb[144].mxu1 }
 0x343   : > { %v3360_v6 = vsel %vm3335_vm2, %v3357_v3, %v3359_v26  ;;  %v3245_v13 = vrot.slane %v7000_v16, 1  ;;  %v3361_v53 = vrot.slane %v7000_v16, 2  ;;  %v3005_v33 = vadd.f32 %v3004_v43, %v6741_v11  ;;  %v3006_v38 = vpop.f32.mrb[145].mxu1 }
 0x344   : > { %v3494_v54 = vpack.c.bf16 %v3360_v6, %v3358_v60  ;;  %v3007_v9 = vpop.f32.mrb[146].mxu1  ;;  %v3244_v37 = vsel %vm2194_vm1, %v3241_v56, %v3243_v39 }
 0x345   : > { %v3362_v3 = vsel %vm3335_vm2, %v3359_v26, %v3361_v53  ;;  %v3120_v34 = vadd.f32 %v6831_v0, %v3005_v33  ;;  %v3008_v5 = vadd.f32 %v3007_v9, %v6743_v35  ;;  %v3009_v57 = vpop.f32.mrb[147].mxu1  ;;  %v3475_v11 = vpack.c.bf16 %v3244_v37, %v3242_v2 }
 0x346   : > { %3652 = vst.msk [vmem:[#allocation3 + $0x58] sm:$0xff] %vm502_vm0, %v3494_v54  ;;  %v3246_v43 = vsel %vm2194_vm1, %v3243_v39, %v3245_v13 }
 0x347   : > { %v7018_v60 = vmax.f32 %v3120_v34, 0.0  ;;  %v3121_v56 = vadd.f32 %v6831_v0, %v3008_v5  ;;  %3537 = vrot.lane.b32.xlu0 %v3475_v11, %s5974_s8 }
 0x349   : > { %v3247_v26 = vrot.slane %v7018_v60, 1  ;;  %v3363_v6 = vrot.slane %v7018_v60, 2  ;;  %v7024_v35 = vmax.f32 %v3121_v56, 0.0 }
 0x34a   : > { %v3012_v57 = vpop.f32.mrb[148].mxu1 }
 0x34b   : > { %v3364_v2 = vsel %vm3335_vm2, %v3361_v53, %v3363_v6  ;;  %v3249_v33 = vrot.slane %v7024_v35, 1  ;;  %v3365_v39 = vrot.slane %v7024_v35, 2  ;;  %v3013_v38 = vadd.f32 %v3012_v57, %v6747_v4  ;;  %v3014_v51 = vpop.f32.mrb[149].mxu1 }
 0x34c   : > { %v3495_v54 = vpack.c.bf16 %v3364_v2, %v3362_v3  ;;  %v3015_v9 = vpop.f32.mrb[150].mxu1  ;;  %v3248_v37 = vsel %vm2194_vm1, %v3245_v13, %v3247_v26 }
 0x34d   : > { %v3366_v5 = vsel %vm3335_vm2, %v3363_v6, %v3365_v39  ;;  %v3122_v11 = vadd.f32 %v6831_v0, %v3013_v38  ;;  %v3016_v53 = vadd.f32 %v3015_v9, %v6749_v17  ;;  %v3017_v56 = vpop.f32.mrb[151].mxu1  ;;  %v3476_v28 = vpack.c.bf16 %v3248_v37, %v3246_v43 }
 0x34e   : > { %3654 = vst.msk [vmem:[#allocation3 + $0x68] sm:$0xff] %vm502_vm0, %v3495_v54  ;;  %v3250_v4 = vsel %vm2194_vm1, %v3247_v26, %v3249_v33 }
 0x34f   : > { %v7038_v57 = vmax.f32 %v3122_v11, 0.0  ;;  %v3123_v3 = vadd.f32 %v6831_v0, %v3016_v53  ;;  %3539 = vrot.lane.b32.xlu1 %v3476_v28, %s5974_s8  ;;  %v5949_v28 = vld [vmem:[%s7855_s5 + $0x28] sm:$0xff]  }
 0x350   : > { %4142 = vmatpush1.bf16.msra.mxu1 %v5949_v28 }
 0x351   : > { %v3251_v13 = vrot.slane %v7038_v57, 1  ;;  %v3367_v6 = vrot.slane %v7038_v57, 2  ;;  %v7044_v2 = vmax.f32 %v3123_v3, 0.0  ;;  %4143 = vmatprep.subr.bf16.mxu1 %v5973_v1 }
 0x352   : > { %v3020_v38 = vpop.f32.mrb[152].mxu1 }
 0x353   : > { %v3368_v17 = vsel %vm3335_vm2, %v3365_v39, %v3367_v6  ;;  %v3253_v43 = vrot.slane %v7044_v2, 1  ;;  %v3369_v51 = vrot.slane %v7044_v2, 2  ;;  %v3021_v26 = vadd.f32 %v3020_v38, %v6753_v15  ;;  %v3022_v54 = vpop.f32.mrb[153].mxu1 }
 0x354   : > { %v3496_v9 = vpack.c.bf16 %v3368_v17, %v3366_v5  ;;  %v3023_v37 = vpop.f32.mrb[154].mxu1  ;;  %v3252_v11 = vsel %vm2194_vm1, %v3249_v33, %v3251_v13 }
 0x355   : > { %v3370_v39 = vsel %vm3335_vm2, %v3367_v6, %v3369_v51  ;;  %v3124_v56 = vadd.f32 %v6831_v0, %v3021_v26  ;;  %v3024_v3 = vadd.f32 %v3023_v37, %v6755_v24  ;;  %v3025_v34 = vpop.f32.mrb[155].mxu1  ;;  %v3477_v15 = vpack.c.bf16 %v3252_v11, %v3250_v4 }
 0x356   : > { %3656 = vst.msk [vmem:[#allocation3 + $0x78] sm:$0xff] %vm502_vm0, %v3496_v9  ;;  %v3254_v38 = vsel %vm2194_vm1, %v3251_v13, %v3253_v43  ;;  %v5952_v9 = vld [vmem:[%s7855_s5 + $0x30] sm:$0xff]  }
 0x357   : > { %v7062_v5 = vmax.f32 %v3124_v56, 0.0  ;;  %v3125_v33 = vadd.f32 %v6831_v0, %v3024_v3  ;;  %3541 = vrot.lane.b32.xlu0 %v3477_v15, %s5974_s8  ;;  %4144 = vmatpush1.bf16.msra.mxu1 %v5952_v9 }
 0x358   : > { %4145 = vmatprep.subr.bf16.mxu1 %v5973_v1 }
 0x359   : > { %v3255_v6 = vrot.slane %v7062_v5, 1  ;;  %v3371_v17 = vrot.slane %v7062_v5, 2  ;;  %v7068_v24 = vmax.f32 %v3125_v33, 0.0 }
 0x35a   : > { %v3028_v34 = vpop.f32.mrb[156].mxu1 }
 0x35b   : > { %v3372_v4 = vsel %vm3335_vm2, %v3369_v51, %v3371_v17  ;;  %v3257_v26 = vrot.slane %v7068_v24, 1  ;;  %v3373_v13 = vrot.slane %v7068_v24, 2  ;;  %v3029_v54 = vadd.f32 %v3028_v34, %v6759_v8  ;;  %v3030_v28 = vpop.f32.mrb[157].mxu1 }
 0x35c   : > { %v3497_v37 = vpack.c.bf16 %v3372_v4, %v3370_v39  ;;  %v3031_v11 = vpop.f32.mrb[158].mxu1  ;;  %v3256_v56 = vsel %vm2194_vm1, %v3253_v43, %v3255_v6 }
 0x35d   : > { %v3374_v51 = vsel %vm3335_vm2, %v3371_v17, %v3373_v13  ;;  %v3126_v15 = vadd.f32 %v6831_v0, %v3029_v54  ;;  %v3032_v33 = vadd.f32 %v3031_v11, %v6761_v21  ;;  %v3033_v53 = vpop.f32.mrb[159].mxu1  ;;  %v3478_v8 = vpack.c.bf16 %v3256_v56, %v3254_v38 }
 0x35e   : > { %3658 = vst.msk [vmem:[#allocation3 + $0x88] sm:$0xff] %vm502_vm0, %v3497_v37  ;;  %v3258_v34 = vsel %vm2194_vm1, %v3255_v6, %v3257_v26 }
 0x35f   : > { %v7086_v39 = vmax.f32 %v3126_v15, 0.0  ;;  %v3127_v43 = vadd.f32 %v6831_v0, %v3032_v33  ;;  %3543 = vrot.lane.b32.xlu1 %v3478_v8, %s5974_s8 }
 0x361   : > { %v3259_v17 = vrot.slane %v7086_v39, 1  ;;  %v3375_v4 = vrot.slane %v7086_v39, 2  ;;  %v7092_v21 = vmax.f32 %v3127_v43, 0.0 }
 0x362   : > { %v3036_v53 = vpop.f32.mrb[160].mxu1 }
 0x363   : > { %v3376_v38 = vsel %vm3335_vm2, %v3373_v13, %v3375_v4  ;;  %v3261_v54 = vrot.slane %v7092_v21, 1  ;;  %v3377_v6 = vrot.slane %v7092_v21, 2  ;;  %v3037_v28 = vadd.f32 %v3036_v53, %v6764_v19  ;;  %v3038_v9 = vpop.f32.mrb[161].mxu1 }
 0x364   : > { %v3498_v37 = vpack.c.bf16 %v3376_v38, %v3374_v51  ;;  %v3039_v11 = vpop.f32.mrb[162].mxu1  ;;  %v3260_v56 = vsel %vm2194_vm1, %v3257_v26, %v3259_v17 }
 0x365   : > { %v3378_v33 = vsel %vm3335_vm2, %v3375_v4, %v3377_v6  ;;  %v3128_v8 = vadd.f32 %v6831_v0, %v3037_v28  ;;  %v3040_v13 = vadd.f32 %v3039_v11, %v6766_v25  ;;  %v3041_v43 = vpop.f32.mrb[163].mxu1  ;;  %v3479_v3 = vpack.c.bf16 %v3260_v56, %v3258_v34 }
 0x366   : > { %3660 = vst.msk [vmem:[#allocation3 + $0x98] sm:$0xff] %vm502_vm0, %v3498_v37  ;;  %v3262_v19 = vsel %vm2194_vm1, %v3259_v17, %v3261_v54 }
 0x367   : > { %v7106_v53 = vmax.f32 %v3128_v8, 0.0  ;;  %v3129_v51 = vadd.f32 %v6831_v0, %v3040_v13  ;;  %3545 = vrot.lane.b32.xlu0 %v3479_v3, %s5974_s8  ;;  %v5954_v3 = vld [vmem:[%s7855_s5 + $0x38] sm:$0xff]  }
 0x368   : > { %4146 = vmatpush1.bf16.msra.mxu1 %v5954_v3 }
 0x369   : > { %v3263_v26 = vrot.slane %v7106_v53, 1  ;;  %v3379_v4 = vrot.slane %v7106_v53, 2  ;;  %v7112_v38 = vmax.f32 %v3129_v51, 0.0  ;;  %4147 = vmatprep.subr.bf16.mxu1 %v5973_v1 }
 0x36a   : > { %v3044_v28 = vpop.f32.mrb[164].mxu1 }
 0x36b   : > { %v3380_v25 = vsel %vm3335_vm2, %v3377_v6, %v3379_v4  ;;  %v3265_v34 = vrot.slane %v7112_v38, 1  ;;  %v3381_v9 = vrot.slane %v7112_v38, 2  ;;  %v3045_v17 = vadd.f32 %v3044_v28, %v6768_v47  ;;  %v3046_v37 = vpop.f32.mrb[165].mxu1 }
 0x36c   : > { %v3499_v11 = vpack.c.bf16 %v3380_v25, %v3378_v33  ;;  %v3047_v56 = vpop.f32.mrb[166].mxu1  ;;  %v3264_v8 = vsel %vm2194_vm1, %v3261_v54, %v3263_v26 }
 0x36d   : > { %v3382_v6 = vsel %vm3335_vm2, %v3379_v4, %v3381_v9  ;;  %v3130_v43 = vadd.f32 %v6831_v0, %v3045_v17  ;;  %v3048_v51 = vadd.f32 %v3047_v56, %v6770_v12  ;;  %v3049_v15 = vpop.f32.mrb[167].mxu1  ;;  %v3480_v47 = vpack.c.bf16 %v3264_v8, %v3262_v19 }
 0x36e   : > { %3662 = vst.msk [vmem:[#allocation3 + $0xa8] sm:$0xff] %vm502_vm0, %v3499_v11  ;;  %v3266_v28 = vsel %vm2194_vm1, %v3263_v26, %v3265_v34  ;;  %v5956_v11 = vld [vmem:[%s7855_s5 + $0x40] sm:$0xff]  }
 0x36f   : > { %v7130_v33 = vmax.f32 %v3130_v43, 0.0  ;;  %v3131_v54 = vadd.f32 %v6831_v0, %v3048_v51  ;;  %3547 = vrot.lane.b32.xlu1 %v3480_v47, %s5974_s8  ;;  %4148 = vmatpush1.bf16.msra.mxu1 %v5956_v11 }
 0x370   : > { %4149 = vmatprep.subr.bf16.mxu1 %v5973_v1 }
 0x371   : > { %v3267_v4 = vrot.slane %v7130_v33, 1  ;;  %v3383_v25 = vrot.slane %v7130_v33, 2  ;;  %v7136_v12 = vmax.f32 %v3131_v54, 0.0 }
 0x372   : > { %v3052_v15 = vpop.f32.mrb[168].mxu1 }
 0x373   : > { %v3384_v19 = vsel %vm3335_vm2, %v3381_v9, %v3383_v25  ;;  %v3269_v17 = vrot.slane %v7136_v12, 1  ;;  %v3385_v26 = vrot.slane %v7136_v12, 2  ;;  %v3053_v37 = vadd.f32 %v3052_v15, %v6772_v42  ;;  %v3054_v3 = vpop.f32.mrb[169].mxu1 }
 0x374   : > { %v3500_v56 = vpack.c.bf16 %v3384_v19, %v3382_v6  ;;  %v3055_v8 = vpop.f32.mrb[170].mxu1  ;;  %v3268_v43 = vsel %vm2194_vm1, %v3265_v34, %v3267_v4 }
 0x375   : > { %v3386_v9 = vsel %vm3335_vm2, %v3383_v25, %v3385_v26  ;;  %v3132_v47 = vadd.f32 %v6831_v0, %v3053_v37  ;;  %v3056_v54 = vadd.f32 %v3055_v8, %v6774_v27  ;;  %v3057_v13 = vpop.f32.mrb[171].mxu1  ;;  %v3481_v42 = vpack.c.bf16 %v3268_v43, %v3266_v28 }
 0x376   : > { %3664 = vst.msk [vmem:[#allocation3 + $0xb8] sm:$0xff] %vm502_vm0, %v3500_v56  ;;  %v3270_v15 = vsel %vm2194_vm1, %v3267_v4, %v3269_v17 }
 0x377   : > { %v7154_v6 = vmax.f32 %v3132_v47, 0.0  ;;  %v3133_v34 = vadd.f32 %v6831_v0, %v3056_v54  ;;  %3549 = vrot.lane.b32.xlu0 %v3481_v42, %s5974_s8 }
 0x379   : > { %v3271_v25 = vrot.slane %v7154_v6, 1  ;;  %v3387_v19 = vrot.slane %v7154_v6, 2  ;;  %v7160_v27 = vmax.f32 %v3133_v34, 0.0 }
 0x37a   : > { %v3060_v13 = vpop.f32.mrb[172].mxu1 }
 0x37b   : > { %v3388_v28 = vsel %vm3335_vm2, %v3385_v26, %v3387_v19  ;;  %v3273_v37 = vrot.slane %v7160_v27, 1  ;;  %v3389_v4 = vrot.slane %v7160_v27, 2  ;;  %v3061_v3 = vadd.f32 %v3060_v13, %v6780_v48  ;;  %v3062_v11 = vpop.f32.mrb[173].mxu1 }
 0x37c   : > { %v3501_v56 = vpack.c.bf16 %v3388_v28, %v3386_v9  ;;  %v3063_v8 = vpop.f32.mrb[174].mxu1  ;;  %v3272_v43 = vsel %vm2194_vm1, %v3269_v17, %v3271_v25 }
 0x37d   : > { %v3390_v54 = vsel %vm3335_vm2, %v3387_v19, %v3389_v4  ;;  %v3134_v42 = vadd.f32 %v6831_v0, %v3061_v3  ;;  %v3064_v26 = vadd.f32 %v3063_v8, %v6782_v36  ;;  %v3065_v34 = vpop.f32.mrb[175].mxu1  ;;  %v3482_v51 = vpack.c.bf16 %v3272_v43, %v3270_v15 }
 0x37e   : > { %3666 = vst.msk [vmem:[#allocation3 + $0xc8] sm:$0xff] %vm502_vm0, %v3501_v56  ;;  %v3274_v48 = vsel %vm2194_vm1, %v3271_v25, %v3273_v37 }
 0x37f   : > { %v7174_v13 = vmax.f32 %v3134_v42, 0.0  ;;  %v3135_v9 = vadd.f32 %v6831_v0, %v3064_v26  ;;  %3551 = vrot.lane.b32.xlu1 %v3482_v51, %s5974_s8  ;;  %v5958_v51 = vld [vmem:[%s7855_s5 + $0x48] sm:$0xff]  }
 0x380   : > { %4150 = vmatpush1.bf16.msra.mxu1 %v5958_v51 }
 0x381   : > { %v3275_v17 = vrot.slane %v7174_v13, 1  ;;  %v3391_v19 = vrot.slane %v7174_v13, 2  ;;  %v7180_v28 = vmax.f32 %v3135_v9, 0.0  ;;  %4151 = vmatprep.subr.bf16.mxu1 %v5973_v1 }
 0x382   : > { %v3068_v3 = vpop.f32.mrb[176].mxu1 }
 0x383   : > { %v3392_v36 = vsel %vm3335_vm2, %v3389_v4, %v3391_v19  ;;  %v3277_v15 = vrot.slane %v7180_v28, 1  ;;  %v3393_v11 = vrot.slane %v7180_v28, 2  ;;  %v3069_v25 = vadd.f32 %v3068_v3, %v6791_v49  ;;  %v3070_v56 = vpop.f32.mrb[177].mxu1 }
 0x384   : > { %v3502_v8 = vpack.c.bf16 %v3392_v36, %v3390_v54  ;;  %v3071_v43 = vpop.f32.mrb[178].mxu1  ;;  %v3276_v42 = vsel %vm2194_vm1, %v3273_v37, %v3275_v17 }
 0x385   : > { %v3394_v4 = vsel %vm3335_vm2, %v3391_v19, %v3393_v11  ;;  %v3136_v34 = vadd.f32 %v6831_v0, %v3069_v25  ;;  %v3072_v9 = vadd.f32 %v3071_v43, %v6793_v55  ;;  %v3073_v47 = vpop.f32.mrb[179].mxu1  ;;  %v3483_v49 = vpack.c.bf16 %v3276_v42, %v3274_v48 }
 0x386   : > { %3668 = vst.msk [vmem:[#allocation3 + $0xd8] sm:$0xff] %vm502_vm0, %v3502_v8  ;;  %v3278_v3 = vsel %vm2194_vm1, %v3275_v17, %v3277_v15  ;;  %v5960_v8 = vld [vmem:[%s7855_s5 + $0x50] sm:$0xff]  }
 0x387   : > { %v7198_v54 = vmax.f32 %v3136_v34, 0.0  ;;  %v3137_v37 = vadd.f32 %v6831_v0, %v3072_v9  ;;  %3553 = vrot.lane.b32.xlu0 %v3483_v49, %s5974_s8  ;;  %4152 = vmatpush1.bf16.msra.mxu1 %v5960_v8 }
 0x388   : > { %4153 = vmatprep.subr.bf16.mxu1 %v5973_v1 }
 0x389   : > { %v3279_v19 = vrot.slane %v7198_v54, 1  ;;  %v3395_v36 = vrot.slane %v7198_v54, 2  ;;  %v7204_v55 = vmax.f32 %v3137_v37, 0.0 }
 0x38a   : > { %v3076_v47 = vpop.f32.mrb[180].mxu1 }
 0x38b   : > { %v3396_v48 = vsel %vm3335_vm2, %v3393_v11, %v3395_v36  ;;  %v3281_v25 = vrot.slane %v7204_v55, 1  ;;  %v3397_v17 = vrot.slane %v7204_v55, 2  ;;  %v3077_v56 = vadd.f32 %v3076_v47, %v6800_v58  ;;  %v3078_v51 = vpop.f32.mrb[181].mxu1 }
 0x38c   : > { %v3503_v43 = vpack.c.bf16 %v3396_v48, %v3394_v4  ;;  %v3079_v42 = vpop.f32.mrb[182].mxu1  ;;  %v3280_v34 = vsel %vm2194_vm1, %v3277_v15, %v3279_v19 }
 0x38d   : > { %v3398_v11 = vsel %vm3335_vm2, %v3395_v36, %v3397_v17  ;;  %v3138_v49 = vadd.f32 %v6831_v0, %v3077_v56  ;;  %v3080_v37 = vadd.f32 %v3079_v42, %v6802_v62  ;;  %v3081_v26 = vpop.f32.mrb[183].mxu1  ;;  %v3484_v58 = vpack.c.bf16 %v3280_v34, %v3278_v3 }
 0x38e   : > { %3670 = vst.msk [vmem:[#allocation3 + $0xe8] sm:$0xff] %vm502_vm0, %v3503_v43  ;;  %v3282_v47 = vsel %vm2194_vm1, %v3279_v19, %v3281_v25  ;;  %v5962_v43 = vld [vmem:[%s7855_s5 + $0x58] sm:$0xff]  }
 0x38f   : > { %v7222_v4 = vmax.f32 %v3138_v49, 0.0  ;;  %v3139_v15 = vadd.f32 %v6831_v0, %v3080_v37  ;;  %3555 = vrot.lane.b32.xlu1 %v3484_v58, %s5974_s8  ;;  %4154 = vmatpush1.bf16.msra.mxu1 %v5962_v43 }
 0x391   : > { %v3283_v36 = vrot.slane %v7222_v4, 1  ;;  %v3399_v48 = vrot.slane %v7222_v4, 2  ;;  %v7228_v62 = vmax.f32 %v3139_v15, 0.0 }
 0x392   : > { %v3084_v26 = vpop.f32.mrb[184].mxu1 }
 0x393   : > { %v3400_v3 = vsel %vm3335_vm2, %v3397_v17, %v3399_v48  ;;  %v3285_v56 = vrot.slane %v7228_v62, 1  ;;  %v3401_v19 = vrot.slane %v7228_v62, 2  ;;  %v3085_v51 = vadd.f32 %v3084_v26, %v6808_v50  ;;  %v3086_v8 = vpop.f32.mrb[185].mxu1 }
 0x394   : > { %v3504_v42 = vpack.c.bf16 %v3400_v3, %v3398_v11  ;;  %v3087_v34 = vpop.f32.mrb[186].mxu1  ;;  %v3284_v49 = vsel %vm2194_vm1, %v3281_v25, %v3283_v36  ;;  %v3467_v37 = vpack.c.bf16 %v7228_v62, %v7222_v4 }
 0x395   : > { %v3402_v17 = vsel %vm3335_vm2, %v3399_v48, %v3401_v19  ;;  %v3140_v58 = vadd.f32 %v6831_v0, %v3085_v51  ;;  %v3088_v15 = vadd.f32 %v3087_v34, %v6810_v30  ;;  %v3089_v9 = vpop.f32.mrb[187].mxu1  ;;  %v3485_v50 = vpack.c.bf16 %v3284_v49, %v3282_v47  ;;  %v5942_v48 = vld [vmem:[%s7855_s5 + $0xc0] sm:$0xff]  }
 0x396   : > { %3672 = vst.msk [vmem:[#allocation3 + $0xf8] sm:$0xff] %vm502_vm0, %v3504_v42  ;;  %v3286_v26 = vsel %vm2194_vm1, %v3283_v36, %v3285_v56 }
 0x397   : > { %v7245_v11 = vmax.f32 %v3140_v58, 0.0  ;;  %v3141_v25 = vadd.f32 %v6831_v0, %v3088_v15  ;;  %3557 = vrot.lane.b32.xlu0 %v3485_v50, %s5974_s8  ;;  %v7267_v58 = vld [vmem:[#allocation3 + $0x28] sm:$0xff] }
 0x399   : > { %v3287_v3 = vrot.slane %v7245_v11, 1  ;;  %v3403_v30 = vrot.slane %v7245_v11, 2  ;;  %v7254_v9 = vmax.f32 %v3141_v25, 0.0  ;;  %v3530_v47 = vpop.permute.xlu0 %3529 }
 0x39a   : > { %v7260_v36 = vsel %vm502_vm0, %v3452_v63, %v3530_v47  ;;  %v3092_v51 = vpop.f32.mrb[188].mxu1 }
 0x39b   : > { %v3404_v8 = vsel %vm3335_vm2, %v3401_v19, %v3403_v30  ;;  %v3289_v43 = vrot.slane %v7254_v9, 1  ;;  %v3405_v42 = vrot.slane %v7254_v9, 2  ;;  %v3093_v34 = vadd.f32 %v3092_v51, %v6816_v22  ;;  %v3094_v49 = vpop.f32.mrb[189].mxu1  ;;  %3920 = vmatmul.mubr.bf16.vlgmr.msra.gmra.mrb[40].mxu0 %v7260_v36 }
 0x39c   : > { %v3505_v15 = vpack.c.bf16 %v3404_v8, %v3402_v17  ;;  %v3095_v50 = vpop.f32.mrb[190].mxu1  ;;  %v3288_v44 = vsel %vm2194_vm1, %v3285_v56, %v3287_v3  ;;  %5279 = vmatprep.mubr.msk.bf16.mxu0 %vm502_vm0, %v7267_v58  ;;  %4483 = vmatpush1.bf16.msra.mxu0 %v5942_v48  ;;  %v3468_v22 = vpack.c.bf16 %v7254_v9, %v7245_v11 }
 0x39d   : > { %v3406_v63 = vsel %vm3335_vm2, %v3403_v30, %v3405_v42  ;;  %v3142_v19 = vadd.f32 %v6831_v0, %v3093_v34  ;;  %v3096_v17 = vadd.f32 %v3095_v50, %v6821_v14  ;;  %v3097_v25 = vpop.f32.mrb[191].mxu1  ;;  %v3486_v47 = vpack.c.bf16 %v3288_v44, %v3286_v26  ;;  %4484 = vmatprep.subr.bf16.mxu0 %v5973_v1  ;;  %v5946_v14 = vld [vmem:[%s7855_s5 + $0xd0] sm:$0xff]  }
 0x39e   : > { %3674 = vst.msk [vmem:[#allocation3 + $0x108] sm:$0xff] %vm502_vm0, %v3505_v15  ;;  %v3290_v56 = vsel %vm2194_vm1, %v3287_v3, %v3289_v43  ;;  %v7860_v50 = vpack.c.bf16 %v6892_v45, %v6863_v40 }
 0x39f   : > { %v7283_v48 = vmax.f32 %v3142_v19, 0.0  ;;  %v3143_v51 = vadd.f32 %v6831_v0, %v3096_v17  ;;  %3559 = vrot.lane.b32.xlu1 %v3486_v47, %s5974_s8  ;;  %v7862_v19 = vrot.slane %v6843_v23, 1 }
 0x3a0   : > { %v3532_v8 = vpop.permute.xlu0 %3531  ;;  %4485 = vmatpush1.bf16.msra.mxu0 %v5944_v52 }
 0x3a1   : > { %v3291_v26 = vrot.slane %v7283_v48, 1  ;;  %v3407_v30 = vrot.slane %v7283_v48, 2  ;;  %v7292_v34 = vmax.f32 %v3143_v51, 0.0  ;;  %v7298_v3 = vsel %vm502_vm0, %v3453_v18, %v3532_v8  ;;  %4486 = vmatprep.subr.bf16.mxu0 %v5973_v1 }
 0x3a2   : > { %v7863_v8 = vpack.c.bf16 %v6930_v31, %v6921_v10  ;;  %v5953_v10 = vld [vmem:[%s7855_s5 + $0xf0] sm:$0xff]  }
 0x3a3   : > { %v3408_v0 = vsel %vm3335_vm2, %v3405_v42, %v3407_v30  ;;  %v3293_v49 = vrot.slane %v7292_v34, 1  ;;  %v3409_v15 = vrot.slane %v7292_v34, 2  ;;  %3527 = vrot.lane.b32.xlu1 %v7860_v50, %s5974_s8  ;;  %v3292_v44 = vsel %vm2194_vm1, %v3289_v43, %v3291_v26  ;;  %3928 = vmatmul.mubr.bf16.gmra.mrb[44].mxu0 %v7298_v3  ;;  %v5948_v42 = vld [vmem:[%s7855_s5 + $0xd8] sm:$0xff]  }
 0x3a4   : > { %v3506_v32 = vpack.c.bf16 %v3408_v0, %v3406_v63  ;;  %v3487_v18 = vpack.c.bf16 %v3292_v44, %v3290_v56  ;;  %5280 = vmatprep.mubr.msk.bf16.mxu0 %vm502_vm0, %v7310_v41  ;;  %4487 = vmatpush1.bf16.msra.mxu0 %v5946_v14  ;;  %v3469_v40 = vpack.c.bf16 %v7292_v34, %v7283_v48  ;;  %v7861_v43 = vrot.slane %v6843_v23, 2  ;;  %v5950_v56 = vld [vmem:[%s7855_s5 + $0xe0] sm:$0xff]   ;;  %v5955_v50 = vld [vmem:[%s7855_s5 + $0xf8] sm:$0xff]  }
 0x3a5   : > { %v3410_v45 = vsel %vm3335_vm2, %v3407_v30, %v3409_v15  ;;  %v3294_v63 = vsel %vm2194_vm1, %v3291_v26, %v3293_v49  ;;  %v3334_v17 = vsel %vm2194_vm1, %v3293_v49, %v7862_v19  ;;  %4488 = vmatprep.subr.bf16.mxu0 %v5973_v1  ;;  %v7343_v26 = vld [vmem:[#allocation3 + $0x48] sm:$0xff]  ;;  %v7864_v0 = vpack.c.bf16 %v6955_v61, %v6950_v59  ;;  %v5957_v59 = vld [vmem:[%s7855_s5 + $0x100] sm:$0xff]  }
 0x3a6   : > { %v3450_v52 = vsel %vm3335_vm2, %v3409_v15, %v7861_v43  ;;  %3676 = vst.msk [vmem:[#allocation3 + $0x118] sm:$0xff] %vm502_vm0, %v3506_v32  ;;  %3561 = vrot.lane.b32.xlu0 %v3487_v18, %s5974_s8  ;;  %v3488_v47 = vpack.c.bf16 %v3334_v17, %v3294_v63  ;;  %v5951_v30 = vld [vmem:[%s7855_s5 + $0xe8] sm:$0xff]   ;;  %v7362_v15 = vld [vmem:[#allocation3 + $0x58] sm:$0xff]  ;;  %v7865_v44 = vpack.c.bf16 %v6980_v7, %v6974_v20  ;;  %v5961_v20 = vld [vmem:[%s7855_s5 + $0x110] sm:$0xff]  }
 0x3a7   : > { %v3507_v25 = vpack.c.bf16 %v3450_v52, %v3410_v45  ;;  %v7381_v18 = vld [vmem:[#allocation3 + $0x68] sm:$0xff]  ;;  %v7866_v45 = vpack.c.bf16 %v7000_v16, %v6994_v29  ;;  %v7400_v52 = vld [vmem:[#allocation3 + $0x78] sm:$0xff]  ;;  %v7867_v29 = vpack.c.bf16 %v7024_v35, %v7018_v60 }
 0x3a8   : > { %4489 = vmatpush1.bf16.msra.mxu0 %v5948_v42  ;;  %v5959_v42 = vld [vmem:[%s7855_s5 + $0x108] sm:$0xff]   ;;  %v5963_v63 = vld [vmem:[%s7855_s5 + $0x118] sm:$0xff]  }
 0x3a9   : > { %3678 = vst.msk [vmem:[#allocation3 + $0x128] sm:$0xff] %vm502_vm0, %v3507_v25  ;;  %v3534_v51 = vpop.permute.xlu1 %3533  ;;  %4490 = vmatprep.subr.bf16.mxu0 %v5973_v1  ;;  %v7415_v17 = vld [vmem:[#allocation3 + $0x88] sm:$0xff]  ;;  %v7426_v60 = vld [vmem:[#allocation3 + $0x98] sm:$0xff] }
 0x3aa   : > { %v7339_v14 = vsel %vm502_vm0, %v7863_v8, %v3534_v51  ;;  %3563 = vrot.lane.b32.xlu0 %v3488_v47, %s5974_s8  ;;  %v7868_v47 = vpack.c.bf16 %v7044_v2, %v7038_v57  ;;  %v7437_v57 = vld [vmem:[#allocation3 + $0xa8] sm:$0xff]  ;;  %v7870_v8 = vpack.c.bf16 %v7092_v21, %v7086_v39 }
 0x3ab   : > { %3936 = vmatmul.mubr.bf16.gmra.mrb[48].mxu0 %v7339_v14  ;;  %v7459_v39 = vld [vmem:[#allocation3 + $0xc8] sm:$0xff] }
 0x3ac   : > { %5281 = vmatprep.mubr.msk.bf16.mxu0 %vm502_vm0, %v7343_v26  ;;  %4491 = vmatpush1.bf16.msra.mxu0 %v5950_v56  ;;  %v7869_v56 = vpack.c.bf16 %v7068_v24, %v7062_v5  ;;  %v7448_v5 = vld [vmem:[#allocation3 + $0xb8] sm:$0xff] }
 0x3ad   : > { %4492 = vmatprep.subr.bf16.mxu0 %v5973_v1 }
 0x3b0   : > { %4493 = vmatpush1.bf16.msra.mxu0 %v5951_v30 }
 0x3b1   : > { %v3536_v31 = vpop.permute.xlu1 %3535  ;;  %4494 = vmatprep.subr.bf16.mxu0 %v5973_v1 }
 0x3b2   : > { %v7359_v49 = vsel %vm502_vm0, %v7864_v0, %v3536_v31  ;;  %v7872_v0 = vpack.c.bf16 %v7136_v12, %v7130_v33  ;;  %v7481_v33 = vld [vmem:[#allocation3 + $0xe8] sm:$0xff] }
 0x3b3   : > { %3944 = vmatmul.mubr.bf16.gmra.mrb[52].mxu0 %v7359_v49 }
 0x3b4   : > { %5282 = vmatprep.mubr.msk.bf16.mxu0 %vm502_vm0, %v7362_v15  ;;  %4495 = vmatpush1.bf16.msra.mxu0 %v5953_v10  ;;  %v7871_v10 = vpack.c.bf16 %v7112_v38, %v7106_v53  ;;  %v7470_v53 = vld [vmem:[#allocation3 + $0xd8] sm:$0xff] }
 0x3b5   : > { %4496 = vmatprep.subr.bf16.mxu0 %v5973_v1 }
 0x3b8   : > { %4497 = vmatpush1.bf16.msra.mxu0 %v5955_v50 }
 0x3b9   : > { %v3538_v61 = vpop.permute.xlu0 %3537  ;;  %4498 = vmatprep.subr.bf16.mxu0 %v5973_v1 }
 0x3ba   : > { %v7378_v32 = vsel %vm502_vm0, %v7865_v44, %v3538_v61  ;;  %v7874_v44 = vpack.c.bf16 %v7180_v28, %v7174_v13  ;;  %v7503_v13 = vld [vmem:[#allocation3 + $0x108] sm:$0xff] }
 0x3bb   : > { %3952 = vmatmul.mubr.bf16.gmra.mrb[56].mxu0 %v7378_v32 }
 0x3bc   : > { %5283 = vmatprep.mubr.msk.bf16.mxu0 %vm502_vm0, %v7381_v18  ;;  %4499 = vmatpush1.bf16.msra.mxu0 %v5957_v59  ;;  %v7873_v59 = vpack.c.bf16 %v7160_v27, %v7154_v6  ;;  %v7492_v6 = vld [vmem:[#allocation3 + $0xf8] sm:$0xff] }
 0x3bd   : > { %4500 = vmatprep.subr.bf16.mxu0 %v5973_v1 }
 0x3c0   : > { %4501 = vmatpush1.bf16.msra.mxu0 %v5959_v42 }
 0x3c1   : > { %v3540_v7 = vpop.permute.xlu1 %3539  ;;  %4502 = vmatprep.subr.bf16.mxu0 %v5973_v1 }
 0x3c2   : > { %v7397_v43 = vsel %vm502_vm0, %v7866_v45, %v3540_v7 }
 0x3c3   : > { %3960 = vmatmul.mubr.bf16.gmra.mrb[60].mxu0 %v7397_v43 }
 0x3c4   : > { %5284 = vmatprep.mubr.msk.bf16.mxu0 %vm502_vm0, %v7400_v52  ;;  %4503 = vmatpush1.bf16.msra.mxu0 %v5961_v20  ;;  %v7875_v20 = vpack.c.bf16 %v7204_v55, %v7198_v54  ;;  %v7514_v54 = vld [vmem:[#allocation3 + $0x118] sm:$0xff] }
 0x3c5   : > { %4504 = vmatprep.subr.bf16.mxu0 %v5973_v1 }
 0x3c8   : > { %4505 = vmatpush1.bf16.msra.mxu0 %v5963_v63  ;;  %v7876_v63 = vpack.c.bf16 %v6846_v46, %v6843_v23 }
 0x3c9   : > { %v3542_v19 = vpop.permute.xlu0 %3541 }
 0x3ca   : > { %v7412_v16 = vsel %vm502_vm0, %v7867_v29, %v3542_v19 }
 0x3cb   : > { %3968 = vmatmul.mubr.bf16.gmra.mrb[64].mxu0 %v7412_v16 }
 0x3cc   : > { %5285 = vmatprep.mubr.msk.bf16.mxu0 %vm502_vm0, %v7415_v17 }
 0x3d1   : > { %v3544_v25 = vpop.permute.xlu1 %3543 }
 0x3d2   : > { %v7423_v1 = vsel %vm502_vm0, %v7868_v47, %v3544_v25  ;;  %v5964_v25 = vld [vmem:[#allocation3 + $0x18] sm:$0xff] }
 0x3d3   : > { %3976 = vmatmul.mubr.bf16.gmra.mrb[68].mxu0 %v7423_v1 }
 0x3d4   : > { %5286 = vmatprep.mubr.msk.bf16.mxu0 %vm502_vm0, %v7426_v60 }
 0x3d9   : > { %v3546_v35 = vpop.permute.xlu0 %3545 }
 0x3da   : > { %v7434_v51 = vsel %vm502_vm0, %v7869_v56, %v3546_v35 }
 0x3db   : > { %3984 = vmatmul.mubr.bf16.gmra.mrb[72].mxu0 %v7434_v51 }
 0x3dc   : > { %5287 = vmatprep.mubr.msk.bf16.mxu0 %vm502_vm0, %v7437_v57 }
 0x3e1   : > { %v3548_v2 = vpop.permute.xlu1 %3547 }
 0x3e2   : > { %v7445_v30 = vsel %vm502_vm0, %v7870_v8, %v3548_v2 }
 0x3e3   : > { %3992 = vmatmul.mubr.bf16.gmra.mrb[76].mxu0 %v7445_v30 }
 0x3e4   : > { %5288 = vmatprep.mubr.msk.bf16.mxu0 %vm502_vm0, %v7448_v5 }
 0x3e9   : > { %v3550_v24 = vpop.permute.xlu0 %3549 }
 0x3ea   : > { %v7456_v31 = vsel %vm502_vm0, %v7871_v10, %v3550_v24 }
 0x3eb   : > { %4000 = vmatmul.mubr.bf16.gmra.mrb[80].mxu0 %v7456_v31 }
 0x3ec   : > { %5289 = vmatprep.mubr.msk.bf16.mxu0 %vm502_vm0, %v7459_v39 }
 0x3f1   : > { %v3552_v21 = vpop.permute.xlu1 %3551 }
 0x3f2   : > { %v7467_v50 = vsel %vm502_vm0, %v7872_v0, %v3552_v21 }
 0x3f3   : > { %4008 = vmatmul.mubr.bf16.gmra.mrb[84].mxu0 %v7467_v50 }
 0x3f4   : > { %5290 = vmatprep.mubr.msk.bf16.mxu0 %vm502_vm0, %v7470_v53 }
 0x3f9   : > { %v3554_v38 = vpop.permute.xlu0 %3553 }
 0x3fa   : > { %v7478_v61 = vsel %vm502_vm0, %v7873_v59, %v3554_v38 }
 0x3fb   : > { %4016 = vmatmul.mubr.bf16.gmra.mrb[88].mxu0 %v7478_v61 }
 0x3fc   : > { %5291 = vmatprep.mubr.msk.bf16.mxu0 %vm502_vm0, %v7481_v33 }
 0x401   : > { %v3556_v12 = vpop.permute.xlu1 %3555 }
 0x402   : > { %v7489_v42 = vsel %vm502_vm0, %v7874_v44, %v3556_v12 }
 0x403   : > { %4024 = vmatmul.mubr.bf16.gmra.mrb[92].mxu0 %v7489_v42 }
 0x404   : > { %5292 = vmatprep.mubr.msk.bf16.mxu0 %vm502_vm0, %v7492_v6 }
 0x409   : > { %v3558_v27 = vpop.permute.xlu0 %3557 }
 0x40a   : > { %v7500_v7 = vsel %vm502_vm0, %v7875_v20, %v3558_v27 }
 0x40b   : > { %4032 = vmatmul.mubr.bf16.gmra.mrb[96].mxu0 %v7500_v7 }
 0x40c   : > { %5293 = vmatprep.mubr.msk.bf16.mxu0 %vm502_vm0, %v7503_v13 }
 0x411   : > { %v3560_v28 = vpop.permute.xlu1 %3559 }
 0x412   : > { %v7511_v45 = vsel %vm502_vm0, %v3467_v37, %v3560_v28 }
 0x413   : > { %4040 = vmatmul.mubr.bf16.gmra.mrb[100].mxu0 %v7511_v45 }
 0x414   : > { %5294 = vmatprep.mubr.msk.bf16.mxu0 %vm502_vm0, %v7514_v54 }
 0x415   : > { %v3528_v55 = vpop.permute.xlu1 %3527 }
 0x416   : > { %v3567_v19 = vsel %vm502_vm0, %v7876_v63, %v3528_v55 }
 0x417   : > { %4164 = vmatmul.mubr.bf16.vlgmr.msra.gmra.mrb[192].mxu1 %v3567_v19 }
 0x418   : > { %v3562_v29 = vpop.permute.xlu0 %3561  ;;  %5308 = vmatprep.mubr.msk.bf16.mxu1 %vm502_vm0, %v5964_v25 }
 0x419   : > { %v7527_v4 = vsel %vm502_vm0, %v3468_v22, %v3562_v29 }
 0x41b   : > { %4048 = vmatmul.mubr.bf16.gmra.mrb[104].mxu0 %v7527_v4 }
 0x41c   : > { %v3564_v62 = vpop.permute.xlu0 %3563  ;;  %5360 = vmatprep.mubr.msk.bf16.mxu0 %vm502_vm0, %v7267_v58 }
 0x41d   : > { %v7536_v23 = vsel %vm502_vm0, %v3469_v40, %v3564_v62 }
 0x41f   : > { %4172 = vmatmul.mubr.bf16.gmra.mrb[196].mxu1 %v7260_v36 }
 0x420   : > { %5309 = vmatprep.mubr.msk.bf16.mxu1 %vm502_vm0, %v7267_v58 }
 0x423   : > { %4515 = vmatmul.mubr.bf16.vlgmr.msra.gmra.mrb[108].mxu0 %v7298_v3 }
 0x424   : > { %5361 = vmatprep.mubr.msk.bf16.mxu0 %vm502_vm0, %v7310_v41 }
 0x427   : > { %4180 = vmatmul.mubr.bf16.gmra.mrb[200].mxu1 %v7298_v3 }
 0x428   : > { %5310 = vmatprep.mubr.msk.bf16.mxu1 %vm502_vm0, %v7310_v41 }
 0x42b   : > { %4523 = vmatmul.mubr.bf16.gmra.mrb[112].mxu0 %v7339_v14 }
 0x42c   : > { %5362 = vmatprep.mubr.msk.bf16.mxu0 %vm502_vm0, %v7343_v26 }
 0x42f   : > { %4188 = vmatmul.mubr.bf16.gmra.mrb[204].mxu1 %v7339_v14 }
 0x430   : > { %5311 = vmatprep.mubr.msk.bf16.mxu1 %vm502_vm0, %v7343_v26 }
 0x433   : > { %4531 = vmatmul.mubr.bf16.gmra.mrb[116].mxu0 %v7359_v49 }
 0x434   : > { %5363 = vmatprep.mubr.msk.bf16.mxu0 %vm502_vm0, %v7362_v15 }
 0x437   : > { %4196 = vmatmul.mubr.bf16.gmra.mrb[208].mxu1 %v7359_v49 }
 0x438   : > { %5312 = vmatprep.mubr.msk.bf16.mxu1 %vm502_vm0, %v7362_v15 }
 0x43b   : > { %4539 = vmatmul.mubr.bf16.gmra.mrb[120].mxu0 %v7378_v32 }
 0x43c   : > { %5364 = vmatprep.mubr.msk.bf16.mxu0 %vm502_vm0, %v7381_v18 }
 0x43f   : > { %4204 = vmatmul.mubr.bf16.gmra.mrb[212].mxu1 %v7378_v32 }
 0x440   : > { %5313 = vmatprep.mubr.msk.bf16.mxu1 %vm502_vm0, %v7381_v18 }
 0x443   : > { %4547 = vmatmul.mubr.bf16.gmra.mrb[124].mxu0 %v7397_v43 }
 0x444   : > { %5365 = vmatprep.mubr.msk.bf16.mxu0 %vm502_vm0, %v7400_v52 }
 0x447   : > { %4212 = vmatmul.mubr.bf16.gmra.mrb[216].mxu1 %v7397_v43 }
 0x448   : > { %5314 = vmatprep.mubr.msk.bf16.mxu1 %vm502_vm0, %v7400_v52 }
 0x44b   : > { %4555 = vmatmul.mubr.bf16.gmra.mrb[128].mxu0 %v7412_v16 }
 0x44c   : > { %5366 = vmatprep.mubr.msk.bf16.mxu0 %vm502_vm0, %v7415_v17 }
 0x44f   : > { %4220 = vmatmul.mubr.bf16.gmra.mrb[220].mxu1 %v7412_v16 }
 0x450   : > { %5315 = vmatprep.mubr.msk.bf16.mxu1 %vm502_vm0, %v7415_v17 }
 0x453   : > { %4563 = vmatmul.mubr.bf16.gmra.mrb[132].mxu0 %v7423_v1 }
 0x454   : > { %5367 = vmatprep.mubr.msk.bf16.mxu0 %vm502_vm0, %v7426_v60 }
 0x457   : > { %4228 = vmatmul.mubr.bf16.gmra.mrb[224].mxu1 %v7423_v1 }
 0x458   : > { %5316 = vmatprep.mubr.msk.bf16.mxu1 %vm502_vm0, %v7426_v60  ;;  %v4333_v60 = vld [vmem:[#allocation3 + $0x128] sm:$0xff] }
 0x45b   : > { %4571 = vmatmul.mubr.bf16.gmra.mrb[136].mxu0 %v7434_v51 }
 0x45c   : > { %5368 = vmatprep.mubr.msk.bf16.mxu0 %vm502_vm0, %v7437_v57 }
 0x45f   : > { %4236 = vmatmul.mubr.bf16.gmra.mrb[228].mxu1 %v7434_v51 }
 0x460   : > { %5317 = vmatprep.mubr.msk.bf16.mxu1 %vm502_vm0, %v7437_v57 }
 0x463   : > { %4579 = vmatmul.mubr.bf16.gmra.mrb[140].mxu0 %v7445_v30 }
 0x464   : > { %5369 = vmatprep.mubr.msk.bf16.mxu0 %vm502_vm0, %v7448_v5 }
 0x467   : > { %4244 = vmatmul.mubr.bf16.gmra.mrb[232].mxu1 %v7445_v30 }
 0x468   : > { %5318 = vmatprep.mubr.msk.bf16.mxu1 %vm502_vm0, %v7448_v5 }
 0x46b   : > { %4587 = vmatmul.mubr.bf16.gmra.mrb[144].mxu0 %v7456_v31 }
 0x46c   : > { %5370 = vmatprep.mubr.msk.bf16.mxu0 %vm502_vm0, %v7459_v39 }
 0x46e   : > { %v7598_v46 = vpop.f32.mrb[40].mxu0 }
 0x46f   : > { %v3923_v37 = vpop.f32.mrb[41].mxu0  ;;  %4252 = vmatmul.mubr.bf16.gmra.mrb[236].mxu1 %v7456_v31 }
 0x470   : > { %v7601_v11 = vpop.f32.mrb[42].mxu0  ;;  %5319 = vmatprep.mubr.msk.bf16.mxu1 %vm502_vm0, %v7459_v39 }
 0x471   : > { %v3926_v9 = vpop.f32.mrb[43].mxu0 }
 0x473   : > { %4595 = vmatmul.mubr.bf16.gmra.mrb[148].mxu0 %v7467_v50 }
 0x474   : > { %5371 = vmatprep.mubr.msk.bf16.mxu0 %vm502_vm0, %v7470_v53 }
 0x476   : > { %v7608_v36 = vpop.f32.mrb[44].mxu0 }
 0x477   : > { %v3931_v58 = vpop.f32.mrb[45].mxu0  ;;  %4260 = vmatmul.mubr.bf16.gmra.mrb[240].mxu1 %v7467_v50 }
 0x478   : > { %v7611_v22 = vpop.f32.mrb[46].mxu0  ;;  %5320 = vmatprep.mubr.msk.bf16.mxu1 %vm502_vm0, %v7470_v53 }
 0x479   : > { %v3934_v48 = vpop.f32.mrb[47].mxu0 }
 0x47b   : > { %4603 = vmatmul.mubr.bf16.gmra.mrb[152].mxu0 %v7478_v61 }
 0x47c   : > { %5372 = vmatprep.mubr.msk.bf16.mxu0 %vm502_vm0, %v7481_v33 }
 0x47e   : > { %v7618_v34 = vpop.f32.mrb[48].mxu0 }
 0x47f   : > { %v3939_v3 = vpop.f32.mrb[49].mxu0  ;;  %4268 = vmatmul.mubr.bf16.gmra.mrb[244].mxu1 %v7478_v61 }
 0x480   : > { %v7621_v41 = vpop.f32.mrb[50].mxu0  ;;  %5321 = vmatprep.mubr.msk.bf16.mxu1 %vm502_vm0, %v7481_v33 }
 0x481   : > { %v3942_v40 = vpop.f32.mrb[51].mxu0 }
 0x483   : > { %4611 = vmatmul.mubr.bf16.gmra.mrb[156].mxu0 %v7489_v42 }
 0x484   : > { %5373 = vmatprep.mubr.msk.bf16.mxu0 %vm502_vm0, %v7492_v6 }
 0x486   : > { %v7628_v14 = vpop.f32.mrb[52].mxu0 }
 0x487   : > { %v3947_v26 = vpop.f32.mrb[53].mxu0  ;;  %4276 = vmatmul.mubr.bf16.gmra.mrb[248].mxu1 %v7489_v42 }
 0x488   : > { %v7631_v49 = vpop.f32.mrb[54].mxu0  ;;  %5322 = vmatprep.mubr.msk.bf16.mxu1 %vm502_vm0, %v7492_v6 }
 0x489   : > { %v3950_v15 = vpop.f32.mrb[55].mxu0 }
 0x48b   : > { %4619 = vmatmul.mubr.bf16.gmra.mrb[160].mxu0 %v7500_v7 }
 0x48c   : > { %5374 = vmatprep.mubr.msk.bf16.mxu0 %vm502_vm0, %v7503_v13 }
 0x48e   : > { %v7638_v32 = vpop.f32.mrb[56].mxu0 }
 0x48f   : > { %v3955_v18 = vpop.f32.mrb[57].mxu0  ;;  %4284 = vmatmul.mubr.bf16.gmra.mrb[252].mxu1 %v7500_v7 }
 0x490   : > { %v7641_v43 = vpop.f32.mrb[58].mxu0  ;;  %5323 = vmatprep.mubr.msk.bf16.mxu1 %vm502_vm0, %v7503_v13 }
 0x491   : > { %v3958_v52 = vpop.f32.mrb[59].mxu0 }
 0x493   : > { %4627 = vmatmul.mubr.bf16.gmra.mrb[164].mxu0 %v7511_v45 }
 0x494   : > { %5375 = vmatprep.mubr.msk.bf16.mxu0 %vm502_vm0, %v7514_v54 }
 0x496   : > { %v7648_v16 = vpop.f32.mrb[60].mxu0 }
 0x497   : > { %v3963_v17 = vpop.f32.mrb[61].mxu0  ;;  %4292 = vmatmul.mubr.bf16.gmra.mrb[0].mxu1 %v7511_v45 }
 0x498   : > { %v7651_v47 = vpop.f32.mrb[62].mxu0 }
 0x499   : > { %v3966_v1 = vpop.f32.mrb[63].mxu0 }
 0x49b   : > { %4635 = vmatmul.mubr.bf16.gmra.mrb[168].mxu0 %v7527_v4 }
 0x49c   : > { %5376 = vmatprep.mubr.msk.bf16.mxu0 %vm502_vm0, %v4333_v60 }
 0x49e   : > { %v7655_v35 = vpop.f32.mrb[64].mxu0 }
 0x49f   : > { %v3971_v56 = vpop.f32.mrb[65].mxu0 }
 0x4a0   : > { %v7657_v51 = vpop.f32.mrb[66].mxu0 }
 0x4a1   : > { %v3974_v57 = vpop.f32.mrb[67].mxu0 }
 0x4a3   : > { %4643 = vmatmul.mubr.bf16.gmra.mrb[172].mxu0 %v7536_v23 }
 0x4a6   : > { %v7660_v2 = vpop.f32.mrb[68].mxu0 }
 0x4a7   : > { %v3979_v8 = vpop.f32.mrb[69].mxu0 }
 0x4a8   : > { %v7662_v30 = vpop.f32.mrb[70].mxu0 }
 0x4a9   : > { %v3982_v5 = vpop.f32.mrb[71].mxu0 }
 0x4ae   : > { %v7664_v24 = vpop.f32.mrb[72].mxu0 }
 0x4af   : > { %v3987_v10 = vpop.f32.mrb[73].mxu0 }
 0x4b0   : > { %v7666_v31 = vpop.f32.mrb[74].mxu0 }
 0x4b1   : > { %v3990_v39 = vpop.f32.mrb[75].mxu0 }
 0x4b6   : > { %v7668_v21 = vpop.f32.mrb[76].mxu0 }
 0x4b7   : > { %v3995_v0 = vpop.f32.mrb[77].mxu0 }
 0x4b8   : > { %v7670_v50 = vpop.f32.mrb[78].mxu0 }
 0x4b9   : > { %v3998_v53 = vpop.f32.mrb[79].mxu0 }
 0x4be   : > { %v7672_v38 = vpop.f32.mrb[80].mxu0 }
 0x4bf   : > { %v4003_v59 = vpop.f32.mrb[81].mxu0 }
 0x4c0   : > { %v7674_v61 = vpop.f32.mrb[82].mxu0 }
 0x4c1   : > { %v4006_v33 = vpop.f32.mrb[83].mxu0 }
 0x4c6   : > { %v7676_v12 = vpop.f32.mrb[84].mxu0 }
 0x4c7   : > { %v4011_v44 = vpop.f32.mrb[85].mxu0 }
 0x4c8   : > { %v7678_v42 = vpop.f32.mrb[86].mxu0 }
 0x4c9   : > { %v4014_v6 = vpop.f32.mrb[87].mxu0 }
 0x4ce   : > { %v7680_v27 = vpop.f32.mrb[88].mxu0 }
 0x4cf   : > { %v4019_v20 = vpop.f32.mrb[89].mxu0 }
 0x4d0   : > { %v7682_v7 = vpop.f32.mrb[90].mxu0 }
 0x4d1   : > { %v4022_v13 = vpop.f32.mrb[91].mxu0 }
 0x4d6   : > { %v7684_v28 = vpop.f32.mrb[92].mxu0 }
 0x4d7   : > { %v4027_v45 = vpop.f32.mrb[93].mxu0 }
 0x4d8   : > { %v7686_v54 = vpop.f32.mrb[94].mxu0 }
 0x4d9   : > { %v4030_v55 = vpop.f32.mrb[95].mxu0 }
 0x4de   : > { %v7688_v63 = vpop.f32.mrb[96].mxu0 }
 0x4df   : > { %v4035_v19 = vpop.f32.mrb[97].mxu0 }
 0x4e0   : > { %v7690_v29 = vpop.f32.mrb[98].mxu0 }
 0x4e1   : > { %v4038_v25 = vpop.f32.mrb[99].mxu0 }
 0x4e6   : > { %v7692_v4 = vpop.f32.mrb[100].mxu0 }
 0x4e7   : > { %v4043_v62 = vpop.f32.mrb[101].mxu0 }
 0x4e8   : > { %v7694_v23 = vpop.f32.mrb[102].mxu0 }
 0x4e9   : > { %v4046_v37 = vpop.f32.mrb[103].mxu0 }
 0x4ea   : > { %v4165_v9 = vpop.f32.mrb[192].mxu1 }
 0x4eb   : > { %v4166_v58 = vadd.f32 %v4165_v9, %v7598_v46  ;;  %v4167_v48 = vpop.f32.mrb[193].mxu1 }
 0x4ec   : > { %v4168_v3 = vpop.f32.mrb[194].mxu1 }
 0x4ed   : > { %v4169_v40 = vadd.f32 %v4168_v3, %v7601_v11  ;;  %v4170_v26 = vpop.f32.mrb[195].mxu1  ;;  %v7708_v11 = vld [vmem:[%s7856_s6] ss:$0 sm:$0xff] }
 0x4ee   : > { %v7698_v15 = vpop.f32.mrb[104].mxu0 }
 0x4ef   : > { %v4051_v18 = vpop.f32.mrb[105].mxu0 }
 0x4f0   : > { %v7700_v52 = vpop.f32.mrb[106].mxu0 }
 0x4f1   : > { %v4054_v17 = vpop.f32.mrb[107].mxu0 }
 0x4f2   : > { %v4173_v1 = vpop.f32.mrb[196].mxu1 }
 0x4f3   : > { %v4174_v60 = vadd.f32 %v4173_v1, %v7608_v36  ;;  %v4175_v56 = vpop.f32.mrb[197].mxu1 }
 0x4f4   : > { %v4176_v57 = vpop.f32.mrb[198].mxu1 }
 0x4f5   : > { %v4177_v8 = vadd.f32 %v4176_v57, %v7611_v22  ;;  %v4178_v5 = vpop.f32.mrb[199].mxu1 }
 0x4f6   : > { %v4516_v46 = vpop.f32.mrb[108].mxu0 }
 0x4f7   : > { %v4651_v10 = vadd.f32 %v4516_v46, %v4166_v58  ;;  %v4518_v39 = vpop.f32.mrb[109].mxu0 }
 0x4f8   : > { %v4519_v0 = vpop.f32.mrb[110].mxu0 }
 0x4f9   : > { %v4692_v53 = vadd.f32 %v7708_v11, %v4651_v10  ;;  %v4652_v59 = vadd.f32 %v4519_v0, %v4169_v40  ;;  %v4521_v33 = vpop.f32.mrb[111].mxu0 }
 0x4fa   : > { %v4181_v36 = vpop.f32.mrb[200].mxu1 }
 0x4fb   : > { %v4726_v22 = vmax.f32 %v4692_v53, 0.0  ;;  %v4693_v44 = vadd.f32 %v7708_v11, %v4652_v59  ;;  %v4182_v6 = vadd.f32 %v4181_v36, %v7618_v34  ;;  %v4183_v20 = vpop.f32.mrb[201].mxu1 }
 0x4fc   : > { %v4184_v13 = vpop.f32.mrb[202].mxu1 }
 0x4fd   : > { %4760 = vst.msk [vmem:[%s7714_s20] sm:$0xff] %vm502_vm0, %v4726_v22  ;;  %v4727_v45 = vmax.f32 %v4693_v44, 0.0  ;;  %v4185_v55 = vadd.f32 %v4184_v13, %v7621_v41  ;;  %v4186_v19 = vpop.f32.mrb[203].mxu1 }
 0x4fe   : > { %v4524_v25 = vpop.f32.mrb[112].mxu0 }
 0x4ff   : > { %4761 = vst.msk [vmem:[%s7714_s20 + $0x8] sm:$0xff] %vm502_vm0, %v4727_v45  ;;  %v4653_v62 = vadd.f32 %v4524_v25, %v4174_v60  ;;  %v4526_v37 = vpop.f32.mrb[113].mxu0 }
 0x500   : > { %v4527_v9 = vpop.f32.mrb[114].mxu0 }
 0x501   : > { %v4694_v58 = vadd.f32 %v7708_v11, %v4653_v62  ;;  %v4654_v48 = vadd.f32 %v4527_v9, %v4177_v8  ;;  %v4529_v34 = vpop.f32.mrb[115].mxu0 }
 0x502   : > { %v4189_v3 = vpop.f32.mrb[204].mxu1 }
 0x503   : > { %v4728_v40 = vmax.f32 %v4694_v58, 0.0  ;;  %v4695_v26 = vadd.f32 %v7708_v11, %v4654_v48  ;;  %v4190_v18 = vadd.f32 %v4189_v3, %v7628_v14  ;;  %v4191_v41 = vpop.f32.mrb[205].mxu1 }
 0x504   : > { %v4192_v17 = vpop.f32.mrb[206].mxu1 }
 0x505   : > { %4762 = vst.msk [vmem:[%s7714_s20 + $0x10] sm:$0xff] %vm502_vm0, %v4728_v40  ;;  %v4729_v1 = vmax.f32 %v4695_v26, 0.0  ;;  %v4193_v60 = vadd.f32 %v4192_v17, %v7631_v49  ;;  %v4194_v56 = vpop.f32.mrb[207].mxu1 }
 0x506   : > { %v4532_v57 = vpop.f32.mrb[116].mxu0 }
 0x507   : > { %4763 = vst.msk [vmem:[%s7714_s20 + $0x18] sm:$0xff] %vm502_vm0, %v4729_v1  ;;  %v4655_v8 = vadd.f32 %v4532_v57, %v4182_v6  ;;  %v4534_v5 = vpop.f32.mrb[117].mxu0 }
 0x508   : > { %v4535_v46 = vpop.f32.mrb[118].mxu0 }
 0x509   : > { %v4696_v10 = vadd.f32 %v7708_v11, %v4655_v8  ;;  %v4656_v39 = vadd.f32 %v4535_v46, %v4185_v55  ;;  %v4537_v14 = vpop.f32.mrb[119].mxu0 }
 0x50a   : > { %v4197_v0 = vpop.f32.mrb[208].mxu1 }
 0x50b   : > { %v4730_v53 = vmax.f32 %v4696_v10, 0.0  ;;  %v4697_v59 = vadd.f32 %v7708_v11, %v4656_v39  ;;  %v4198_v33 = vadd.f32 %v4197_v0, %v7638_v32  ;;  %v4199_v49 = vpop.f32.mrb[209].mxu1 }
 0x50c   : > { %v4200_v36 = vpop.f32.mrb[210].mxu1 }
 0x50d   : > { %4764 = vst.msk [vmem:[%s7714_s20 + $0x20] sm:$0xff] %vm502_vm0, %v4730_v53  ;;  %v4731_v22 = vmax.f32 %v4697_v59, 0.0  ;;  %v4201_v44 = vadd.f32 %v4200_v36, %v7641_v43  ;;  %v4202_v6 = vpop.f32.mrb[211].mxu1 }
 0x50e   : > { %v4540_v20 = vpop.f32.mrb[120].mxu0 }
 0x50f   : > { %4765 = vst.msk [vmem:[%s7714_s20 + $0x28] sm:$0xff] %vm502_vm0, %v4731_v22  ;;  %v4657_v13 = vadd.f32 %v4540_v20, %v4190_v18  ;;  %v4542_v45 = vpop.f32.mrb[121].mxu0 }
 0x510   : > { %v4543_v55 = vpop.f32.mrb[122].mxu0 }
 0x511   : > { %v4698_v19 = vadd.f32 %v7708_v11, %v4657_v13  ;;  %v4658_v25 = vadd.f32 %v4543_v55, %v4193_v60  ;;  %v4545_v32 = vpop.f32.mrb[123].mxu0 }
 0x512   : > { %v4205_v62 = vpop.f32.mrb[212].mxu1 }
 0x513   : > { %v4732_v37 = vmax.f32 %v4698_v19, 0.0  ;;  %v4699_v9 = vadd.f32 %v7708_v11, %v4658_v25  ;;  %v4206_v58 = vadd.f32 %v4205_v62, %v7648_v16  ;;  %v4207_v43 = vpop.f32.mrb[213].mxu1 }
 0x514   : > { %v4208_v48 = vpop.f32.mrb[214].mxu1 }
 0x515   : > { %4766 = vst.msk [vmem:[%s7714_s20 + $0x30] sm:$0xff] %vm502_vm0, %v4732_v37  ;;  %v4733_v34 = vmax.f32 %v4699_v9, 0.0  ;;  %v4209_v3 = vadd.f32 %v4208_v48, %v7651_v47  ;;  %v4210_v40 = vpop.f32.mrb[215].mxu1 }
 0x516   : > { %v4548_v26 = vpop.f32.mrb[124].mxu0 }
 0x517   : > { %4767 = vst.msk [vmem:[%s7714_s20 + $0x38] sm:$0xff] %vm502_vm0, %v4733_v34  ;;  %v4659_v18 = vadd.f32 %v4548_v26, %v4198_v33  ;;  %v4550_v41 = vpop.f32.mrb[125].mxu0 }
 0x518   : > { %v4551_v17 = vpop.f32.mrb[126].mxu0 }
 0x519   : > { %v4700_v1 = vadd.f32 %v7708_v11, %v4659_v18  ;;  %v4660_v60 = vadd.f32 %v4551_v17, %v4201_v44  ;;  %v4553_v16 = vpop.f32.mrb[127].mxu0 }
 0x51a   : > { %v4213_v56 = vpop.f32.mrb[216].mxu1 }
 0x51b   : > { %v4734_v57 = vmax.f32 %v4700_v1, 0.0  ;;  %v4701_v8 = vadd.f32 %v7708_v11, %v4660_v60  ;;  %v4214_v5 = vadd.f32 %v4213_v56, %v7655_v35  ;;  %v4215_v47 = vpop.f32.mrb[217].mxu1 }
 0x51c   : > { %v4216_v46 = vpop.f32.mrb[218].mxu1 }
 0x51d   : > { %4768 = vst.msk [vmem:[%s7714_s20 + $0x40] sm:$0xff] %vm502_vm0, %v4734_v57  ;;  %v4735_v10 = vmax.f32 %v4701_v8, 0.0  ;;  %v4217_v39 = vadd.f32 %v4216_v46, %v7657_v51  ;;  %v4218_v14 = vpop.f32.mrb[219].mxu1 }
 0x51e   : > { %v4556_v0 = vpop.f32.mrb[128].mxu0 }
 0x51f   : > { %4769 = vst.msk [vmem:[%s7714_s20 + $0x48] sm:$0xff] %vm502_vm0, %v4735_v10  ;;  %v4661_v53 = vadd.f32 %v4556_v0, %v4206_v58  ;;  %v4558_v59 = vpop.f32.mrb[129].mxu0 }
 0x520   : > { %v4559_v33 = vpop.f32.mrb[130].mxu0 }
 0x521   : > { %v4702_v49 = vadd.f32 %v7708_v11, %v4661_v53  ;;  %v4662_v36 = vadd.f32 %v4559_v33, %v4209_v3  ;;  %v4561_v35 = vpop.f32.mrb[131].mxu0 }
 0x522   : > { %v4221_v22 = vpop.f32.mrb[220].mxu1 }
 0x523   : > { %v4736_v44 = vmax.f32 %v4702_v49, 0.0  ;;  %v4703_v6 = vadd.f32 %v7708_v11, %v4662_v36  ;;  %v4222_v20 = vadd.f32 %v4221_v22, %v7660_v2  ;;  %v4223_v51 = vpop.f32.mrb[221].mxu1 }
 0x524   : > { %v4224_v13 = vpop.f32.mrb[222].mxu1 }
 0x525   : > { %4770 = vst.msk [vmem:[%s7714_s20 + $0x50] sm:$0xff] %vm502_vm0, %v4736_v44  ;;  %v4737_v45 = vmax.f32 %v4703_v6, 0.0  ;;  %v4225_v55 = vadd.f32 %v4224_v13, %v7662_v30  ;;  %v4226_v19 = vpop.f32.mrb[223].mxu1 }
 0x526   : > { %v4564_v25 = vpop.f32.mrb[132].mxu0 }
 0x527   : > { %4771 = vst.msk [vmem:[%s7714_s20 + $0x58] sm:$0xff] %vm502_vm0, %v4737_v45  ;;  %v4663_v32 = vadd.f32 %v4564_v25, %v4214_v5  ;;  %v4566_v62 = vpop.f32.mrb[133].mxu0 }
 0x528   : > { %v4567_v37 = vpop.f32.mrb[134].mxu0 }
 0x529   : > { %v4704_v9 = vadd.f32 %v7708_v11, %v4663_v32  ;;  %v4664_v58 = vadd.f32 %v4567_v37, %v4217_v39  ;;  %v4569_v2 = vpop.f32.mrb[135].mxu0 }
 0x52a   : > { %v4229_v43 = vpop.f32.mrb[224].mxu1 }
 0x52b   : > { %v4738_v48 = vmax.f32 %v4704_v9, 0.0  ;;  %v4705_v34 = vadd.f32 %v7708_v11, %v4664_v58  ;;  %v4230_v3 = vadd.f32 %v4229_v43, %v7664_v24  ;;  %v4231_v30 = vpop.f32.mrb[225].mxu1 }
 0x52c   : > { %v4232_v40 = vpop.f32.mrb[226].mxu1 }
 0x52d   : > { %4772 = vst.msk [vmem:[%s7714_s20 + $0x60] sm:$0xff] %vm502_vm0, %v4738_v48  ;;  %v4739_v26 = vmax.f32 %v4705_v34, 0.0  ;;  %v4233_v18 = vadd.f32 %v4232_v40, %v7666_v31  ;;  %v4234_v41 = vpop.f32.mrb[227].mxu1 }
 0x52e   : > { %v4572_v17 = vpop.f32.mrb[136].mxu0 }
 0x52f   : > { %4773 = vst.msk [vmem:[%s7714_s20 + $0x68] sm:$0xff] %vm502_vm0, %v4739_v26  ;;  %v4665_v1 = vadd.f32 %v4572_v17, %v4222_v20  ;;  %v4574_v60 = vpop.f32.mrb[137].mxu0 }
 0x530   : > { %v4575_v16 = vpop.f32.mrb[138].mxu0 }
 0x531   : > { %v4706_v56 = vadd.f32 %v7708_v11, %v4665_v1  ;;  %v4666_v57 = vadd.f32 %v4575_v16, %v4225_v55  ;;  %v4577_v24 = vpop.f32.mrb[139].mxu0 }
 0x532   : > { %v4237_v8 = vpop.f32.mrb[228].mxu1 }
 0x533   : > { %v4740_v5 = vmax.f32 %v4706_v56, 0.0  ;;  %v4707_v47 = vadd.f32 %v7708_v11, %v4666_v57  ;;  %v4238_v46 = vadd.f32 %v4237_v8, %v7668_v21  ;;  %v4239_v31 = vpop.f32.mrb[229].mxu1 }
 0x534   : > { %v4240_v10 = vpop.f32.mrb[230].mxu1 }
 0x535   : > { %4774 = vst.msk [vmem:[%s7714_s20 + $0x70] sm:$0xff] %vm502_vm0, %v4740_v5  ;;  %v4741_v39 = vmax.f32 %v4707_v47, 0.0  ;;  %v4241_v14 = vadd.f32 %v4240_v10, %v7670_v50  ;;  %v4242_v0 = vpop.f32.mrb[231].mxu1 }
 0x536   : > { %v4580_v53 = vpop.f32.mrb[140].mxu0 }
 0x537   : > { %4775 = vst.msk [vmem:[%s7714_s20 + $0x78] sm:$0xff] %vm502_vm0, %v4741_v39  ;;  %v4667_v59 = vadd.f32 %v4580_v53, %v4230_v3  ;;  %v4582_v33 = vpop.f32.mrb[141].mxu0 }
 0x538   : > { %v4583_v49 = vpop.f32.mrb[142].mxu0 }
 0x539   : > { %v4708_v36 = vadd.f32 %v7708_v11, %v4667_v59  ;;  %v4668_v35 = vadd.f32 %v4583_v49, %v4233_v18  ;;  %v4585_v21 = vpop.f32.mrb[143].mxu0 }
 0x53a   : > { %v4245_v22 = vpop.f32.mrb[232].mxu1 }
 0x53b   : > { %v4742_v44 = vmax.f32 %v4708_v36, 0.0  ;;  %v4709_v6 = vadd.f32 %v7708_v11, %v4668_v35  ;;  %v4246_v20 = vadd.f32 %v4245_v22, %v7672_v38  ;;  %v4247_v50 = vpop.f32.mrb[233].mxu1 }
 0x53c   : > { %v4248_v51 = vpop.f32.mrb[234].mxu1 }
 0x53d   : > { %4776 = vst.msk [vmem:[%s7714_s20 + $0x80] sm:$0xff] %vm502_vm0, %v4742_v44  ;;  %v4743_v13 = vmax.f32 %v4709_v6, 0.0  ;;  %v4249_v45 = vadd.f32 %v4248_v51, %v7674_v61  ;;  %v4250_v55 = vpop.f32.mrb[235].mxu1 }
 0x53e   : > { %v4588_v19 = vpop.f32.mrb[144].mxu0 }
 0x53f   : > { %4777 = vst.msk [vmem:[%s7714_s20 + $0x88] sm:$0xff] %vm502_vm0, %v4743_v13  ;;  %v4669_v25 = vadd.f32 %v4588_v19, %v4238_v46  ;;  %v4590_v32 = vpop.f32.mrb[145].mxu0 }
 0x540   : > { %v4591_v62 = vpop.f32.mrb[146].mxu0 }
 0x541   : > { %v4710_v37 = vadd.f32 %v7708_v11, %v4669_v25  ;;  %v4670_v9 = vadd.f32 %v4591_v62, %v4241_v14  ;;  %v4593_v38 = vpop.f32.mrb[147].mxu0 }
 0x542   : > { %v4253_v58 = vpop.f32.mrb[236].mxu1 }
 0x543   : > { %v4744_v2 = vmax.f32 %v4710_v37, 0.0  ;;  %v4711_v43 = vadd.f32 %v7708_v11, %v4670_v9  ;;  %v4254_v48 = vadd.f32 %v4253_v58, %v7676_v12  ;;  %v4255_v61 = vpop.f32.mrb[237].mxu1 }
 0x544   : > { %v4256_v34 = vpop.f32.mrb[238].mxu1 }
 0x545   : > { %4778 = vst.msk [vmem:[%s7714_s20 + $0x90] sm:$0xff] %vm502_vm0, %v4744_v2  ;;  %v4745_v3 = vmax.f32 %v4711_v43, 0.0  ;;  %v4257_v30 = vadd.f32 %v4256_v34, %v7678_v42  ;;  %v4258_v40 = vpop.f32.mrb[239].mxu1 }
 0x546   : > { %v4596_v26 = vpop.f32.mrb[148].mxu0 }
 0x547   : > { %4779 = vst.msk [vmem:[%s7714_s20 + $0x98] sm:$0xff] %vm502_vm0, %v4745_v3  ;;  %v4671_v18 = vadd.f32 %v4596_v26, %v4246_v20  ;;  %v4598_v41 = vpop.f32.mrb[149].mxu0 }
 0x548   : > { %v4599_v17 = vpop.f32.mrb[150].mxu0 }
 0x549   : > { %v4712_v1 = vadd.f32 %v7708_v11, %v4671_v18  ;;  %v4672_v60 = vadd.f32 %v4599_v17, %v4249_v45  ;;  %v4601_v12 = vpop.f32.mrb[151].mxu0 }
 0x54a   : > { %v4261_v16 = vpop.f32.mrb[240].mxu1 }
 0x54b   : > { %v4746_v56 = vmax.f32 %v4712_v1, 0.0  ;;  %v4713_v57 = vadd.f32 %v7708_v11, %v4672_v60  ;;  %v4262_v24 = vadd.f32 %v4261_v16, %v7680_v27  ;;  %v4263_v42 = vpop.f32.mrb[241].mxu1 }
 0x54c   : > { %v4264_v8 = vpop.f32.mrb[242].mxu1 }
 0x54d   : > { %4780 = vst.msk [vmem:[%s7714_s20 + $0xa0] sm:$0xff] %vm502_vm0, %v4746_v56  ;;  %v4747_v5 = vmax.f32 %v4713_v57, 0.0  ;;  %v4265_v47 = vadd.f32 %v4264_v8, %v7682_v7  ;;  %v4266_v46 = vpop.f32.mrb[243].mxu1 }
 0x54e   : > { %v4604_v31 = vpop.f32.mrb[152].mxu0 }
 0x54f   : > { %4781 = vst.msk [vmem:[%s7714_s20 + $0xa8] sm:$0xff] %vm502_vm0, %v4747_v5  ;;  %v4673_v10 = vadd.f32 %v4604_v31, %v4254_v48  ;;  %v4606_v39 = vpop.f32.mrb[153].mxu0 }
 0x550   : > { %v4607_v14 = vpop.f32.mrb[154].mxu0 }
 0x551   : > { %v4714_v0 = vadd.f32 %v7708_v11, %v4673_v10  ;;  %v4674_v53 = vadd.f32 %v4607_v14, %v4257_v30  ;;  %v4609_v27 = vpop.f32.mrb[155].mxu0 }
 0x552   : > { %v4269_v59 = vpop.f32.mrb[244].mxu1 }
 0x553   : > { %v4748_v33 = vmax.f32 %v4714_v0, 0.0  ;;  %v4715_v49 = vadd.f32 %v7708_v11, %v4674_v53  ;;  %v4270_v36 = vadd.f32 %v4269_v59, %v7684_v28  ;;  %v4271_v7 = vpop.f32.mrb[245].mxu1 }
 0x554   : > { %v4272_v35 = vpop.f32.mrb[246].mxu1 }
 0x555   : > { %4782 = vst.msk [vmem:[%s7714_s20 + $0xb0] sm:$0xff] %vm502_vm0, %v4748_v33  ;;  %v4749_v21 = vmax.f32 %v4715_v49, 0.0  ;;  %v4273_v22 = vadd.f32 %v4272_v35, %v7686_v54  ;;  %v4274_v44 = vpop.f32.mrb[247].mxu1 }
 0x556   : > { %v4612_v6 = vpop.f32.mrb[156].mxu0 }
 0x557   : > { %4783 = vst.msk [vmem:[%s7714_s20 + $0xb8] sm:$0xff] %vm502_vm0, %v4749_v21  ;;  %v4675_v20 = vadd.f32 %v4612_v6, %v4262_v24  ;;  %v4614_v50 = vpop.f32.mrb[157].mxu0 }
 0x558   : > { %v4615_v51 = vpop.f32.mrb[158].mxu0 }
 0x559   : > { %v4716_v13 = vadd.f32 %v7708_v11, %v4675_v20  ;;  %v4676_v45 = vadd.f32 %v4615_v51, %v4265_v47  ;;  %v4617_v28 = vpop.f32.mrb[159].mxu0 }
 0x55a   : > { %v4277_v55 = vpop.f32.mrb[248].mxu1 }
 0x55b   : > { %v4750_v19 = vmax.f32 %v4716_v13, 0.0  ;;  %v4717_v25 = vadd.f32 %v7708_v11, %v4676_v45  ;;  %v4278_v32 = vadd.f32 %v4277_v55, %v7688_v63  ;;  %v4279_v54 = vpop.f32.mrb[249].mxu1 }
 0x55c   : > { %v4280_v62 = vpop.f32.mrb[250].mxu1 }
 0x55d   : > { %4784 = vst.msk [vmem:[%s7714_s20 + $0xc0] sm:$0xff] %vm502_vm0, %v4750_v19  ;;  %v4751_v37 = vmax.f32 %v4717_v25, 0.0  ;;  %v4281_v9 = vadd.f32 %v4280_v62, %v7690_v29  ;;  %v4282_v38 = vpop.f32.mrb[251].mxu1 }
 0x55e   : > { %v4620_v58 = vpop.f32.mrb[160].mxu0 }
 0x55f   : > { %4785 = vst.msk [vmem:[%s7714_s20 + $0xc8] sm:$0xff] %vm502_vm0, %v4751_v37  ;;  %v4677_v2 = vadd.f32 %v4620_v58, %v4270_v36  ;;  %v4622_v43 = vpop.f32.mrb[161].mxu0 }
 0x560   : > { %v4623_v48 = vpop.f32.mrb[162].mxu0 }
 0x561   : > { %v4718_v61 = vadd.f32 %v7708_v11, %v4677_v2  ;;  %v4678_v34 = vadd.f32 %v4623_v48, %v4273_v22  ;;  %v4625_v63 = vpop.f32.mrb[163].mxu0 }
 0x562   : > { %v4285_v3 = vpop.f32.mrb[252].mxu1 }
 0x563   : > { %v4752_v30 = vmax.f32 %v4718_v61, 0.0  ;;  %v4719_v40 = vadd.f32 %v7708_v11, %v4678_v34  ;;  %v4286_v26 = vadd.f32 %v4285_v3, %v7692_v4  ;;  %v4287_v29 = vpop.f32.mrb[253].mxu1 }
 0x564   : > { %v4288_v18 = vpop.f32.mrb[254].mxu1 }
 0x565   : > { %4786 = vst.msk [vmem:[%s7714_s20 + $0xd0] sm:$0xff] %vm502_vm0, %v4752_v30  ;;  %v4753_v41 = vmax.f32 %v4719_v40, 0.0  ;;  %v4289_v17 = vadd.f32 %v4288_v18, %v7694_v23  ;;  %v4290_v1 = vpop.f32.mrb[255].mxu1 }
 0x566   : > { %v4628_v60 = vpop.f32.mrb[164].mxu0 }
 0x567   : > { %4787 = vst.msk [vmem:[%s7714_s20 + $0xd8] sm:$0xff] %vm502_vm0, %v4753_v41  ;;  %v4679_v12 = vadd.f32 %v4628_v60, %v4278_v32  ;;  %v4630_v16 = vpop.f32.mrb[165].mxu0 }
 0x568   : > { %v4631_v56 = vpop.f32.mrb[166].mxu0 }
 0x569   : > { %v4720_v57 = vadd.f32 %v7708_v11, %v4679_v12  ;;  %v4680_v24 = vadd.f32 %v4631_v56, %v4281_v9  ;;  %v4633_v4 = vpop.f32.mrb[167].mxu0 }
 0x56a   : > { %v4293_v42 = vpop.f32.mrb[0].mxu1 }
 0x56b   : > { %v4754_v8 = vmax.f32 %v4720_v57, 0.0  ;;  %v4721_v5 = vadd.f32 %v7708_v11, %v4680_v24  ;;  %v4294_v47 = vadd.f32 %v4293_v42, %v7698_v15  ;;  %v4295_v23 = vpop.f32.mrb[1].mxu1 }
 0x56c   : > { %v4296_v46 = vpop.f32.mrb[2].mxu1 }
 0x56d   : > { %4788 = vst.msk [vmem:[%s7714_s20 + $0xe0] sm:$0xff] %vm502_vm0, %v4754_v8  ;;  %v4755_v31 = vmax.f32 %v4721_v5, 0.0  ;;  %v4297_v10 = vadd.f32 %v4296_v46, %v7700_v52  ;;  %v4298_v39 = vpop.f32.mrb[3].mxu1 }
 0x56e   : > { %v4636_v14 = vpop.f32.mrb[168].mxu0 }
 0x56f   : > { %4789 = vst.msk [vmem:[%s7714_s20 + $0xe8] sm:$0xff] %vm502_vm0, %v4755_v31  ;;  %v4681_v0 = vadd.f32 %v4636_v14, %v4286_v26  ;;  %v4638_v53 = vpop.f32.mrb[169].mxu0 }
 0x570   : > { %v4639_v27 = vpop.f32.mrb[170].mxu0 }
 0x571   : > { %v4722_v59 = vadd.f32 %v7708_v11, %v4681_v0  ;;  %v4682_v33 = vadd.f32 %v4639_v27, %v4289_v17  ;;  %v4641_v15 = vpop.f32.mrb[171].mxu0 }
 0x573   : > { %v4756_v49 = vmax.f32 %v4722_v59, 0.0  ;;  %v4723_v36 = vadd.f32 %v7708_v11, %v4682_v33 }
 0x575   : > { %4790 = vst.msk [vmem:[%s7714_s20 + $0xf0] sm:$0xff] %vm502_vm0, %v4756_v49  ;;  %v4757_v7 = vmax.f32 %v4723_v36, 0.0 }
 0x576   : > { %v4644_v52 = vpop.f32.mrb[172].mxu0 }
 0x577   : > { %4791 = vst.msk [vmem:[%s7714_s20 + $0xf8] sm:$0xff] %vm502_vm0, %v4757_v7  ;;  %v4683_v35 = vadd.f32 %v4644_v52, %v4294_v47  ;;  %v4646_v21 = vpop.f32.mrb[173].mxu0 }
 0x578   : > { %v4647_v22 = vpop.f32.mrb[174].mxu0 }
 0x579   : > { %v4724_v44 = vadd.f32 %v7708_v11, %v4683_v35  ;;  %v4684_v6 = vadd.f32 %v4647_v22, %v4297_v10  ;;  %v4649_v20 = vpop.f32.mrb[175].mxu0 }
 0x57b   : > { %v4758_v50 = vmax.f32 %v4724_v44, 0.0  ;;  %v4725_v51 = vadd.f32 %v7708_v11, %v4684_v6 }
 0x57d   : > { %4792 = vst.msk [vmem:[%s7714_s20 + $0x100] sm:$0xff] %vm502_vm0, %v4758_v50  ;;  %v4759_v13 = vmax.f32 %v4725_v51, 0.0 }
 0x57f   : > { %4793 = vst.msk [vmem:[%s7714_s20 + $0x108] sm:$0xff] %vm502_vm0, %v4759_v13 }
 0x580 PF: > { %s17_s24 = sadd.s32 1, %s5971_s24  }
 0x581   : > { %p14_p4 = scmp.ge.s32.totalorder %s17_s24, 4  }
 0x583   :  { %16 = sbr.rel (!%p14_p4) target bundleno = 1 (0x1), region = 87 }

</bundles_post_ra>
